<compile_context>
chip_gen: v7x
topology: tpu7x:2x2x1
jax: 0.10.0
libtpu: 0.0.40
codegen_flags: <defaults>
</compile_context>

<pallas_src>
import functools

import numpy as np
import jax
import jax.numpy as jnp
from jax.experimental import pallas as pl
from jax.experimental.pallas import tpu as pltpu


# --------------------------------------------------------------------------- #
# Trace-time constants (numpy)
# --------------------------------------------------------------------------- #

def _blur_matrix(H, W):
    """Dense spatial operator of `downsamp`: reflect-pad-1 + 3x3 [1,2,1]^2/16
    blur + stride-2 decimation, as a (Ho*Wo, H*W) matrix."""
    Ho = (H - 1) // 2 + 1
    Wo = (W - 1) // 2 + 1
    f1 = np.array([1.0, 2.0, 1.0], np.float64)
    f2 = np.outer(f1, f1)
    f2 = f2 / f2.sum()

    def refl(i, n):  # ReflectionPad2d(1) index map
        if i < 0:
            return -i
        if i >= n:
            return 2 * n - 2 - i
        return i

    B = np.zeros((Ho * Wo, H * W), np.float32)
    for ho in range(Ho):
        for wo in range(Wo):
            r = ho * Wo + wo
            for dy in range(3):
                for dx in range(3):
                    h = refl(2 * ho + dy - 1, H)
                    w = refl(2 * wo + dx - 1, W)
                    B[r, h * W + w] += f2[dy, dx]
    return B, Ho, Wo


def _dx_masks(H, W):
    """Row-validity masks for the horizontal 3x3 taps (zero padding)."""
    w_idx = np.arange(H * W) % W
    mask_l = (w_idx >= 1).astype(np.float32).reshape(H * W, 1)       # tap dx = -1
    mask_r = (w_idx <= W - 2).astype(np.float32).reshape(H * W, 1)   # tap dx = +1
    return mask_l, mask_r


# --------------------------------------------------------------------------- #
# Fused ResidualDownSample kernel (one grid step == one image)
# --------------------------------------------------------------------------- #

def _res_down_kernel(x_ref, ml_ref, mr_ref, bmat_ref, w1_ref, w3_ref, wt_ref,
                     wb_ref, alpha_ref, o_ref, pad_ref, *, W, M, C, P):
    # x_ref: (M, C) one image, channels on lanes.  o_ref: (Mo, 2C).
    x = x_ref[...]
    a1 = alpha_ref[0]                       # PReLU alphas from SMEM (scalar path)
    a2 = alpha_ref[1]

    # ---- 1x1 conv + PReLU (MXU + VPU, stays in VMEM) -----------------------
    y1 = jnp.dot(x, w1_ref[...], preferred_element_type=jnp.float32)
    y1 = jnp.where(y1 >= 0, y1, a1 * y1)

    # ---- 3x3 conv (zero pad 1) + PReLU -------------------------------------
    # Nine shifted views of a zero-padded VMEM scratch; no HBM im2col.
    zeros_band = jnp.zeros((P, C), jnp.float32)
    pad_ref[0:P, :] = zeros_band
    pad_ref[P + M:P + M + P, :] = zeros_band
    pad_ref[P:P + M, :] = y1

    ml = ml_ref[...]                        # (M, 1) valid when w-1 >= 0
    mr = mr_ref[...]                        # (M, 1) valid when w+1 <= W-1
    acc = jnp.zeros((M, C), jnp.float32)
    k = 0
    for ky in range(3):
        for kx in range(3):
            s = (ky - 1) * W + (kx - 1)
            win = pad_ref[P + s:P + s + M, :]          # (M, C) shifted window
            if kx == 0:
                win = win * ml
            elif kx == 2:
                win = win * mr
            # At C >= 128 these 9 windows would be packed along lanes into a
            # single (M, 9C) @ (9C, C) matmul; at C = 4 the MXU accumulation of
            # 9 tiny-K dots is cheaper than the sub-tile lane packing.
            acc = acc + jnp.dot(win, w3_ref[k], preferred_element_type=jnp.float32)
            k += 1
    y2 = jnp.where(acc >= 0, acc, a2 * acc)

    # ---- blur-pool (reflect + taps + stride-2) folded into B, dual 1x1 + add
    #   out = B @ (y2 @ Wt + x @ Wb)  ==  conv1x1(blur(y2)) + conv1x1(blur(x))
    t = jnp.dot(y2, wt_ref[...], preferred_element_type=jnp.float32)
    t = t + jnp.dot(x, wb_ref[...], preferred_element_type=jnp.float32)
    out = jnp.dot(bmat_ref[...], t, preferred_element_type=jnp.float32)
    o_ref[...] = out.astype(o_ref.dtype)


def residual_downsample_block(x, p, H, W):
    """One fused ResidualDownSample block.

    x: (N, H*W, C) rows flattened NHWC (channels on the lane axis).
    p: PyTorch-layout parameters (see init_downsample_params).
    Returns (out (N, Ho*Wo, 2C), Ho, Wo).
    """
    N, M, C = x.shape
    assert M == H * W
    Co = 2 * C

    # constant spatial operators (built in numpy at trace time)
    B_np, Ho, Wo = _blur_matrix(H, W)
    Mo = Ho * Wo
    mask_l, mask_r = _dx_masks(H, W)
    P = ((W + 1 + 7) // 8) * 8              # sublane-aligned halo pad for the scratch

    # PyTorch Conv2d / PReLU layouts -> matmul layouts
    w1 = jnp.transpose(p["w1"][:, :, 0, 0])                      # (Cin, Cout)
    w3 = jnp.transpose(p["w3"], (2, 3, 1, 0)).reshape(9, C, C)   # (ky*3+kx, Cin, Cout)
    wt = jnp.transpose(p["wt"][:, :, 0, 0])                      # (Cin, 2C)
    wb = jnp.transpose(p["wb"][:, :, 0, 0])                      # (Cin, 2C)
    alphas = jnp.stack([p["a1"], p["a2"]]).astype(jnp.float32)   # (2,) -> SMEM

    kernel = functools.partial(_res_down_kernel, W=W, M=M, C=C, P=P)
    out = pl.pallas_call(
        kernel,
        out_shape=jax.ShapeDtypeStruct((N, Mo, Co), x.dtype),
        grid=(N,),
        in_specs=[
            pl.BlockSpec((None, M, C), lambda n: (n, 0, 0)),      # x: one image/step
            pl.BlockSpec((M, 1), lambda n: (0, 0)),               # mask dx = -1
            pl.BlockSpec((M, 1), lambda n: (0, 0)),               # mask dx = +1
            pl.BlockSpec((Mo, M), lambda n: (0, 0)),              # blur-pool matrix B
            pl.BlockSpec((C, C), lambda n: (0, 0)),               # w1
            pl.BlockSpec((9, C, C), lambda n: (0, 0, 0)),         # w3
            pl.BlockSpec((C, Co), lambda n: (0, 0)),              # wt
            pl.BlockSpec((C, Co), lambda n: (0, 0)),              # wb
            pl.BlockSpec(memory_space=pltpu.MemorySpace.SMEM),    # PReLU alphas
        ],
        out_specs=pl.BlockSpec((None, Mo, Co), lambda n: (n, 0, 0)),
        scratch_shapes=[pltpu.VMEM((M + 2 * P, C), jnp.float32)],
        compiler_params=pltpu.CompilerParams(
            dimension_semantics=("parallel",)),
    )(x, jnp.asarray(mask_l), jnp.asarray(mask_r), jnp.asarray(B_np),
      w1, w3, wt, wb, alphas)
    return out, Ho, Wo


@jax.jit
def downsample_forward(x_nchw, params):
    """DownSample: stack of ResidualDownSample blocks.  NCHW in -> NCHW out."""
    N, C, H, W = x_nchw.shape
    x = jnp.transpose(x_nchw, (0, 2, 3, 1)).reshape(N, H * W, C)
    for p in params:
        x, H, W = residual_downsample_block(x, p, H, W)
    C = x.shape[-1]
    out = x.reshape(N, H, W, C)
    return jnp.transpose(out, (0, 3, 1, 2))


# --------------------------------------------------------------------------- #
# Synthetic parameters (PyTorch Conv2d / PReLU layouts, bias=False)
# --------------------------------------------------------------------------- #

def init_downsample_params(key, in_channels, scale_factor):
    n_blocks = int(np.log2(scale_factor))
    params = []
    C = in_channels
    for _ in range(n_blocks):
        key, k1, k2, k3, k4 = jax.random.split(key, 5)
        params.append({
            "w1": jax.random.normal(k1, (C, C, 1, 1), jnp.float32) * 0.1,      # Conv2d 1x1
            "a1": jnp.float32(0.25),                                           # PReLU()
            "w3": jax.random.normal(k2, (C, C, 3, 3), jnp.float32) * 0.1,      # Conv2d 3x3
            "a2": jnp.float32(0.25),                                           # PReLU()
            "wt": jax.random.normal(k3, (2 * C, C, 1, 1), jnp.float32) * 0.1,  # top tail 1x1
            "wb": jax.random.normal(k4, (2 * C, C, 1, 1), jnp.float32) * 0.1,  # bot tail 1x1
        })
        C *= 2
    return params


# --------------------------------------------------------------------------- #
# Pure-JAX reference (mirrors the PyTorch module) for a correctness check
# --------------------------------------------------------------------------- #

def _prelu(x, a):
    return jnp.where(x >= 0, x, a * x)


def _conv2d_ref(x, w, stride=1, padding=0, groups=1):
    return jax.lax.conv_general_dilated(
        x, w, window_strides=(stride, stride),
        padding=((padding, padding), (padding, padding)),
        dimension_numbers=("NCHW", "OIHW", "NCHW"),
        feature_group_count=groups,
        precision=jax.lax.Precision.HIGHEST)


def _blurpool_ref(x):
    C = x.shape[1]
    f1 = np.array([1.0, 2.0, 1.0], np.float32)
    f2 = np.outer(f1, f1)
    f2 = f2 / f2.sum()
    w = jnp.asarray(np.tile(f2[None, None], (C, 1, 1, 1)))
    xp = jnp.pad(x, ((0, 0), (0, 0), (1, 1), (1, 1)), mode="reflect")
    return _conv2d_ref(xp, w, stride=2, padding=0, groups=C)


def residual_downsample_ref(x, p):
    y = _prelu(_conv2d_ref(x, p["w1"]), p["a1"])
    y = _prelu(_conv2d_ref(y, p["w3"], padding=1), p["a2"])
    top = _conv2d_ref(_blurpool_ref(y), p["wt"])
    bot = _conv2d_ref(_blurpool_ref(x), p["wb"])
    return top + bot


def downsample_forward_ref(x_nchw, params):
    for p in params:
        x_nchw = residual_downsample_ref(x_nchw, p)
    return x_nchw


# --------------------------------------------------------------------------- #

if __name__ == "__main__":
    key = jax.random.PRNGKey(0)
    kx, kp = jax.random.split(key)

    # PyTorch-style NCHW input, small shapes
    N, C, H, W = 2, 4, 16, 16
    scale_factor = 4                      # log2 -> 2 ResidualDownSample blocks
    x_nchw = jax.random.normal(kx, (N, C, H, W), jnp.float32)
    params = init_downsample_params(kp, C, scale_factor)

    out = downsample_forward(x_nchw, params)
    out = jax.block_until_ready(out)

    # two blocks: spatial /4, channels x4 (NCHW output, like the PyTorch module)
    assert out.shape == (N, C * scale_factor, H // scale_factor, W // scale_factor), out.shape
    assert bool(jnp.isfinite(out).all())

    ref = downsample_forward_ref(x_nchw, params)
    np.testing.assert_allclose(np.asarray(out), np.asarray(ref), rtol=5e-2, atol=5e-3)

    print("KERNEL_OK")
</pallas_src>

<mosaic_0001>
module attributes {stable_mosaic.version = 11 : i64} {
  func.func @_res_down_kernel(%arg0: i32, %arg1: memref<1x256x4xf32, #tpu.memory_space<vmem>>, %arg2: memref<256x1xf32, #tpu.memory_space<vmem>>, %arg3: memref<256x1xf32, #tpu.memory_space<vmem>>, %arg4: memref<64x256xf32, #tpu.memory_space<vmem>>, %arg5: memref<4x4xf32, #tpu.memory_space<vmem>>, %arg6: memref<9x4x4xf32, #tpu.memory_space<vmem>>, %arg7: memref<4x8xf32, #tpu.memory_space<vmem>>, %arg8: memref<4x8xf32, #tpu.memory_space<vmem>>, %arg9: memref<2xf32, #tpu.memory_space<smem>>, %arg10: memref<1x64x8xf32, #tpu.memory_space<vmem>>, %arg11: memref<304x4xf32, #tpu.memory_space<vmem>>) attributes {dimension_semantics = [#tpu.dimension_semantics<parallel>], iteration_bounds = array<i64: 2>, scalar_prefetch = 0 : i64, scratch_operands = 1 : i64, tpu.core_type = #tpu.core_type<tc>, window_params = [{transform_indices = @transform_0, window_bounds = array<i64: 1, 256, 4>}, {pipeline_mode = #tpu.pipeline_mode<synchronous>, transform_indices = @transform_1, window_bounds = array<i64: 256, 1>}, {pipeline_mode = #tpu.pipeline_mode<synchronous>, transform_indices = @transform_2, window_bounds = array<i64: 256, 1>}, {pipeline_mode = #tpu.pipeline_mode<synchronous>, transform_indices = @transform_3, window_bounds = array<i64: 64, 256>}, {pipeline_mode = #tpu.pipeline_mode<synchronous>, transform_indices = @transform_4, window_bounds = array<i64: 4, 4>}, {pipeline_mode = #tpu.pipeline_mode<synchronous>, transform_indices = @transform_5, window_bounds = array<i64: 9, 4, 4>}, {pipeline_mode = #tpu.pipeline_mode<synchronous>, transform_indices = @transform_6, window_bounds = array<i64: 4, 8>}, {pipeline_mode = #tpu.pipeline_mode<synchronous>, transform_indices = @transform_7, window_bounds = array<i64: 4, 8>}, {transform_indices = @transform_8, window_bounds = array<i64: 2>}, {transform_indices = @transform_9, window_bounds = array<i64: 1, 64, 8>}]} {
    %c0 = arith.constant 0 : index
    %c0_0 = arith.constant 0 : index
    %c0_1 = arith.constant 0 : index
    %0 = vector.load %arg1[%c0, %c0_0, %c0_1] : memref<1x256x4xf32, #tpu.memory_space<vmem>>, vector<1x256x4xf32>
    %1 = vector.shape_cast %0 : vector<1x256x4xf32> to vector<256x4xf32>
    %c0_2 = arith.constant 0 : index
    %2 = memref.load %arg9[%c0_2] : memref<2xf32, #tpu.memory_space<smem>>
    %c1 = arith.constant 1 : index
    %3 = memref.load %arg9[%c1] : memref<2xf32, #tpu.memory_space<smem>>
    %c0_3 = arith.constant 0 : index
    %c0_4 = arith.constant 0 : index
    %4 = vector.load %arg5[%c0_3, %c0_4] : memref<4x4xf32, #tpu.memory_space<vmem>>, vector<4x4xf32>
    %cst = arith.constant dense<0.000000e+00> : vector<256x4xf32>
    %5 = tpu.matmul %1, %4, %cst {dimension_numbers = #tpu.dot_dimension_numbers<[1], [0], [0], [1], [0, 0, 1, 1], [], []>} : vector<256x4xf32>, vector<4x4xf32>, vector<256x4xf32> -> vector<256x4xf32>
    %cst_5 = arith.constant 0.000000e+00 : f32
    %6 = vector.broadcast %cst_5 : f32 to vector<256x4xf32>
    %7 = arith.cmpf oge, %5, %6 : vector<256x4xf32>
    %8 = vector.broadcast %2 : f32 to vector<256x4xf32>
    %9 = arith.mulf %8, %5 : vector<256x4xf32>
    %10 = arith.select %7, %5, %9 : vector<256x4xi1>, vector<256x4xf32>
    %cst_6 = arith.constant 0.000000e+00 : f32
    %11 = vector.broadcast %cst_6 : f32 to vector<24x4xf32>
    %c0_7 = arith.constant 0 : index
    %c0_8 = arith.constant 0 : index
    %12 = vector.load %arg11[%c0_7, %c0_8] : memref<304x4xf32, #tpu.memory_space<vmem>>, vector<24x4xf32>
    tpu.vector_store %arg11[%c0_7, %c0_8], %11 {strides = array<i32>} : memref<304x4xf32, #tpu.memory_space<vmem>>, vector<24x4xf32>,
    %c280 = arith.constant 280 : index
    %c0_9 = arith.constant 0 : index
    %13 = vector.load %arg11[%c280, %c0_9] : memref<304x4xf32, #tpu.memory_space<vmem>>, vector<24x4xf32>
    tpu.vector_store %arg11[%c280, %c0_9], %11 {strides = array<i32>} : memref<304x4xf32, #tpu.memory_space<vmem>>, vector<24x4xf32>,
    %c24 = arith.constant 24 : index
    %c0_10 = arith.constant 0 : index
    %14 = vector.load %arg11[%c24, %c0_10] : memref<304x4xf32, #tpu.memory_space<vmem>>, vector<256x4xf32>
    tpu.vector_store %arg11[%c24, %c0_10], %10 {strides = array<i32>} : memref<304x4xf32, #tpu.memory_space<vmem>>, vector<256x4xf32>,
    %c0_11 = arith.constant 0 : index
    %c0_12 = arith.constant 0 : index
    %15 = vector.load %arg2[%c0_11, %c0_12] : memref<256x1xf32, #tpu.memory_space<vmem>>, vector<256x1xf32>
    %c0_13 = arith.constant 0 : index
    %c0_14 = arith.constant 0 : index
    %16 = vector.load %arg3[%c0_13, %c0_14] : memref<256x1xf32, #tpu.memory_space<vmem>>, vector<256x1xf32>
    %cst_15 = arith.constant 0.000000e+00 : f32
    %17 = vector.broadcast %cst_15 : f32 to vector<256x4xf32>
    %c7 = arith.constant 7 : index
    %c0_16 = arith.constant 0 : index
    %18 = vector.load %arg11[%c7, %c0_16] : memref<304x4xf32, #tpu.memory_space<vmem>>, vector<256x4xf32>
    %19 = vector.broadcast %15 : vector<256x1xf32> to vector<256x4xf32>
    %20 = arith.mulf %18, %19 : vector<256x4xf32>
    %c0_17 = arith.constant 0 : index
    %c0_18 = arith.constant 0 : index
    %c0_19 = arith.constant 0 : index
    %21 = vector.load %arg6[%c0_17, %c0_18, %c0_19] : memref<9x4x4xf32, #tpu.memory_space<vmem>>, vector<1x4x4xf32>
    %22 = vector.shape_cast %21 : vector<1x4x4xf32> to vector<4x4xf32>
    %cst_20 = arith.constant dense<0.000000e+00> : vector<256x4xf32>
    %23 = tpu.matmul %20, %22, %cst_20 {dimension_numbers = #tpu.dot_dimension_numbers<[1], [0], [0], [1], [0, 0, 1, 1], [], []>} : vector<256x4xf32>, vector<4x4xf32>, vector<256x4xf32> -> vector<256x4xf32>
    %24 = arith.addf %17, %23 : vector<256x4xf32>
    %c8 = arith.constant 8 : index
    %c0_21 = arith.constant 0 : index
    %25 = vector.load %arg11[%c8, %c0_21] : memref<304x4xf32, #tpu.memory_space<vmem>>, vector<256x4xf32>
    %c1_22 = arith.constant 1 : index
    %c0_23 = arith.constant 0 : index
    %c0_24 = arith.constant 0 : index
    %26 = vector.load %arg6[%c1_22, %c0_23, %c0_24] : memref<9x4x4xf32, #tpu.memory_space<vmem>>, vector<1x4x4xf32>
    %27 = vector.shape_cast %26 : vector<1x4x4xf32> to vector<4x4xf32>
    %cst_25 = arith.constant dense<0.000000e+00> : vector<256x4xf32>
    %28 = tpu.matmul %25, %27, %cst_25 {dimension_numbers = #tpu.dot_dimension_numbers<[1], [0], [0], [1], [0, 0, 1, 1], [], []>} : vector<256x4xf32>, vector<4x4xf32>, vector<256x4xf32> -> vector<256x4xf32>
    %29 = arith.addf %24, %28 : vector<256x4xf32>
    %c9 = arith.constant 9 : index
    %c0_26 = arith.constant 0 : index
    %30 = vector.load %arg11[%c9, %c0_26] : memref<304x4xf32, #tpu.memory_space<vmem>>, vector<256x4xf32>
    %31 = vector.broadcast %16 : vector<256x1xf32> to vector<256x4xf32>
    %32 = arith.mulf %30, %31 : vector<256x4xf32>
    %c2 = arith.constant 2 : index
    %c0_27 = arith.constant 0 : index
    %c0_28 = arith.constant 0 : index
    %33 = vector.load %arg6[%c2, %c0_27, %c0_28] : memref<9x4x4xf32, #tpu.memory_space<vmem>>, vector<1x4x4xf32>
    %34 = vector.shape_cast %33 : vector<1x4x4xf32> to vector<4x4xf32>
    %cst_29 = arith.constant dense<0.000000e+00> : vector<256x4xf32>
    %35 = tpu.matmul %32, %34, %cst_29 {dimension_numbers = #tpu.dot_dimension_numbers<[1], [0], [0], [1], [0, 0, 1, 1], [], []>} : vector<256x4xf32>, vector<4x4xf32>, vector<256x4xf32> -> vector<256x4xf32>
    %36 = arith.addf %29, %35 : vector<256x4xf32>
    %c23 = arith.constant 23 : index
    %c0_30 = arith.constant 0 : index
    %37 = vector.load %arg11[%c23, %c0_30] : memref<304x4xf32, #tpu.memory_space<vmem>>, vector<256x4xf32>
    %38 = vector.broadcast %15 : vector<256x1xf32> to vector<256x4xf32>
    %39 = arith.mulf %37, %38 : vector<256x4xf32>
    %c3 = arith.constant 3 : index
    %c0_31 = arith.constant 0 : index
    %c0_32 = arith.constant 0 : index
    %40 = vector.load %arg6[%c3, %c0_31, %c0_32] : memref<9x4x4xf32, #tpu.memory_space<vmem>>, vector<1x4x4xf32>
    %41 = vector.shape_cast %40 : vector<1x4x4xf32> to vector<4x4xf32>
    %cst_33 = arith.constant dense<0.000000e+00> : vector<256x4xf32>
    %42 = tpu.matmul %39, %41, %cst_33 {dimension_numbers = #tpu.dot_dimension_numbers<[1], [0], [0], [1], [0, 0, 1, 1], [], []>} : vector<256x4xf32>, vector<4x4xf32>, vector<256x4xf32> -> vector<256x4xf32>
    %43 = arith.addf %36, %42 : vector<256x4xf32>
    %c24_34 = arith.constant 24 : index
    %c0_35 = arith.constant 0 : index
    %44 = vector.load %arg11[%c24_34, %c0_35] : memref<304x4xf32, #tpu.memory_space<vmem>>, vector<256x4xf32>
    %c4 = arith.constant 4 : index
    %c0_36 = arith.constant 0 : index
    %c0_37 = arith.constant 0 : index
    %45 = vector.load %arg6[%c4, %c0_36, %c0_37] : memref<9x4x4xf32, #tpu.memory_space<vmem>>, vector<1x4x4xf32>
    %46 = vector.shape_cast %45 : vector<1x4x4xf32> to vector<4x4xf32>
    %cst_38 = arith.constant dense<0.000000e+00> : vector<256x4xf32>
    %47 = tpu.matmul %44, %46, %cst_38 {dimension_numbers = #tpu.dot_dimension_numbers<[1], [0], [0], [1], [0, 0, 1, 1], [], []>} : vector<256x4xf32>, vector<4x4xf32>, vector<256x4xf32> -> vector<256x4xf32>
    %48 = arith.addf %43, %47 : vector<256x4xf32>
    %c25 = arith.constant 25 : index
    %c0_39 = arith.constant 0 : index
    %49 = vector.load %arg11[%c25, %c0_39] : memref<304x4xf32, #tpu.memory_space<vmem>>, vector<256x4xf32>
    %50 = vector.broadcast %16 : vector<256x1xf32> to vector<256x4xf32>
    %51 = arith.mulf %49, %50 : vector<256x4xf32>
    %c5 = arith.constant 5 : index
    %c0_40 = arith.constant 0 : index
    %c0_41 = arith.constant 0 : index
    %52 = vector.load %arg6[%c5, %c0_40, %c0_41] : memref<9x4x4xf32, #tpu.memory_space<vmem>>, vector<1x4x4xf32>
    %53 = vector.shape_cast %52 : vector<1x4x4xf32> to vector<4x4xf32>
    %cst_42 = arith.constant dense<0.000000e+00> : vector<256x4xf32>
    %54 = tpu.matmul %51, %53, %cst_42 {dimension_numbers = #tpu.dot_dimension_numbers<[1], [0], [0], [1], [0, 0, 1, 1], [], []>} : vector<256x4xf32>, vector<4x4xf32>, vector<256x4xf32> -> vector<256x4xf32>
    %55 = arith.addf %48, %54 : vector<256x4xf32>
    %c39 = arith.constant 39 : index
    %c0_43 = arith.constant 0 : index
    %56 = vector.load %arg11[%c39, %c0_43] : memref<304x4xf32, #tpu.memory_space<vmem>>, vector<256x4xf32>
    %57 = vector.broadcast %15 : vector<256x1xf32> to vector<256x4xf32>
    %58 = arith.mulf %56, %57 : vector<256x4xf32>
    %c6 = arith.constant 6 : index
    %c0_44 = arith.constant 0 : index
    %c0_45 = arith.constant 0 : index
    %59 = vector.load %arg6[%c6, %c0_44, %c0_45] : memref<9x4x4xf32, #tpu.memory_space<vmem>>, vector<1x4x4xf32>
    %60 = vector.shape_cast %59 : vector<1x4x4xf32> to vector<4x4xf32>
    %cst_46 = arith.constant dense<0.000000e+00> : vector<256x4xf32>
    %61 = tpu.matmul %58, %60, %cst_46 {dimension_numbers = #tpu.dot_dimension_numbers<[1], [0], [0], [1], [0, 0, 1, 1], [], []>} : vector<256x4xf32>, vector<4x4xf32>, vector<256x4xf32> -> vector<256x4xf32>
    %62 = arith.addf %55, %61 : vector<256x4xf32>
    %c40 = arith.constant 40 : index
    %c0_47 = arith.constant 0 : index
    %63 = vector.load %arg11[%c40, %c0_47] : memref<304x4xf32, #tpu.memory_space<vmem>>, vector<256x4xf32>
    %c7_48 = arith.constant 7 : index
    %c0_49 = arith.constant 0 : index
    %c0_50 = arith.constant 0 : index
    %64 = vector.load %arg6[%c7_48, %c0_49, %c0_50] : memref<9x4x4xf32, #tpu.memory_space<vmem>>, vector<1x4x4xf32>
    %65 = vector.shape_cast %64 : vector<1x4x4xf32> to vector<4x4xf32>
    %cst_51 = arith.constant dense<0.000000e+00> : vector<256x4xf32>
    %66 = tpu.matmul %63, %65, %cst_51 {dimension_numbers = #tpu.dot_dimension_numbers<[1], [0], [0], [1], [0, 0, 1, 1], [], []>} : vector<256x4xf32>, vector<4x4xf32>, vector<256x4xf32> -> vector<256x4xf32>
    %67 = arith.addf %62, %66 : vector<256x4xf32>
    %c41 = arith.constant 41 : index
    %c0_52 = arith.constant 0 : index
    %68 = vector.load %arg11[%c41, %c0_52] : memref<304x4xf32, #tpu.memory_space<vmem>>, vector<256x4xf32>
    %69 = vector.broadcast %16 : vector<256x1xf32> to vector<256x4xf32>
    %70 = arith.mulf %68, %69 : vector<256x4xf32>
    %c8_53 = arith.constant 8 : index
    %c0_54 = arith.constant 0 : index
    %c0_55 = arith.constant 0 : index
    %71 = vector.load %arg6[%c8_53, %c0_54, %c0_55] : memref<9x4x4xf32, #tpu.memory_space<vmem>>, vector<1x4x4xf32>
    %72 = vector.shape_cast %71 : vector<1x4x4xf32> to vector<4x4xf32>
    %cst_56 = arith.constant dense<0.000000e+00> : vector<256x4xf32>
    %73 = tpu.matmul %70, %72, %cst_56 {dimension_numbers = #tpu.dot_dimension_numbers<[1], [0], [0], [1], [0, 0, 1, 1], [], []>} : vector<256x4xf32>, vector<4x4xf32>, vector<256x4xf32> -> vector<256x4xf32>
    %74 = arith.addf %67, %73 : vector<256x4xf32>
    %cst_57 = arith.constant 0.000000e+00 : f32
    %75 = vector.broadcast %cst_57 : f32 to vector<256x4xf32>
    %76 = arith.cmpf oge, %74, %75 : vector<256x4xf32>
    %77 = vector.broadcast %3 : f32 to vector<256x4xf32>
    %78 = arith.mulf %77, %74 : vector<256x4xf32>
    %79 = arith.select %76, %74, %78 : vector<256x4xi1>, vector<256x4xf32>
    %c0_58 = arith.constant 0 : index
    %c0_59 = arith.constant 0 : index
    %80 = vector.load %arg7[%c0_58, %c0_59] : memref<4x8xf32, #tpu.memory_space<vmem>>, vector<4x8xf32>
    %cst_60 = arith.constant dense<0.000000e+00> : vector<256x8xf32>
    %81 = tpu.matmul %79, %80, %cst_60 {dimension_numbers = #tpu.dot_dimension_numbers<[1], [0], [0], [1], [0, 0, 1, 1], [], []>} : vector<256x4xf32>, vector<4x8xf32>, vector<256x8xf32> -> vector<256x8xf32>
    %c0_61 = arith.constant 0 : index
    %c0_62 = arith.constant 0 : index
    %82 = vector.load %arg8[%c0_61, %c0_62] : memref<4x8xf32, #tpu.memory_space<vmem>>, vector<4x8xf32>
    %cst_63 = arith.constant dense<0.000000e+00> : vector<256x8xf32>
    %83 = tpu.matmul %1, %82, %cst_63 {dimension_numbers = #tpu.dot_dimension_numbers<[1], [0], [0], [1], [0, 0, 1, 1], [], []>} : vector<256x4xf32>, vector<4x8xf32>, vector<256x8xf32> -> vector<256x8xf32>
    %84 = arith.addf %81, %83 : vector<256x8xf32>
    %c0_64 = arith.constant 0 : index
    %c0_65 = arith.constant 0 : index
    %85 = vector.load %arg4[%c0_64, %c0_65] : memref<64x256xf32, #tpu.memory_space<vmem>>, vector<64x256xf32>
    %cst_66 = arith.constant dense<0.000000e+00> : vector<64x8xf32>
    %86 = tpu.matmul %85, %84, %cst_66 {dimension_numbers = #tpu.dot_dimension_numbers<[1], [0], [0], [1], [0, 0, 1, 1], [], []>} : vector<64x256xf32>, vector<256x8xf32>, vector<64x8xf32> -> vector<64x8xf32>
    %c0_67 = arith.constant 0 : index
    %c0_68 = arith.constant 0 : index
    %c0_69 = arith.constant 0 : index
    %87 = vector.load %arg10[%c0_67, %c0_68, %c0_69] : memref<1x64x8xf32, #tpu.memory_space<vmem>>, vector<1x64x8xf32>
    %88 = vector.shape_cast %87 : vector<1x64x8xf32> to vector<64x8xf32>
    %89 = vector.shape_cast %86 : vector<64x8xf32> to vector<1x64x8xf32>
    tpu.vector_store %arg10[%c0_67, %c0_68, %c0_69], %89 {strides = array<i32>} : memref<1x64x8xf32, #tpu.memory_space<vmem>>, vector<1x64x8xf32>,
    return
  }
  func.func @transform_0(%arg0: i32) -> (i32, i32, i32) {
    %c0_i32 = arith.constant 0 : i32
    %c0_i32_0 = arith.constant 0 : i32
    %c0_i32_1 = arith.constant 0 : i32
    return %arg0, %c0_i32, %c0_i32_0 : i32, i32, i32
  }
  func.func @transform_1(%arg0: i32) -> (i32, i32) {
    %c0_i32 = arith.constant 0 : i32
    %c0_i32_0 = arith.constant 0 : i32
    %c0_i32_1 = arith.constant 0 : i32
    return %c0_i32, %c0_i32_0 : i32, i32
  }
  func.func @transform_2(%arg0: i32) -> (i32, i32) {
    %c0_i32 = arith.constant 0 : i32
    %c0_i32_0 = arith.constant 0 : i32
    %c0_i32_1 = arith.constant 0 : i32
    return %c0_i32, %c0_i32_0 : i32, i32
  }
  func.func @transform_3(%arg0: i32) -> (i32, i32) {
    %c0_i32 = arith.constant 0 : i32
    %c0_i32_0 = arith.constant 0 : i32
    %c0_i32_1 = arith.constant 0 : i32
    return %c0_i32, %c0_i32_0 : i32, i32
  }
  func.func @transform_4(%arg0: i32) -> (i32, i32) {
    %c0_i32 = arith.constant 0 : i32
    %c0_i32_0 = arith.constant 0 : i32
    %c0_i32_1 = arith.constant 0 : i32
    return %c0_i32, %c0_i32_0 : i32, i32
  }
  func.func @transform_5(%arg0: i32) -> (i32, i32, i32) {
    %c0_i32 = arith.constant 0 : i32
    %c0_i32_0 = arith.constant 0 : i32
    %c0_i32_1 = arith.constant 0 : i32
    %c0_i32_2 = arith.constant 0 : i32
    return %c0_i32, %c0_i32_0, %c0_i32_1 : i32, i32, i32
  }
  func.func @transform_6(%arg0: i32) -> (i32, i32) {
    %c0_i32 = arith.constant 0 : i32
    %c0_i32_0 = arith.constant 0 : i32
    %c0_i32_1 = arith.constant 0 : i32
    return %c0_i32, %c0_i32_0 : i32, i32
  }
  func.func @transform_7(%arg0: i32) -> (i32, i32) {
    %c0_i32 = arith.constant 0 : i32
    %c0_i32_0 = arith.constant 0 : i32
    %c0_i32_1 = arith.constant 0 : i32
    return %c0_i32, %c0_i32_0 : i32, i32
  }
  func.func @transform_8(%arg0: i32) -> i32 {
    %c0_i32 = arith.constant 0 : i32
    %c0_i32_0 = arith.constant 0 : i32
    return %c0_i32 : i32
  }
  func.func @transform_9(%arg0: i32) -> (i32, i32, i32) {
    %c0_i32 = arith.constant 0 : i32
    %c0_i32_0 = arith.constant 0 : i32
    %c0_i32_1 = arith.constant 0 : i32
    return %arg0, %c0_i32, %c0_i32_0 : i32, i32, i32
  }
}

module attributes {stable_mosaic.version = 11 : i64} {
  func.func @_res_down_kernel(%arg0: i32, %arg1: memref<1x64x8xf32, #tpu.memory_space<vmem>>, %arg2: memref<64x1xf32, #tpu.memory_space<vmem>>, %arg3: memref<64x1xf32, #tpu.memory_space<vmem>>, %arg4: memref<16x64xf32, #tpu.memory_space<vmem>>, %arg5: memref<8x8xf32, #tpu.memory_space<vmem>>, %arg6: memref<9x8x8xf32, #tpu.memory_space<vmem>>, %arg7: memref<8x16xf32, #tpu.memory_space<vmem>>, %arg8: memref<8x16xf32, #tpu.memory_space<vmem>>, %arg9: memref<2xf32, #tpu.memory_space<smem>>, %arg10: memref<1x16x16xf32, #tpu.memory_space<vmem>>, %arg11: memref<96x8xf32, #tpu.memory_space<vmem>>) attributes {dimension_semantics = [#tpu.dimension_semantics<parallel>], iteration_bounds = array<i64: 2>, scalar_prefetch = 0 : i64, scratch_operands = 1 : i64, tpu.core_type = #tpu.core_type<tc>, window_params = [{transform_indices = @transform_0, window_bounds = array<i64: 1, 64, 8>}, {pipeline_mode = #tpu.pipeline_mode<synchronous>, transform_indices = @transform_1, window_bounds = array<i64: 64, 1>}, {pipeline_mode = #tpu.pipeline_mode<synchronous>, transform_indices = @transform_2, window_bounds = array<i64: 64, 1>}, {pipeline_mode = #tpu.pipeline_mode<synchronous>, transform_indices = @transform_3, window_bounds = array<i64: 16, 64>}, {pipeline_mode = #tpu.pipeline_mode<synchronous>, transform_indices = @transform_4, window_bounds = array<i64: 8, 8>}, {pipeline_mode = #tpu.pipeline_mode<synchronous>, transform_indices = @transform_5, window_bounds = array<i64: 9, 8, 8>}, {pipeline_mode = #tpu.pipeline_mode<synchronous>, transform_indices = @transform_6, window_bounds = array<i64: 8, 16>}, {pipeline_mode = #tpu.pipeline_mode<synchronous>, transform_indices = @transform_7, window_bounds = array<i64: 8, 16>}, {transform_indices = @transform_8, window_bounds = array<i64: 2>}, {transform_indices = @transform_9, window_bounds = array<i64: 1, 16, 16>}]} {
    %c0 = arith.constant 0 : index
    %c0_0 = arith.constant 0 : index
    %c0_1 = arith.constant 0 : index
    %0 = vector.load %arg1[%c0, %c0_0, %c0_1] : memref<1x64x8xf32, #tpu.memory_space<vmem>>, vector<1x64x8xf32>
    %1 = vector.shape_cast %0 : vector<1x64x8xf32> to vector<64x8xf32>
    %c0_2 = arith.constant 0 : index
    %2 = memref.load %arg9[%c0_2] : memref<2xf32, #tpu.memory_space<smem>>
    %c1 = arith.constant 1 : index
    %3 = memref.load %arg9[%c1] : memref<2xf32, #tpu.memory_space<smem>>
    %c0_3 = arith.constant 0 : index
    %c0_4 = arith.constant 0 : index
    %4 = vector.load %arg5[%c0_3, %c0_4] : memref<8x8xf32, #tpu.memory_space<vmem>>, vector<8x8xf32>
    %cst = arith.constant dense<0.000000e+00> : vector<64x8xf32>
    %5 = tpu.matmul %1, %4, %cst {dimension_numbers = #tpu.dot_dimension_numbers<[1], [0], [0], [1], [0, 0, 1, 1], [], []>} : vector<64x8xf32>, vector<8x8xf32>, vector<64x8xf32> -> vector<64x8xf32>
    %cst_5 = arith.constant 0.000000e+00 : f32
    %6 = vector.broadcast %cst_5 : f32 to vector<64x8xf32>
    %7 = arith.cmpf oge, %5, %6 : vector<64x8xf32>
    %8 = vector.broadcast %2 : f32 to vector<64x8xf32>
    %9 = arith.mulf %8, %5 : vector<64x8xf32>
    %10 = arith.select %7, %5, %9 : vector<64x8xi1>, vector<64x8xf32>
    %cst_6 = arith.constant 0.000000e+00 : f32
    %11 = vector.broadcast %cst_6 : f32 to vector<16x8xf32>
    %c0_7 = arith.constant 0 : index
    %c0_8 = arith.constant 0 : index
    %12 = vector.load %arg11[%c0_7, %c0_8] : memref<96x8xf32, #tpu.memory_space<vmem>>, vector<16x8xf32>
    tpu.vector_store %arg11[%c0_7, %c0_8], %11 {strides = array<i32>} : memref<96x8xf32, #tpu.memory_space<vmem>>, vector<16x8xf32>,
    %c80 = arith.constant 80 : index
    %c0_9 = arith.constant 0 : index
    %13 = vector.load %arg11[%c80, %c0_9] : memref<96x8xf32, #tpu.memory_space<vmem>>, vector<16x8xf32>
    tpu.vector_store %arg11[%c80, %c0_9], %11 {strides = array<i32>} : memref<96x8xf32, #tpu.memory_space<vmem>>, vector<16x8xf32>,
    %c16 = arith.constant 16 : index
    %c0_10 = arith.constant 0 : index
    %14 = vector.load %arg11[%c16, %c0_10] : memref<96x8xf32, #tpu.memory_space<vmem>>, vector<64x8xf32>
    tpu.vector_store %arg11[%c16, %c0_10], %10 {strides = array<i32>} : memref<96x8xf32, #tpu.memory_space<vmem>>, vector<64x8xf32>,
    %c0_11 = arith.constant 0 : index
    %c0_12 = arith.constant 0 : index
    %15 = vector.load %arg2[%c0_11, %c0_12] : memref<64x1xf32, #tpu.memory_space<vmem>>, vector<64x1xf32>
    %c0_13 = arith.constant 0 : index
    %c0_14 = arith.constant 0 : index
    %16 = vector.load %arg3[%c0_13, %c0_14] : memref<64x1xf32, #tpu.memory_space<vmem>>, vector<64x1xf32>
    %cst_15 = arith.constant 0.000000e+00 : f32
    %17 = vector.broadcast %cst_15 : f32 to vector<64x8xf32>
    %c7 = arith.constant 7 : index
    %c0_16 = arith.constant 0 : index
    %18 = vector.load %arg11[%c7, %c0_16] : memref<96x8xf32, #tpu.memory_space<vmem>>, vector<64x8xf32>
    %19 = vector.broadcast %15 : vector<64x1xf32> to vector<64x8xf32>
    %20 = arith.mulf %18, %19 : vector<64x8xf32>
    %c0_17 = arith.constant 0 : index
    %c0_18 = arith.constant 0 : index
    %c0_19 = arith.constant 0 : index
    %21 = vector.load %arg6[%c0_17, %c0_18, %c0_19] : memref<9x8x8xf32, #tpu.memory_space<vmem>>, vector<1x8x8xf32>
    %22 = vector.shape_cast %21 : vector<1x8x8xf32> to vector<8x8xf32>
    %cst_20 = arith.constant dense<0.000000e+00> : vector<64x8xf32>
    %23 = tpu.matmul %20, %22, %cst_20 {dimension_numbers = #tpu.dot_dimension_numbers<[1], [0], [0], [1], [0, 0, 1, 1], [], []>} : vector<64x8xf32>, vector<8x8xf32>, vector<64x8xf32> -> vector<64x8xf32>
    %24 = arith.addf %17, %23 : vector<64x8xf32>
    %c8 = arith.constant 8 : index
    %c0_21 = arith.constant 0 : index
    %25 = vector.load %arg11[%c8, %c0_21] : memref<96x8xf32, #tpu.memory_space<vmem>>, vector<64x8xf32>
    %c1_22 = arith.constant 1 : index
    %c0_23 = arith.constant 0 : index
    %c0_24 = arith.constant 0 : index
    %26 = vector.load %arg6[%c1_22, %c0_23, %c0_24] : memref<9x8x8xf32, #tpu.memory_space<vmem>>, vector<1x8x8xf32>
    %27 = vector.shape_cast %26 : vector<1x8x8xf32> to vector<8x8xf32>
    %cst_25 = arith.constant dense<0.000000e+00> : vector<64x8xf32>
    %28 = tpu.matmul %25, %27, %cst_25 {dimension_numbers = #tpu.dot_dimension_numbers<[1], [0], [0], [1], [0, 0, 1, 1], [], []>} : vector<64x8xf32>, vector<8x8xf32>, vector<64x8xf32> -> vector<64x8xf32>
    %29 = arith.addf %24, %28 : vector<64x8xf32>
    %c9 = arith.constant 9 : index
    %c0_26 = arith.constant 0 : index
    %30 = vector.load %arg11[%c9, %c0_26] : memref<96x8xf32, #tpu.memory_space<vmem>>, vector<64x8xf32>
    %31 = vector.broadcast %16 : vector<64x1xf32> to vector<64x8xf32>
    %32 = arith.mulf %30, %31 : vector<64x8xf32>
    %c2 = arith.constant 2 : index
    %c0_27 = arith.constant 0 : index
    %c0_28 = arith.constant 0 : index
    %33 = vector.load %arg6[%c2, %c0_27, %c0_28] : memref<9x8x8xf32, #tpu.memory_space<vmem>>, vector<1x8x8xf32>
    %34 = vector.shape_cast %33 : vector<1x8x8xf32> to vector<8x8xf32>
    %cst_29 = arith.constant dense<0.000000e+00> : vector<64x8xf32>
    %35 = tpu.matmul %32, %34, %cst_29 {dimension_numbers = #tpu.dot_dimension_numbers<[1], [0], [0], [1], [0, 0, 1, 1], [], []>} : vector<64x8xf32>, vector<8x8xf32>, vector<64x8xf32> -> vector<64x8xf32>
    %36 = arith.addf %29, %35 : vector<64x8xf32>
    %c15 = arith.constant 15 : index
    %c0_30 = arith.constant 0 : index
    %37 = vector.load %arg11[%c15, %c0_30] : memref<96x8xf32, #tpu.memory_space<vmem>>, vector<64x8xf32>
    %38 = vector.broadcast %15 : vector<64x1xf32> to vector<64x8xf32>
    %39 = arith.mulf %37, %38 : vector<64x8xf32>
    %c3 = arith.constant 3 : index
    %c0_31 = arith.constant 0 : index
    %c0_32 = arith.constant 0 : index
    %40 = vector.load %arg6[%c3, %c0_31, %c0_32] : memref<9x8x8xf32, #tpu.memory_space<vmem>>, vector<1x8x8xf32>
    %41 = vector.shape_cast %40 : vector<1x8x8xf32> to vector<8x8xf32>
    %cst_33 = arith.constant dense<0.000000e+00> : vector<64x8xf32>
    %42 = tpu.matmul %39, %41, %cst_33 {dimension_numbers = #tpu.dot_dimension_numbers<[1], [0], [0], [1], [0, 0, 1, 1], [], []>} : vector<64x8xf32>, vector<8x8xf32>, vector<64x8xf32> -> vector<64x8xf32>
    %43 = arith.addf %36, %42 : vector<64x8xf32>
    %c16_34 = arith.constant 16 : index
    %c0_35 = arith.constant 0 : index
    %44 = vector.load %arg11[%c16_34, %c0_35] : memref<96x8xf32, #tpu.memory_space<vmem>>, vector<64x8xf32>
    %c4 = arith.constant 4 : index
    %c0_36 = arith.constant 0 : index
    %c0_37 = arith.constant 0 : index
    %45 = vector.load %arg6[%c4, %c0_36, %c0_37] : memref<9x8x8xf32, #tpu.memory_space<vmem>>, vector<1x8x8xf32>
    %46 = vector.shape_cast %45 : vector<1x8x8xf32> to vector<8x8xf32>
    %cst_38 = arith.constant dense<0.000000e+00> : vector<64x8xf32>
    %47 = tpu.matmul %44, %46, %cst_38 {dimension_numbers = #tpu.dot_dimension_numbers<[1], [0], [0], [1], [0, 0, 1, 1], [], []>} : vector<64x8xf32>, vector<8x8xf32>, vector<64x8xf32> -> vector<64x8xf32>
    %48 = arith.addf %43, %47 : vector<64x8xf32>
    %c17 = arith.constant 17 : index
    %c0_39 = arith.constant 0 : index
    %49 = vector.load %arg11[%c17, %c0_39] : memref<96x8xf32, #tpu.memory_space<vmem>>, vector<64x8xf32>
    %50 = vector.broadcast %16 : vector<64x1xf32> to vector<64x8xf32>
    %51 = arith.mulf %49, %50 : vector<64x8xf32>
    %c5 = arith.constant 5 : index
    %c0_40 = arith.constant 0 : index
    %c0_41 = arith.constant 0 : index
    %52 = vector.load %arg6[%c5, %c0_40, %c0_41] : memref<9x8x8xf32, #tpu.memory_space<vmem>>, vector<1x8x8xf32>
    %53 = vector.shape_cast %52 : vector<1x8x8xf32> to vector<8x8xf32>
    %cst_42 = arith.constant dense<0.000000e+00> : vector<64x8xf32>
    %54 = tpu.matmul %51, %53, %cst_42 {dimension_numbers = #tpu.dot_dimension_numbers<[1], [0], [0], [1], [0, 0, 1, 1], [], []>} : vector<64x8xf32>, vector<8x8xf32>, vector<64x8xf32> -> vector<64x8xf32>
    %55 = arith.addf %48, %54 : vector<64x8xf32>
    %c23 = arith.constant 23 : index
    %c0_43 = arith.constant 0 : index
    %56 = vector.load %arg11[%c23, %c0_43] : memref<96x8xf32, #tpu.memory_space<vmem>>, vector<64x8xf32>
    %57 = vector.broadcast %15 : vector<64x1xf32> to vector<64x8xf32>
    %58 = arith.mulf %56, %57 : vector<64x8xf32>
    %c6 = arith.constant 6 : index
    %c0_44 = arith.constant 0 : index
    %c0_45 = arith.constant 0 : index
    %59 = vector.load %arg6[%c6, %c0_44, %c0_45] : memref<9x8x8xf32, #tpu.memory_space<vmem>>, vector<1x8x8xf32>
    %60 = vector.shape_cast %59 : vector<1x8x8xf32> to vector<8x8xf32>
    %cst_46 = arith.constant dense<0.000000e+00> : vector<64x8xf32>
    %61 = tpu.matmul %58, %60, %cst_46 {dimension_numbers = #tpu.dot_dimension_numbers<[1], [0], [0], [1], [0, 0, 1, 1], [], []>} : vector<64x8xf32>, vector<8x8xf32>, vector<64x8xf32> -> vector<64x8xf32>
    %62 = arith.addf %55, %61 : vector<64x8xf32>
    %c24 = arith.constant 24 : index
    %c0_47 = arith.constant 0 : index
    %63 = vector.load %arg11[%c24, %c0_47] : memref<96x8xf32, #tpu.memory_space<vmem>>, vector<64x8xf32>
    %c7_48 = arith.constant 7 : index
    %c0_49 = arith.constant 0 : index
    %c0_50 = arith.constant 0 : index
    %64 = vector.load %arg6[%c7_48, %c0_49, %c0_50] : memref<9x8x8xf32, #tpu.memory_space<vmem>>, vector<1x8x8xf32>
    %65 = vector.shape_cast %64 : vector<1x8x8xf32> to vector<8x8xf32>
    %cst_51 = arith.constant dense<0.000000e+00> : vector<64x8xf32>
    %66 = tpu.matmul %63, %65, %cst_51 {dimension_numbers = #tpu.dot_dimension_numbers<[1], [0], [0], [1], [0, 0, 1, 1], [], []>} : vector<64x8xf32>, vector<8x8xf32>, vector<64x8xf32> -> vector<64x8xf32>
    %67 = arith.addf %62, %66 : vector<64x8xf32>
    %c25 = arith.constant 25 : index
    %c0_52 = arith.constant 0 : index
    %68 = vector.load %arg11[%c25, %c0_52] : memref<96x8xf32, #tpu.memory_space<vmem>>, vector<64x8xf32>
    %69 = vector.broadcast %16 : vector<64x1xf32> to vector<64x8xf32>
    %70 = arith.mulf %68, %69 : vector<64x8xf32>
    %c8_53 = arith.constant 8 : index
    %c0_54 = arith.constant 0 : index
    %c0_55 = arith.constant 0 : index
    %71 = vector.load %arg6[%c8_53, %c0_54, %c0_55] : memref<9x8x8xf32, #tpu.memory_space<vmem>>, vector<1x8x8xf32>
    %72 = vector.shape_cast %71 : vector<1x8x8xf32> to vector<8x8xf32>
    %cst_56 = arith.constant dense<0.000000e+00> : vector<64x8xf32>
    %73 = tpu.matmul %70, %72, %cst_56 {dimension_numbers = #tpu.dot_dimension_numbers<[1], [0], [0], [1], [0, 0, 1, 1], [], []>} : vector<64x8xf32>, vector<8x8xf32>, vector<64x8xf32> -> vector<64x8xf32>
    %74 = arith.addf %67, %73 : vector<64x8xf32>
    %cst_57 = arith.constant 0.000000e+00 : f32
    %75 = vector.broadcast %cst_57 : f32 to vector<64x8xf32>
    %76 = arith.cmpf oge, %74, %75 : vector<64x8xf32>
    %77 = vector.broadcast %3 : f32 to vector<64x8xf32>
    %78 = arith.mulf %77, %74 : vector<64x8xf32>
    %79 = arith.select %76, %74, %78 : vector<64x8xi1>, vector<64x8xf32>
    %c0_58 = arith.constant 0 : index
    %c0_59 = arith.constant 0 : index
    %80 = vector.load %arg7[%c0_58, %c0_59] : memref<8x16xf32, #tpu.memory_space<vmem>>, vector<8x16xf32>
    %cst_60 = arith.constant dense<0.000000e+00> : vector<64x16xf32>
    %81 = tpu.matmul %79, %80, %cst_60 {dimension_numbers = #tpu.dot_dimension_numbers<[1], [0], [0], [1], [0, 0, 1, 1], [], []>} : vector<64x8xf32>, vector<8x16xf32>, vector<64x16xf32> -> vector<64x16xf32>
    %c0_61 = arith.constant 0 : index
    %c0_62 = arith.constant 0 : index
    %82 = vector.load %arg8[%c0_61, %c0_62] : memref<8x16xf32, #tpu.memory_space<vmem>>, vector<8x16xf32>
    %cst_63 = arith.constant dense<0.000000e+00> : vector<64x16xf32>
    %83 = tpu.matmul %1, %82, %cst_63 {dimension_numbers = #tpu.dot_dimension_numbers<[1], [0], [0], [1], [0, 0, 1, 1], [], []>} : vector<64x8xf32>, vector<8x16xf32>, vector<64x16xf32> -> vector<64x16xf32>
    %84 = arith.addf %81, %83 : vector<64x16xf32>
    %c0_64 = arith.constant 0 : index
    %c0_65 = arith.constant 0 : index
    %85 = vector.load %arg4[%c0_64, %c0_65] : memref<16x64xf32, #tpu.memory_space<vmem>>, vector<16x64xf32>
    %cst_66 = arith.constant dense<0.000000e+00> : vector<16x16xf32>
    %86 = tpu.matmul %85, %84, %cst_66 {dimension_numbers = #tpu.dot_dimension_numbers<[1], [0], [0], [1], [0, 0, 1, 1], [], []>} : vector<16x64xf32>, vector<64x16xf32>, vector<16x16xf32> -> vector<16x16xf32>
    %c0_67 = arith.constant 0 : index
    %c0_68 = arith.constant 0 : index
    %c0_69 = arith.constant 0 : index
    %87 = vector.load %arg10[%c0_67, %c0_68, %c0_69] : memref<1x16x16xf32, #tpu.memory_space<vmem>>, vector<1x16x16xf32>
    %88 = vector.shape_cast %87 : vector<1x16x16xf32> to vector<16x16xf32>
    %89 = vector.shape_cast %86 : vector<16x16xf32> to vector<1x16x16xf32>
    tpu.vector_store %arg10[%c0_67, %c0_68, %c0_69], %89 {strides = array<i32>} : memref<1x16x16xf32, #tpu.memory_space<vmem>>, vector<1x16x16xf32>,
    return
  }
  func.func @transform_0(%arg0: i32) -> (i32, i32, i32) {
    %c0_i32 = arith.constant 0 : i32
    %c0_i32_0 = arith.constant 0 : i32
    %c0_i32_1 = arith.constant 0 : i32
    return %arg0, %c0_i32, %c0_i32_0 : i32, i32, i32
  }
  func.func @transform_1(%arg0: i32) -> (i32, i32) {
    %c0_i32 = arith.constant 0 : i32
    %c0_i32_0 = arith.constant 0 : i32
    %c0_i32_1 = arith.constant 0 : i32
    return %c0_i32, %c0_i32_0 : i32, i32
  }
  func.func @transform_2(%arg0: i32) -> (i32, i32) {
    %c0_i32 = arith.constant 0 : i32
    %c0_i32_0 = arith.constant 0 : i32
    %c0_i32_1 = arith.constant 0 : i32
    return %c0_i32, %c0_i32_0 : i32, i32
  }
  func.func @transform_3(%arg0: i32) -> (i32, i32) {
    %c0_i32 = arith.constant 0 : i32
    %c0_i32_0 = arith.constant 0 : i32
    %c0_i32_1 = arith.constant 0 : i32
    return %c0_i32, %c0_i32_0 : i32, i32
  }
  func.func @transform_4(%arg0: i32) -> (i32, i32) {
    %c0_i32 = arith.constant 0 : i32
    %c0_i32_0 = arith.constant 0 : i32
    %c0_i32_1 = arith.constant 0 : i32
    return %c0_i32, %c0_i32_0 : i32, i32
  }
  func.func @transform_5(%arg0: i32) -> (i32, i32, i32) {
    %c0_i32 = arith.constant 0 : i32
    %c0_i32_0 = arith.constant 0 : i32
    %c0_i32_1 = arith.constant 0 : i32
    %c0_i32_2 = arith.constant 0 : i32
    return %c0_i32, %c0_i32_0, %c0_i32_1 : i32, i32, i32
  }
  func.func @transform_6(%arg0: i32) -> (i32, i32) {
    %c0_i32 = arith.constant 0 : i32
    %c0_i32_0 = arith.constant 0 : i32
    %c0_i32_1 = arith.constant 0 : i32
    return %c0_i32, %c0_i32_0 : i32, i32
  }
  func.func @transform_7(%arg0: i32) -> (i32, i32) {
    %c0_i32 = arith.constant 0 : i32
    %c0_i32_0 = arith.constant 0 : i32
    %c0_i32_1 = arith.constant 0 : i32
    return %c0_i32, %c0_i32_0 : i32, i32
  }
  func.func @transform_8(%arg0: i32) -> i32 {
    %c0_i32 = arith.constant 0 : i32
    %c0_i32_0 = arith.constant 0 : i32
    return %c0_i32 : i32
  }
  func.func @transform_9(%arg0: i32) -> (i32, i32, i32) {
    %c0_i32 = arith.constant 0 : i32
    %c0_i32_0 = arith.constant 0 : i32
    %c0_i32_1 = arith.constant 0 : i32
    return %arg0, %c0_i32, %c0_i32_0 : i32, i32, i32
  }
}

</mosaic_0001>

<bundles_post_ra>
// kernel: downsample_forward.3
= control target key start
LH: loop header
LB: loop body
LE: loop exit
PB: predicated region body
PF: predicated region fallthrough
CT: control target
= control target key end

     0   :  { %14 = vsyncpa [#allocation5], 0  ;;  %s3648_s0 = inlined_call_operand.vmem [shape: f32[2,64,8], index: 0, kind: input, shape index: {}]   ;;  %s3649_s1 = inlined_call_operand.vmem [shape: f32[64,1], index: 1, kind: input, shape index: {}]   ;;  %s3650_s2 = inlined_call_operand.vmem [shape: f32[64,1], index: 2, kind: input, shape index: {}]   ;;  %s3651_s3 = inlined_call_operand.vmem [shape: f32[16,64], index: 3, kind: input, shape index: {}]   ;;  %s3652_s4 = inlined_call_operand.vmem [shape: f32[8,8], index: 4, kind: input, shape index: {}]   ;;  %s3653_s5 = inlined_call_operand.vmem [shape: f32[9,8,8], index: 5, kind: input, shape index: {}]   ;;  %s3654_s6 = inlined_call_operand.vmem [shape: f32[8,16], index: 6, kind: input, shape index: {}]   ;;  %s3655_s7 = inlined_call_operand.vmem [shape: f32[8,16], index: 7, kind: input, shape index: {}]   ;;  %s3656_s8 = inlined_call_operand.vmem [shape: f32[2], index: 8, kind: input, shape index: {}]   ;;  %s3657_s9 = inlined_call_operand.hbm [shape: f32[2,16,16], index: 9, kind: output, shape index: {}]  }
   0x1   :  { %15 = vsyncpa [#allocation4], 0 }
   0x2   :  { %17 = vsyncpa [#allocation4 + $0x1], 0  ;;  %s3120_s30 = smov 0   ;;  %s3122_s10 = smov 0  }
   0x3   :  { %s3124_s11 = smov 0   ;;  %s3126_s12 = smov 0  }
   0x4 LB: > { %s3141_s13 = sadd.s32 4294967295, %s3062_s12   ;;  %s2409_s14 = sadd.s32 4294967294, %s3062_s12   ;;  %s3062_s12 = sphi %s3126_s12, %s3664_s12   ;;  %s3058_s11 = sphi %s3124_s11, %s3663_s11   ;;  %s3054_s10 = sphi %s3122_s10, %s3662_s10   ;;  %s3050_s30 = sphi %s3120_s30, %s3661_s30  }
   0x5   : > { %s3145_s15 = sadd.s32 1, %s3062_s12   ;;  %s224_s16 = sadd.s32 1, %s3058_s11 }
   0x6   : > { %s221_s17 = ssub.s32 %s3062_s12, %s3145_s15  ;;  %p234_p0 = scmp.ne.s32.totalorder %s3058_s11, %s3054_s10 }
   0x7   : > { %p222_p1 = scmp.eq.s32.totalorder %s221_s17, 0  ;;  %p235_p2 = scmp.eq.s32.totalorder %s3141_s13, 1 }
   0x8   : > { %p240_p3 = scmp.ne.s32.totalorder %s3054_s10, %s3050_s30  ;;  %p241_p4 = scmp.eq.s32.totalorder %s2409_s14, 1 }
   0x9   : > { %s3156_s18 = scalar_select %p222_p1, %s3058_s11, %s224_s16  }
   0xa   : > { %p3158_p5 = por %p235_p2, %p234_p0  ;;  %p3162_p6 = por %p241_p4, %p240_p3 }
   0xb   : > { %p2410_p7 = scmp.ge.s32.totalorder %s3062_s12, 1  ;;  %p248_p8 = scmp.lt.s32.totalorder %s3062_s12, 3 }
   0xc   : > { %p2939_p9 = scmp.eq.s32.totalorder %s3141_s13, 0  ;;  %s282_s24 = sshll.u32 %s3656_s8, 4  ;;  %s283_s24 = int_to_ptr.vmem [resolvable:$true] %s282_s24 }
   0xd   : > { %p3169_p10 = pnand %p2410_p7, %p248_p8  ;;  %s2981_s25 = scalar_lea.vmem %s283_s24, 16 }
   0xe   : > { %p2982_p13 = scmp.ne.s32.totalorder %s283_s24, %s2981_s25  ;;  %p2989_p3 = scmp.lt.s32.totalorder %s283_s24, %s283_s24 }
   0xf   : > { %p2931_p11 = pneg %p3169_p10  ;;  %p2990_p4 = scmp.lt.s32.totalorder %s2981_s25, %s2981_s25 }
  0x11   : > { %p2932_p12 = pnand %p2939_p9, %p2931_p11  ;;  %p2991_p7 = por %p2990_p4, %p2989_p3 }
  0x13   : > { %p2983_p0 = pneg %p2932_p12 }
  0x15   : > { %p2984_p1 = pnand %p2983_p0, %p2982_p13 }
  0x17   : > { %p2985_p2 = pneg %p2984_p1 }
  0x19   : > { %p2992_p8 = pnand %p2991_p7, %p2985_p2 }
  0x1b   : > { %2995 = shalt.err (!%p2992_p8)
}
  0x1c   : > { %s3064_s26 = smov [#allocation3]   ;;  %303 = sbr.rel (%p3169_p10) target bundleno = 1032 (0x408), region = 56 }
  0x1d   : > { %2934 = dma.vmem_to_smem (!%p2932_p12), %s283_s24, 16, %s3064_s26, [#allocation5]  }
  0x23   : > { %3041 = dma.done.wait (%p2939_p9), [#allocation5], 16  }
  0x24   : > { %3043 = vsyncadd (%p2939_p9), [#allocation5], 4294967280 }
  0x25   : > { %309 = sfence }
  0x26   : > { %v355_v0 = vld [vmem:[%s3652_s4] sm:$0xff]  ;;  %p340_p11 = scmp.lt.s32.totalorder %s3141_s13, 1  ;;  %vm356_vm0 = vcmask 64512   ;;  %v3065_v2 = vmov 0   ;;  %v525_v3 = vld [vmem:[%s3649_s1 + $0x10] sm:$0xff]  ;;  %v3066_v4 = vmov 0.0  }
  0x27   : > { %v523_v1 = vld [vmem:[%s3649_s1] sm:$0xff]  ;;  %2650 = vmatprep.subr.mxu0 %v355_v0  ;;  %2979 = vset.pattern.permute.xlu0 %v3065_v2  ;;  %511 = vst.msk [vmem:[#allocation2] sm:$0xff] %vm356_vm0, %v3066_v4  ;;  %512 = vst.msk [vmem:[#allocation2 + $0x8] sm:$0xff] %vm356_vm0, %v3066_v4  ;;  %v524_v5 = vld [vmem:[%s3649_s1 + $0x8] sm:$0xff]  ;;  %s353_s26 = sld [smem:[#allocation3]]  ;;  %s2418_s14 = sld [smem:[#allocation3 + $0x1]] }
  0x28   : > { %2651 = vmatpush3.msra.mxu0 %v355_v0  ;;  %s341_s21 = scalar_select %p340_p11, %s3141_s13, 1  ;;  %549 = vperm.xlu0 %2979, %v523_v1   ;;  %513 = vst.msk [vmem:[#allocation2 + $0x50] sm:$0xff] %vm356_vm0, %v3066_v4  ;;  %514 = vst.msk [vmem:[#allocation2 + $0x58] sm:$0xff] %vm356_vm0, %v3066_v4  ;;  %v526_v6 = vld [vmem:[%s3649_s1 + $0x18] sm:$0xff]  ;;  %v527_v10 = vld [vmem:[%s3649_s1 + $0x20] sm:$0xff] }
  0x29   : > { %2980 = vset.pattern.permute.xlu1 %v3065_v2  ;;  %v528_v12 = vld [vmem:[%s3649_s1 + $0x28] sm:$0xff]  ;;  %v529_v14 = vld [vmem:[%s3649_s1 + $0x30] sm:$0xff]  ;;  %v530_v16 = vld [vmem:[%s3649_s1 + $0x38] sm:$0xff] }
  0x2a   : > { %s2530_s24 = sshll.u32 %s341_s21, 6  ;;  %559 = vperm.xlu1 %2980, %v525_v3   ;;  %v531_v18 = vld [vmem:[%s3650_s2] sm:$0xff]  ;;  %v532_v20 = vld [vmem:[%s3650_s2 + $0x8] sm:$0xff]  ;;  %v533_v21 = vld [vmem:[%s3650_s2 + $0x10] sm:$0xff] }
  0x2b   : > { %s344_s27 = scalar_lea.vmem %s3648_s0, %s2530_s24  ;;  %v534_v22 = vld [vmem:[%s3650_s2 + $0x18] sm:$0xff]  ;;  %v535_v23 = vld [vmem:[%s3650_s2 + $0x20] sm:$0xff]  ;;  %v536_v24 = vld [vmem:[%s3650_s2 + $0x28] sm:$0xff] }
  0x2c   : > { %v3210_v7 = vld [vmem:[%s344_s27] sm:$0xff]  ;;  %v3212_v8 = vld [vmem:[%s344_s27 + $0x8] sm:$0xff]  ;;  %v3214_v9 = vld [vmem:[%s344_s27 + $0x10] sm:$0xff]  ;;  %554 = vperm.xlu0 %2979, %v524_v5  }
  0x2d   : > { %2652 = vmatprep.mubr.msk.f32.mxu0 %vm356_vm0, %v3210_v7  ;;  %v3225_v11 = vld [vmem:[%s344_s27 + $0x18] sm:$0xff]  ;;  %v3230_v13 = vld [vmem:[%s344_s27 + $0x20] sm:$0xff]  ;;  %v3239_v15 = vld [vmem:[%s344_s27 + $0x28] sm:$0xff]  ;;  %v494_v32 = vstv %s353_s26  ;;  %s2531_s26 = sshll.u32 %s3141_s13, 8  ;;  %s3067_s13 = smov [#allocation6]  }
  0x2e   : > { %2653 = vmatmul.mubr.msk.f32.vlgmr.msra.gmra.mrb[0].mxu0 %vm356_vm0, %v3212_v8  ;;  %564 = vperm.xlu1 %2980, %v526_v6   ;;  %v3244_v17 = vld [vmem:[%s344_s27 + $0x30] sm:$0xff]  ;;  %v3253_v19 = vld [vmem:[%s344_s27 + $0x38] sm:$0xff]  ;;  %v2427_v27 = vld [vmem:[%s3653_s5 + $0x8] sm:$0xff]  ;;  %s337_s27 = sand.u32 1, %s3054_s10   ;;  %s3000_s21 = sshll.u32 %s3067_s13, 4  ;;  %s3001_s21 = int_to_ptr.vmem [resolvable:$false] %s3000_s21 }
  0x2f   : > { %2655 = vmatprep.mubr.msk.f32.mxu0 %vm356_vm0, %v3214_v9  ;;  %v537_v25 = vld [vmem:[%s3650_s2 + $0x30] sm:$0xff]  ;;  %v538_v26 = vld [vmem:[%s3650_s2 + $0x38] sm:$0xff]  ;;  %2664 = vmatprep.subr.mxu0 %v2427_v27  ;;  %v596_v28 = vld [vmem:[#allocation2 + $0x8] sm:$0xff]  ;;  %s2415_s23 = sshll.u32 %s337_s27, 4  ;;  %s3607_s16 = scalar_lea.sflag [#allocation4], %s337_s27 }
  0x30   : > { %569 = vperm.xlu0 %2979, %v527_v10   ;;  %2665 = vmatpush3.msra.mxu0 %v2427_v27  ;;  %v2453_v29 = vld [vmem:[%s3653_s5 + $0x18] sm:$0xff]  ;;  %v3288_v30 = vld [vmem:[%s3653_s5 + $0x20] sm:$0xff]  ;;  %v3307_v53 = vld [vmem:[%s3653_s5 + $0x10] sm:$0xff]  ;;  %s339_s24 = scalar_lea.vmem [#allocation6], %s2415_s23  ;;  %s3002_s22 = scalar_lea.vmem %s3001_s21, 512 }
  0x31   : > { %2706 = vmatprep.subr.mxu1 %v2453_v29  ;;  %v595_v31 = vld [vmem:[%s3653_s5] sm:$0xff]  ;;  %v2471_v3 = vld [vmem:[%s3653_s5 + $0x28] sm:$0xff]  ;;  %s2335_s25 = sshll.u32 %s339_s24, 4  ;;  %s3600_s25 = int_to_ptr.vmem [resolvable:$true] %s2335_s25 }
  0x32   : > { %2656 = vmatmul.mubr.msk.f32.gmra.mrb[2].mxu0 %vm356_vm0, %v3225_v11  ;;  %574 = vperm.xlu1 %2980, %v528_v12   ;;  %s2996_s17 = scalar_lea.vmem %s3600_s25, 256  ;;  %p3003_p13 = scmp.lt.s32.totalorder %s3600_s25, %s3001_s21 }
  0x33   : > { %2658 = vmatprep.mubr.msk.f32.mxu0 %vm356_vm0, %v3230_v13  ;;  %2707 = vmatpush3.msra.mxu1 %v2453_v29  ;;  %p2997_p9 = scmp.ne.s32.totalorder %s3600_s25, %s2996_s17  ;;  %p3004_p0 = scmp.lt.s32.totalorder %s3002_s22, %s2996_s17 }
  0x34   : > { %579 = vperm.xlu0 %2979, %v529_v14   ;;  %2720 = vmatprep.subr.mxu1 %v3288_v30 }
  0x35   : > { %2678 = vmatprep.subr.mxu0 %v595_v31  ;;  %p2998_p10 = pnand %p2997_p9, %p3158_p5  ;;  %p3005_p1 = por %p3004_p0, %p3003_p13 }
  0x36   : > { %2659 = vmatmul.mubr.msk.f32.gmra.mrb[4].mxu0 %vm356_vm0, %v3239_v15  ;;  %584 = vperm.xlu1 %2980, %v530_v16  }
  0x37   : > { %2661 = vmatprep.mubr.msk.f32.mxu0 %vm356_vm0, %v3244_v17  ;;  %p2999_p12 = pneg %p2998_p10 }
  0x38   : > { %874 = vperm.xlu0 %2979, %v531_v18  }
  0x39   : > { %p3006_p2 = pnand %p3005_p1, %p2999_p12 }
  0x3a   : > { %2662 = vmatmul.mubr.msk.f32.gmra.mrb[6].mxu0 %vm356_vm0, %v3253_v19  ;;  %879 = vperm.xlu1 %2980, %v532_v20  }
  0x3b   : > { %2666 = vmatprep.mubr.msk.f32.mxu0 %vm356_vm0, %v596_v28 }
  0x3c   : > { %884 = vperm.xlu0 %2979, %v533_v21  }
  0x3e   : > { %889 = vperm.xlu1 %2980, %v534_v22  }
  0x40   : > { %894 = vperm.xlu0 %2979, %v535_v23  }
  0x42   : > { %899 = vperm.xlu1 %2980, %v536_v24   ;;  %v539_v24 = vld [vmem:[#allocation2 + $0x7] sm:$0xff] }
  0x44   : > { %904 = vperm.xlu0 %2979, %v537_v25  }
  0x46   : > { %909 = vperm.xlu1 %2980, %v538_v26  }
  0xa7   : > { %v3295_v40 = vpop.permute.xlu0 %549 }
  0xa8   : > { %v587_v28 = vmul.f32 %v3295_v40, %v539_v24  ;;  %v2489_v24 = vld [vmem:[%s3653_s5 + $0x38] sm:$0xff] }
  0xa9   : > { %v3298_v43 = vpop.permute.xlu1 %559 }
  0xab   : > { %v3302_v51 = vpop.permute.xlu0 %554 }
  0xad   : > { %v3309_v54 = vpop.permute.xlu1 %564 }
  0xaf   : > { %v3349_v18 = vpop.permute.xlu0 %569 }
  0xb1   : > { %v3351_v20 = vpop.permute.xlu1 %574 }
  0xb3   : > { %v3375_v29 = vpop.permute.xlu0 %579 }
 0x101   : > { %v2654_v33 = vpop.f32.mrb[0].mxu0 }
 0x102   : > { %vm487_vm1 = vcmp.ge.f32.partialorder %v2654_v33, 0.0  ;;  %v496_v34 = vmul.f32 %v2654_v33, %v494_v32  ;;  %v447_v35 = vpop.f32.mrb[1].mxu0 }
 0x103   : > { %vm486_vm2 = vcmp.ge.f32.partialorder %v447_v35, 0.0  ;;  %v495_v36 = vmul.f32 %v494_v32, %v447_v35 }
 0x104   : > { %v504_v37 = vsel %vm487_vm1, %v2654_v33, %v496_v34 }
 0x105   : > { %516 = vst.msk [vmem:[#allocation2 + $0x18] sm:$0xff] %vm356_vm0, %v504_v37  ;;  %v503_v38 = vsel %vm486_vm2, %v447_v35, %v495_v36  ;;  %v2657_v39 = vpop.f32.mrb[2].mxu0  ;;  %vm2236_vm2 = vcmask 523264  }
 0x106   : > { %515 = vst.msk [vmem:[#allocation2 + $0x10] sm:$0xff] %vm356_vm0, %v503_v38  ;;  %vm489_vm3 = vcmp.ge.f32.partialorder %v2657_v39, 0.0  ;;  %v498_v41 = vmul.f32 %v2657_v39, %v494_v32  ;;  %v457_v42 = vpop.f32.mrb[3].mxu0 }
 0x107   : > { %vm488_vm4 = vcmp.ge.f32.partialorder %v457_v42, 0.0  ;;  %v497_v44 = vmul.f32 %v494_v32, %v457_v42 }
 0x108   : > { %v506_v45 = vsel %vm489_vm3, %v2657_v39, %v498_v41  ;;  %v2480_v41 = vld [vmem:[%s3653_s5 + $0x30] sm:$0xff] }
 0x109   : > { %518 = vst.msk [vmem:[#allocation2 + $0x28] sm:$0xff] %vm356_vm0, %v506_v45  ;;  %v505_v46 = vsel %vm488_vm4, %v457_v42, %v497_v44  ;;  %v2660_v47 = vpop.f32.mrb[4].mxu0  ;;  %v3412_v42 = vpop.permute.xlu0 %874 }
 0x10a   : > { %517 = vst.msk [vmem:[#allocation2 + $0x20] sm:$0xff] %vm356_vm0, %v505_v46  ;;  %vm491_vm5 = vcmp.ge.f32.partialorder %v2660_v47, 0.0  ;;  %v500_v48 = vmul.f32 %v2660_v47, %v494_v32  ;;  %v467_v49 = vpop.f32.mrb[5].mxu0 }
 0x10b   : > { %vm490_vm6 = vcmp.ge.f32.partialorder %v467_v49, 0.0  ;;  %v499_v50 = vmul.f32 %v494_v32, %v467_v49 }
 0x10c   : > { %v508_v52 = vsel %vm491_vm5, %v2660_v47, %v500_v48  ;;  %v3319_v62 = vld [vmem:[#allocation2 + $0x18] sm:$0xff] }
 0x10d   : > { %520 = vst.msk [vmem:[#allocation2 + $0x38] sm:$0xff] %vm356_vm0, %v508_v52  ;;  %v507_v55 = vsel %vm490_vm6, %v467_v49, %v499_v50  ;;  %v2663_v56 = vpop.f32.mrb[6].mxu0  ;;  %v3312_v57 = vld [vmem:[#allocation2 + $0x10] sm:$0xff]  ;;  %v3430_v48 = vpop.permute.xlu0 %884 }
 0x10e   : > { %v1059_v58 = vld [vmem:[#allocation2 + $0xf] sm:$0xff]  ;;  %v3314_v59 = vld [vmem:[#allocation2 + $0x17] sm:$0xff]  ;;  %519 = vst.msk [vmem:[#allocation2 + $0x30] sm:$0xff] %vm356_vm0, %v507_v55  ;;  %vm493_vm7 = vcmp.ge.f32.partialorder %v2663_v56, 0.0  ;;  %v502_v60 = vmul.f32 %v2663_v56, %v494_v32  ;;  %v477_v61 = vpop.f32.mrb[7].mxu0  ;;  %2667 = vmatmul.mubr.msk.f32.vlgmr.msra.gmra.mrb[8].mxu0 %vm356_vm0, %v3312_v57 }
 0x10f   : > { %v1067_v63 = vmul.f32 %v1059_v58, %v3295_v40  ;;  %v1068_v0 = vmul.f32 %v3314_v59, %v3302_v51  ;;  %vm492_vm8 = vcmp.ge.f32.partialorder %v477_v61, 0.0  ;;  %v501_v1 = vmul.f32 %v494_v32, %v477_v61  ;;  %2669 = vmatprep.mubr.msk.f32.mxu0 %vm356_vm0, %v3319_v62  ;;  %2679 = vmatpush3.msra.mxu0 %v595_v31  ;;  %v864_v47 = vld [vmem:[#allocation2 + $0x9] sm:$0xff]  ;;  %v865_v52 = vld [vmem:[#allocation2 + $0x11] sm:$0xff] }
 0x110   : > { %v510_v2 = vsel %vm493_vm7, %v2663_v56, %v502_v60  ;;  %2692 = vmatprep.subr.mxu0 %v3307_v53  ;;  %v3343_v12 = vld [vmem:[#allocation2 + $0x28] sm:$0xff]  ;;  %v588_v36 = vmul.f32 %v1059_v58, %v3302_v51  ;;  %v589_v37 = vmul.f32 %v3314_v59, %v3298_v43  ;;  %v912_v50 = vmul.f32 %v3412_v42, %v864_v47 }
 0x111   : > { %2708 = vmatprep.mubr.msk.f32.mxu1 %vm356_vm0, %v1067_v63  ;;  %522 = vst.msk [vmem:[#allocation2 + $0x48] sm:$0xff] %vm356_vm0, %v510_v2  ;;  %v509_v4 = vsel %vm492_vm8, %v477_v61, %v501_v1  ;;  %v3333_v5 = vld [vmem:[#allocation2 + $0x20] sm:$0xff]  ;;  %v1369_v58 = vmul.f32 %v3412_v42, %v865_v52  ;;  %v3455_v63 = vpop.permute.xlu0 %894 }
 0x112   : > { %2709 = vmatmul.mubr.msk.f32.vlgmr.msra.gmra.mrb[0].mxu1 %vm356_vm0, %v1068_v0  ;;  %v3335_v6 = vld [vmem:[#allocation2 + $0x1f] sm:$0xff]  ;;  %v3337_v10 = vld [vmem:[#allocation2 + $0x27] sm:$0xff]  ;;  %521 = vst.msk [vmem:[#allocation2 + $0x40] sm:$0xff] %vm356_vm0, %v509_v4  ;;  %2670 = vmatmul.mubr.msk.f32.gmra.mrb[10].mxu0 %vm356_vm0, %v3333_v5 }
 0x113   : > { %2721 = vmatpush3.msra.mxu1 %v3288_v30  ;;  %v1069_v14 = vmul.f32 %v3335_v6, %v3298_v43  ;;  %v1070_v16 = vmul.f32 %v3337_v10, %v3309_v54  ;;  %2672 = vmatprep.mubr.msk.f32.mxu0 %vm356_vm0, %v3343_v12  ;;  %v3377_v30 = vpop.permute.xlu1 %584  ;;  %v590_v38 = vmul.f32 %v3335_v6, %v3309_v54  ;;  %v3453_v61 = vld [vmem:[#allocation2 + $0x21] sm:$0xff] }
 0x114   : > { %2734 = vmatprep.subr.mxu1 %v2471_v3  ;;  %v3365_v25 = vld [vmem:[#allocation2 + $0x38] sm:$0xff]  ;;  %v591_v39 = vmul.f32 %v3337_v10, %v3349_v18 }
 0x115   : > { %2711 = vmatprep.mubr.msk.f32.mxu1 %vm356_vm0, %v1069_v14  ;;  %v3357_v21 = vld [vmem:[#allocation2 + $0x30] sm:$0xff] }
 0x116   : > { %2712 = vmatmul.mubr.msk.f32.gmra.mrb[2].mxu1 %vm356_vm0, %v1070_v16  ;;  %v3359_v22 = vld [vmem:[#allocation2 + $0x2f] sm:$0xff]  ;;  %v3361_v23 = vld [vmem:[#allocation2 + $0x37] sm:$0xff]  ;;  %2673 = vmatmul.mubr.msk.f32.gmra.mrb[12].mxu0 %vm356_vm0, %v3357_v21 }
 0x117   : > { %v1071_v26 = vmul.f32 %v3359_v22, %v3349_v18  ;;  %v1072_v27 = vmul.f32 %v3361_v23, %v3351_v20  ;;  %2675 = vmatprep.mubr.msk.f32.mxu0 %vm356_vm0, %v3365_v25  ;;  %v592_v44 = vmul.f32 %v3359_v22, %v3351_v20  ;;  %v3420_v45 = vpop.permute.xlu1 %879  ;;  %v593_v46 = vmul.f32 %v3361_v23, %v3375_v29  ;;  %v3459_v0 = vld [vmem:[#allocation2 + $0x29] sm:$0xff]  ;;  %v3473_v16 = vld [vmem:[#allocation2 + $0x31] sm:$0xff] }
 0x118   : > { %v3445_v56 = vld [vmem:[#allocation2 + $0x48] sm:$0xff]  ;;  %v916_v14 = vmul.f32 %v3455_v63, %v3459_v0 }
 0x119   : > { %2714 = vmatprep.mubr.msk.f32.mxu1 %vm356_vm0, %v1071_v26  ;;  %v3380_v31 = vld [vmem:[#allocation2 + $0x40] sm:$0xff] }
 0x11a   : > { %2715 = vmatmul.mubr.msk.f32.gmra.mrb[4].mxu1 %vm356_vm0, %v1072_v27  ;;  %v3382_v32 = vld [vmem:[#allocation2 + $0x3f] sm:$0xff]  ;;  %v3384_v33 = vld [vmem:[#allocation2 + $0x47] sm:$0xff]  ;;  %2676 = vmatmul.mubr.msk.f32.gmra.mrb[14].mxu0 %vm356_vm0, %v3380_v31 }
 0x11b   : > { %v1073_v34 = vmul.f32 %v3382_v32, %v3375_v29  ;;  %v1074_v35 = vmul.f32 %v3384_v33, %v3377_v30  ;;  %2680 = vmatprep.mubr.msk.f32.mxu0 %vm356_vm0, %v587_v28  ;;  %v594_v49 = vmul.f32 %v3382_v32, %v3377_v30  ;;  %v3442_v55 = vpop.permute.xlu1 %889  ;;  %v870_v26 = vld [vmem:[#allocation2 + $0x39] sm:$0xff]  ;;  %v3483_v28 = vpop.permute.xlu0 %904 }
 0x11c   : > { %v915_v2 = vmul.f32 %v3442_v55, %v3453_v61  ;;  %v1372_v27 = vmul.f32 %v3442_v55, %v3459_v0 }
 0x11d   : > { %2717 = vmatprep.mubr.msk.f32.mxu1 %vm356_vm0, %v1073_v34 }
 0x11e   : > { %2718 = vmatmul.mubr.msk.f32.gmra.mrb[6].mxu1 %vm356_vm0, %v1074_v35  ;;  %2681 = vmatmul.mubr.msk.f32.vlgmr.msra.gmra.mrb[8].mxu0 %vm356_vm0, %v588_v36  ;;  %v1373_v35 = vmul.f32 %v3455_v63, %v3473_v16  ;;  %v918_v36 = vmul.f32 %v3483_v28, %v870_v26 }
 0x11f   : > { %2722 = vmatprep.mubr.msk.f32.mxu1 %vm356_vm0, %v3312_v57  ;;  %2683 = vmatprep.mubr.msk.f32.mxu0 %vm356_vm0, %v589_v37  ;;  %v913_v57 = vmul.f32 %v3420_v45, %v865_v52  ;;  %v3468_v4 = vpop.permute.xlu1 %899  ;;  %v871_v37 = vld [vmem:[#allocation2 + $0x41] sm:$0xff]  ;;  %v1526_v52 = vmul.f32 %v3337_v10, %v3298_v43  ;;  %v1529_v43 = vmul.f32 %v3382_v32, %v3351_v20 }
 0x120   : > { %2693 = vmatpush3.msra.mxu0 %v3307_v53  ;;  %v3440_v53 = vld [vmem:[#allocation2 + $0x19] sm:$0xff]  ;;  %v917_v34 = vmul.f32 %v3468_v4, %v3473_v16  ;;  %v1828_v10 = vmul.f32 %v3430_v48, %v3459_v0  ;;  %v1831_v20 = vmul.f32 %v3468_v4, %v871_v37 }
 0x121   : > { %v914_v60 = vmul.f32 %v3430_v48, %v3440_v53  ;;  %v1370_v1 = vmul.f32 %v3420_v45, %v3440_v53 }
 0x122   : > { %2723 = vmatmul.mubr.msk.f32.vlgmr.msra.gmra.mrb[0].mxu1 %vm356_vm0, %v3319_v62  ;;  %2684 = vmatmul.mubr.msk.f32.gmra.mrb[10].mxu0 %vm356_vm0, %v590_v38 }
 0x123   : > { %2725 = vmatprep.mubr.msk.f32.mxu1 %vm356_vm0, %v3333_v5  ;;  %2735 = vmatpush3.msra.mxu1 %v2471_v3  ;;  %v1371_v3 = vmul.f32 %v3430_v48, %v3453_v61  ;;  %v910_v38 = vpop.permute.xlu1 %909 }
 0x124   : > { %2686 = vmatprep.mubr.msk.f32.mxu0 %vm356_vm0, %v591_v39  ;;  %2748 = vmatprep.subr.mxu1 %v2480_v41  ;;  %v1374_v39 = vmul.f32 %v3468_v4, %v870_v26 }
 0x126   : > { %2726 = vmatmul.mubr.msk.f32.gmra.mrb[2].mxu1 %vm356_vm0, %v3343_v12  ;;  %2687 = vmatmul.mubr.msk.f32.gmra.mrb[12].mxu0 %vm356_vm0, %v592_v44  ;;  %v919_v44 = vmul.f32 %v910_v38, %v871_v37 }
 0x127   : > { %2728 = vmatprep.mubr.msk.f32.mxu1 %vm356_vm0, %v3357_v21  ;;  %2689 = vmatprep.mubr.msk.f32.mxu0 %vm356_vm0, %v593_v46  ;;  %v1375_v46 = vmul.f32 %v3483_v28, %v871_v37 }
 0x12a   : > { %2729 = vmatmul.mubr.msk.f32.gmra.mrb[4].mxu1 %vm356_vm0, %v3365_v25  ;;  %2690 = vmatmul.mubr.msk.f32.gmra.mrb[14].mxu0 %vm356_vm0, %v594_v49  ;;  %v1524_v49 = vmul.f32 %v3314_v59, %v3295_v40  ;;  %v1528_v40 = vmul.f32 %v3361_v23, %v3349_v18  ;;  %v1523_v59 = vld [vmem:[#allocation2 + $0x4f] sm:$0xff]  ;;  %v1830_v18 = vmul.f32 %v3455_v63, %v870_v26 }
 0x12b   : > { %2731 = vmatprep.mubr.msk.f32.mxu1 %vm356_vm0, %v3380_v31  ;;  %2694 = vmatprep.mubr.msk.f32.mxu0 %vm356_vm0, %v912_v50  ;;  %v1525_v50 = vmul.f32 %v3335_v6, %v3302_v51  ;;  %v1530_v51 = vmul.f32 %v3384_v33, %v3375_v29  ;;  %v1827_v6 = vmul.f32 %v3420_v45, %v3453_v61  ;;  %v1998_v29 = vld [vmem:[%s3654_s6] sm:$0xff] }
 0x12e   : > { %2732 = vmatmul.mubr.msk.f32.gmra.mrb[6].mxu1 %vm356_vm0, %v3445_v56  ;;  %2695 = vmatmul.mubr.msk.f32.vlgmr.msra.gmra.mrb[8].mxu0 %vm356_vm0, %v913_v57  ;;  %v2498_v57 = vld [vmem:[%s3653_s5 + $0x40] sm:$0xff] }
 0x12f   : > { %2736 = vmatprep.mubr.msk.f32.mxu1 %vm356_vm0, %v1369_v58  ;;  %2697 = vmatprep.mubr.msk.f32.mxu0 %vm356_vm0, %v914_v60 }
 0x132   : > { %2737 = vmatmul.mubr.msk.f32.vlgmr.msra.gmra.mrb[0].mxu1 %vm356_vm0, %v1370_v1  ;;  %2698 = vmatmul.mubr.msk.f32.gmra.mrb[10].mxu0 %vm356_vm0, %v915_v2 }
 0x133   : > { %2739 = vmatprep.mubr.msk.f32.mxu1 %vm356_vm0, %v1371_v3  ;;  %2749 = vmatpush3.msra.mxu1 %v2480_v41  ;;  %v1368_v41 = vld [vmem:[#allocation2 + $0x49] sm:$0xff] }
 0x134   : > { %2700 = vmatprep.mubr.msk.f32.mxu0 %vm356_vm0, %v916_v14  ;;  %2762 = vmatprep.subr.mxu1 %v2489_v24  ;;  %v1376_v47 = vmul.f32 %v1368_v41, %v910_v38 }
 0x136   : > { %2740 = vmatmul.mubr.msk.f32.gmra.mrb[2].mxu1 %vm356_vm0, %v1372_v27  ;;  %2701 = vmatmul.mubr.msk.f32.gmra.mrb[12].mxu0 %vm356_vm0, %v917_v34 }
 0x137   : > { %2742 = vmatprep.mubr.msk.f32.mxu1 %vm356_vm0, %v1373_v35  ;;  %2703 = vmatprep.mubr.msk.f32.mxu0 %vm356_vm0, %v918_v36 }
 0x13a   : > { %2743 = vmatmul.mubr.msk.f32.gmra.mrb[4].mxu1 %vm356_vm0, %v1374_v39  ;;  %2704 = vmatmul.mubr.msk.f32.gmra.mrb[14].mxu0 %vm356_vm0, %v919_v44 }
 0x13b   : > { %2745 = vmatprep.mubr.msk.f32.mxu1 %vm356_vm0, %v1375_v46  ;;  %2792 = vmatprep.mubr.msk.f32.mxu0 %vm356_vm0, %v3210_v7  ;;  %v1527_v7 = vmul.f32 %v3359_v22, %v3309_v54  ;;  %v1531_v54 = vmul.f32 %v1523_v59, %v3377_v30  ;;  %v1832_v22 = vmul.f32 %v1368_v41, %v3483_v28 }
 0x13e   : > { %2746 = vmatmul.mubr.msk.f32.gmra.mrb[6].mxu1 %vm356_vm0, %v1376_v47  ;;  %v2234_v47 = vld [vmem:[%s3651_s3] sm:$0xff] }
 0x13f   : > { %2750 = vmatprep.mubr.msk.f32.mxu1 %vm356_vm0, %v1524_v49 }
 0x142   : > { %2751 = vmatmul.mubr.msk.f32.vlgmr.msra.gmra.mrb[0].mxu1 %vm356_vm0, %v1525_v50 }
 0x143   : > { %2753 = vmatprep.mubr.msk.f32.mxu1 %vm356_vm0, %v1526_v52  ;;  %2763 = vmatpush3.msra.mxu1 %v2489_v24 }
 0x144   : > { %2776 = vmatprep.subr.mxu1 %v2498_v57 }
 0x146   : > { %2754 = vmatmul.mubr.msk.f32.gmra.mrb[2].mxu1 %vm356_vm0, %v1527_v7 }
 0x147   : > { %2756 = vmatprep.mubr.msk.f32.mxu1 %vm356_vm0, %v1528_v40 }
 0x14a   : > { %2757 = vmatmul.mubr.msk.f32.gmra.mrb[4].mxu1 %vm356_vm0, %v1529_v43 }
 0x14b   : > { %2759 = vmatprep.mubr.msk.f32.mxu1 %vm356_vm0, %v1530_v51 }
 0x14e   : > { %2760 = vmatmul.mubr.msk.f32.gmra.mrb[6].mxu1 %vm356_vm0, %v1531_v54 }
 0x14f   : > { %2764 = vmatprep.mubr.msk.f32.mxu1 %vm356_vm0, %v3319_v62  ;;  %v1678_v62 = vld [vmem:[#allocation2 + $0x50] sm:$0xff] }
 0x152   : > { %2765 = vmatmul.mubr.msk.f32.vlgmr.msra.gmra.mrb[0].mxu1 %vm356_vm0, %v3333_v5  ;;  %v1826_v5 = vmul.f32 %v3412_v42, %v3440_v53 }
 0x153   : > { %2767 = vmatprep.mubr.msk.f32.mxu1 %vm356_vm0, %v3343_v12  ;;  %2777 = vmatpush3.msra.mxu1 %v2498_v57  ;;  %v1829_v12 = vmul.f32 %v3442_v55, %v3473_v16 }
 0x156   : > { %2768 = vmatmul.mubr.msk.f32.gmra.mrb[2].mxu1 %vm356_vm0, %v3357_v21  ;;  %v1825_v21 = vld [vmem:[#allocation2 + $0x51] sm:$0xff] }
 0x157   : > { %2770 = vmatprep.mubr.msk.f32.mxu1 %vm356_vm0, %v3365_v25  ;;  %v1833_v23 = vmul.f32 %v1825_v21, %v910_v38  ;;  %v1999_v25 = vld [vmem:[%s3655_s7] sm:$0xff] }
 0x158   : > { %2790 = vmatprep.subr.mxu0 %v1999_v25 }
 0x159   : > { %2791 = vmatpush3.msra.mxu0 %v1999_v25 }
 0x15a   : > { %2771 = vmatmul.mubr.msk.f32.gmra.mrb[4].mxu1 %vm356_vm0, %v3380_v31  ;;  %2793 = vmatmul.mubr.msk.f32.vlgmr.msra.gmra.mrb[16].mxu0 %vm356_vm0, %v3212_v8 }
 0x15b   : > { %2773 = vmatprep.mubr.msk.f32.mxu1 %vm356_vm0, %v3445_v56  ;;  %2804 = vmatprep.subr.mxu0 %v1998_v29 }
 0x15c   : > { %2805 = vmatpush3.msra.mxu0 %v1998_v29  ;;  %2795 = vmatprep.mubr.msk.f32.mxu0 %vm356_vm0, %v3214_v9 }
 0x15e   : > { %2774 = vmatmul.mubr.msk.f32.gmra.mrb[6].mxu1 %vm356_vm0, %v1678_v62  ;;  %2796 = vmatmul.mubr.msk.f32.gmra.mrb[18].mxu0 %vm356_vm0, %v3225_v11 }
 0x15f   : > { %2778 = vmatprep.mubr.msk.f32.mxu1 %vm356_vm0, %v1826_v5  ;;  %2798 = vmatprep.mubr.msk.f32.mxu0 %vm356_vm0, %v3230_v13  ;;  %v1981_v13 = vstv %s2418_s14  ;;  %s3605_s14 = scalar_lea.hbm %s3657_s9, %s2531_s26 }
 0x162   : > { %2779 = vmatmul.mubr.msk.f32.vlgmr.msra.gmra.mrb[0].mxu1 %vm356_vm0, %v1827_v6  ;;  %2799 = vmatmul.mubr.msk.f32.gmra.mrb[20].mxu0 %vm356_vm0, %v3239_v15  ;;  %v2235_v6 = vld [vmem:[%s3651_s3 + $0x8] sm:$0xff] }
 0x163   : > { %2781 = vmatprep.mubr.msk.f32.mxu1 %vm356_vm0, %v1828_v10  ;;  %2801 = vmatprep.mubr.msk.f32.mxu0 %vm356_vm0, %v3244_v17 }
 0x166   : > { %2782 = vmatmul.mubr.msk.f32.gmra.mrb[2].mxu1 %vm356_vm0, %v1829_v12  ;;  %2802 = vmatmul.mubr.msk.f32.gmra.mrb[22].mxu0 %vm356_vm0, %v3253_v19 }
 0x167   : > { %2784 = vmatprep.mubr.msk.f32.mxu1 %vm356_vm0, %v1830_v18 }
 0x16a   : > { %2785 = vmatmul.mubr.msk.f32.gmra.mrb[4].mxu1 %vm356_vm0, %v1831_v20 }
 0x16b   : > { %2787 = vmatprep.mubr.msk.f32.mxu1 %vm356_vm0, %v1832_v22 }
 0x16e   : > { %2788 = vmatmul.mubr.msk.f32.gmra.mrb[6].mxu1 %vm356_vm0, %v1833_v23 }
 0x201   : > { %v2696_v8 = vpop.f32.mrb[8].mxu0 }
 0x202   : > { %v1012_v30 = vpop.f32.mrb[9].mxu0 }
 0x205   : > { %v2699_v31 = vpop.f32.mrb[10].mxu0 }
 0x206   : > { %v1022_v32 = vpop.f32.mrb[11].mxu0 }
 0x209   : > { %v2702_v9 = vpop.f32.mrb[12].mxu0 }
 0x20a   : > { %v1032_v33 = vpop.f32.mrb[13].mxu0 }
 0x20d   : > { %v2705_v42 = vpop.f32.mrb[14].mxu0 }
 0x20e   : > { %v1042_v11 = vpop.f32.mrb[15].mxu0 }
 0x235   : > { %v2780_v45 = vpop.f32.mrb[0].mxu1 }
 0x236   : > { %v2853_v48 = vadd.f32 %v2780_v45, %v2696_v8  ;;  %v1926_v53 = vpop.f32.mrb[1].mxu1 }
 0x237   : > { %v2854_v15 = vadd.f32 %v1926_v53, %v1012_v30 }
 0x238   : > { %v1983_v55 = vmul.f32 %v2853_v48, %v1981_v13  ;;  %vm1974_vm9 = vcmp.ge.f32.partialorder %v2853_v48, 0.0 }
 0x239   : > { %vm1973_vm10 = vcmp.ge.f32.partialorder %v2854_v15, 0.0  ;;  %v1982_v17 = vmul.f32 %v2854_v15, %v1981_v13  ;;  %v2783_v56 = vpop.f32.mrb[2].mxu1 }
 0x23a   : > { %v2855_v19 = vadd.f32 %v2783_v56, %v2699_v31  ;;  %v1936_v58 = vpop.f32.mrb[3].mxu1  ;;  %v1991_v63 = vsel %vm1974_vm9, %v2853_v48, %v1983_v55 }
 0x23b   : > { %v2856_v60 = vadd.f32 %v1936_v58, %v1022_v32  ;;  %v1990_v61 = vsel %vm1973_vm10, %v2854_v15, %v1982_v17 }
 0x23c   : > { %v1985_v0 = vmul.f32 %v2855_v19, %v1981_v13  ;;  %2806 = vmatprep.mubr.msk.f32.mxu0 %vm356_vm0, %v1990_v61  ;;  %vm1976_vm11 = vcmp.ge.f32.partialorder %v2855_v19, 0.0 }
 0x23d   : > { %vm1975_vm12 = vcmp.ge.f32.partialorder %v2856_v60, 0.0  ;;  %v1984_v1 = vmul.f32 %v2856_v60, %v1981_v13  ;;  %v2786_v2 = vpop.f32.mrb[4].mxu1  ;;  %2807 = vmatmul.mubr.msk.f32.vlgmr.msra.gmra.mrb[16].mxu0 %vm356_vm0, %v1991_v63 }
 0x23e   : > { %v2857_v3 = vadd.f32 %v2786_v2, %v2702_v9  ;;  %v1946_v4 = vpop.f32.mrb[5].mxu1  ;;  %v1993_v26 = vsel %vm1976_vm11, %v2855_v19, %v1985_v0 }
 0x23f   : > { %v2858_v14 = vadd.f32 %v1946_v4, %v1032_v33  ;;  %v1992_v16 = vsel %vm1975_vm12, %v2856_v60, %v1984_v1 }
 0x240   : > { %v1987_v24 = vmul.f32 %v2857_v3, %v1981_v13  ;;  %2809 = vmatprep.mubr.msk.f32.mxu0 %vm356_vm0, %v1992_v16  ;;  %vm1978_vm13 = vcmp.ge.f32.partialorder %v2857_v3, 0.0 }
 0x241   : > { %vm1977_vm14 = vcmp.ge.f32.partialorder %v2858_v14, 0.0  ;;  %v1986_v27 = vmul.f32 %v2858_v14, %v1981_v13  ;;  %v2789_v28 = vpop.f32.mrb[6].mxu1  ;;  %2810 = vmatmul.mubr.msk.f32.gmra.mrb[18].mxu0 %vm356_vm0, %v1993_v26 }
 0x242   : > { %v2859_v34 = vadd.f32 %v2789_v28, %v2705_v42  ;;  %v1956_v35 = vpop.f32.mrb[7].mxu1  ;;  %v1995_v39 = vsel %vm1978_vm13, %v2857_v3, %v1987_v24 }
 0x243   : > { %v2860_v36 = vadd.f32 %v1956_v35, %v1042_v11  ;;  %v1994_v37 = vsel %vm1977_vm14, %v2858_v14, %v1986_v27 }
 0x244   : > { %v1989_v38 = vmul.f32 %v2859_v34, %v1981_v13  ;;  %2812 = vmatprep.mubr.msk.f32.mxu0 %vm356_vm0, %v1994_v37  ;;  %vm1980_vm15 = vcmp.ge.f32.partialorder %v2859_v34, 0.0 }
 0x245   : > { %vm1979_vm1 = vcmp.ge.f32.partialorder %v2860_v36, 0.0  ;;  %v1988_v41 = vmul.f32 %v2860_v36, %v1981_v13  ;;  %2813 = vmatmul.mubr.msk.f32.gmra.mrb[20].mxu0 %vm356_vm0, %v1995_v39 }
 0x246   : > { %v1997_v46 = vsel %vm1980_vm15, %v2859_v34, %v1989_v38 }
 0x247   : > { %v1996_v44 = vsel %vm1979_vm1, %v2860_v36, %v1988_v41 }
 0x248   : > { %2815 = vmatprep.mubr.msk.f32.mxu0 %vm356_vm0, %v1996_v44 }
 0x249   : > { %2816 = vmatmul.mubr.msk.f32.gmra.mrb[22].mxu0 %vm356_vm0, %v1997_v46  ;;  %vm2318_vm0 = vcmask 130048  }
 0x24a   : > { %2834 = vmatprep.mubr.msk.f32.mxu0 %vm2236_vm2, %v2234_v47 }
 0x310   : > { %v2808_v49 = vpop.f32.mrb[16].mxu0 }
 0x311   : > { %v2195_v50 = vpop.f32.mrb[17].mxu0 }
 0x312   : > { %v2837_v52 = vpack.c.bf16 %v2808_v49, %v2195_v50 }
 0x314   : > { %v2811_v57 = vpop.f32.mrb[18].mxu0  ;;  %2838 = vmatprep.subr.bf16.mxu0 %v2837_v52 }
 0x315   : > { %v2205_v7 = vpop.f32.mrb[19].mxu0  ;;  %2840 = vmatpush3.bf16.msra.mxu0 %v2837_v52 }
 0x316   : > { %v2841_v40 = vpack.c.bf16 %v2811_v57, %v2205_v7 }
 0x318   : > { %v2814_v43 = vpop.f32.mrb[20].mxu0  ;;  %2842 = vmatprep.subr.bf16.mxu0 %v2841_v40 }
 0x319   : > { %v2215_v51 = vpop.f32.mrb[21].mxu0  ;;  %2844 = vmatpush3.bf16.msra.mxu0 %v2841_v40 }
 0x31a   : > { %v2845_v59 = vpack.c.bf16 %v2814_v43, %v2215_v51 }
 0x31c   : > { %v2817_v54 = vpop.f32.mrb[22].mxu0  ;;  %2846 = vmatprep.subr.bf16.mxu0 %v2845_v59 }
 0x31d   : > { %v2225_v62 = vpop.f32.mrb[23].mxu0  ;;  %2848 = vmatpush3.bf16.msra.mxu0 %v2845_v59 }
 0x31e   : > { %v2849_v5 = vpack.c.bf16 %v2817_v54, %v2225_v62 }
 0x320   : > { %2850 = vmatprep.subr.bf16.mxu0 %v2849_v5 }
 0x321   : > { %2852 = vmatpush3.bf16.msra.mxu0 %v2849_v5 }
 0x324   : > { %2835 = vmatmul.mubr.msk.f32.vlgmr.msra.gmra.mrb[24].mxu0 %vm2236_vm2, %v2235_v6 }
 0x3f7   : > { %v2836_v10 = vpop.f32.mrb[24].mxu0 }
 0x3f8   : > { %2320 = vst.msk [vmem:[%s339_s24 + $0x8] sm:$0xff] %vm2318_vm0, %v2836_v10  ;;  %v2309_v12 = vpop.f32.mrb[25].mxu0 }
 0x3f9   : > { %2319 = vst.msk [vmem:[%s339_s24] sm:$0xff] %vm2318_vm0, %v2309_v12 }
 0x3fa   : > { %3009 = shalt.err (!%p3006_p2)
}
 0x3fb   : > { %s3010_s27 = scalar_lea.hbm %s3605_s14, 256  ;;  %s3014_s26 = scalar_lea.hbm %s3657_s9, 512 }
 0x3fc   : > { %p3011_p3 = scmp.ne.s32.totalorder %s3605_s14, %s3010_s27  ;;  %p3015_p8 = scmp.lt.u32.totalorder %s3605_s14, %s3657_s9 }
 0x3fd   : > { %p3016_p11 = scmp.lt.u32.totalorder %s3014_s26, %s3010_s27  ;;  %p3018_p10 = scmp.lt.u32.totalorder %s3010_s27, %s3605_s14 }
 0x3fe   : > { %p3012_p4 = pnand %p3011_p3, %p3158_p5 }
 0x3ff   : > { %p3017_p9 = por %p3016_p11, %p3015_p8 }
 0x400   : > { %p3013_p7 = pneg %p3012_p4 }
 0x401   : > { %p3019_p12 = por %p3018_p10, %p3017_p9 }
 0x403   : > { %p3020_p13 = pnand %p3019_p12, %p3013_p7 }
 0x405   : > { %3023 = shalt.err (!%p3020_p13)
}
 0x406   : > { %s3068_s17 = smov 128   ;;  %s3069_s13 = smov 8  }
 0x407   : > { %2929 = dma.vmem_to_hbm [thread:$0]  (%p3158_p5), %s3600_s25, 256, %s3605_s14, %s3607_s16, %s3068_s17, %s3068_s17, %s3069_s13  }
 0x408 PF: > { %p2941_p0 = scmp.ge.s32.totalorder %s3062_s12, 2  ;;  %s2350_s21 = sand.u32 1, %s3050_s30  }
 0x409   : > { %s2351_s22 = scalar_lea.sflag [#allocation4], %s2350_s21 }
 0x40a   : > { %p2936_p1 = pnand %p2941_p0, %p3162_p6 }
 0x40c   : > { %3045 = dma.done.wait (!%p2936_p1), %s2351_s22, 256  }
 0x40d   : > { %3047 = vsyncadd (!%p2936_p1), %s2351_s22, 4294967040  ;;  %p20_p2 = scmp.ge.s32.totalorder %s3145_s15, 4   ;;  %s3661_s30 = smov %s3054_s10 }
 0x40e   : > { %s3662_s10 = smov %s3058_s11  ;;  %s3663_s11 = smov %s3156_s18 }
 0x40f   : > { %s3664_s12 = smov %s3145_s15  ;;  %22 = sbr.rel (!%p20_p2) target bundleno = 4 (0x4), region = 104 }
 0x416   :  { %2356 = vsyncpa [#allocation4], 1 }
 0x417   :  { %2358 = vsyncpa [#allocation4 + $0x1], 1 }
 0x418   :  { %2359 = vsyncpa [#allocation5], 1 }
 0x419   :  { %2361 = vsyncpa [#allocation5 + $0x1], 1 }

// kernel: downsample_forward.2
= control target key start
LH: loop header
LB: loop body
LE: loop exit
PB: predicated region body
PF: predicated region fallthrough
CT: control target
= control target key end

     0   :  { %14 = vsyncpa [#allocation4], 0  ;;  %s7641_s30 = smov 0   ;;  %s9559_s0 = inlined_call_operand.vmem [shape: f32[2,256,4], index: 0, kind: input, shape index: {}]   ;;  %s9560_s1 = inlined_call_operand.vmem [shape: f32[256,1], index: 1, kind: input, shape index: {}]   ;;  %s9561_s2 = inlined_call_operand.vmem [shape: f32[256,1], index: 2, kind: input, shape index: {}]   ;;  %s9562_s3 = inlined_call_operand.vmem [shape: f32[64,256], index: 3, kind: input, shape index: {}]   ;;  %s9563_s4 = inlined_call_operand.vmem [shape: f32[4,4], index: 4, kind: input, shape index: {}]   ;;  %s9564_s5 = inlined_call_operand.vmem [shape: f32[9,4,4], index: 5, kind: input, shape index: {}]   ;;  %s9565_s6 = inlined_call_operand.vmem [shape: f32[4,8], index: 6, kind: input, shape index: {}]   ;;  %s9566_s7 = inlined_call_operand.vmem [shape: f32[4,8], index: 7, kind: input, shape index: {}]   ;;  %s9567_s8 = inlined_call_operand.vmem [shape: f32[2], index: 8, kind: input, shape index: {}]   ;;  %s9568_s9 = inlined_call_operand.vmem [shape: f32[2,64,8], index: 9, kind: output, shape index: {}]  }
   0x1 LB: > { %s7647_s10 = sadd.s32 4294967295, %s7586_s30   ;;  %p5714_p0 = scmp.ge.s32.totalorder %s7586_s30, 1  ;;  %s7586_s30 = sphi %s7641_s30, %s20_s30  }
   0x2   : > { %p245_p1 = scmp.lt.s32.totalorder %s7586_s30, 3  ;;  %s279_s13 = sshll.u32 %s9567_s8, 4  ;;  %s280_s13 = int_to_ptr.vmem [resolvable:$true] %s279_s13 }
   0x3   : > { %p7514_p3 = scmp.eq.s32.totalorder %s7647_s10, 0  ;;  %s7561_s15 = scalar_lea.vmem %s280_s13, 16 }
   0x4   : > { %p7654_p2 = pnand %p5714_p0, %p245_p1  ;;  %p7562_p6 = scmp.ne.s32.totalorder %s280_s13, %s7561_s15 }
   0x5   : > { %p7569_p10 = scmp.lt.s32.totalorder %s280_s13, %s280_s13  ;;  %p7570_p11 = scmp.lt.s32.totalorder %s7561_s15, %s7561_s15 }
   0x6   : > { %p7510_p4 = pneg %p7654_p2 }
   0x7   : > { %p7571_p12 = por %p7570_p11, %p7569_p10 }
   0x8   : > { %p7511_p5 = pnand %p7514_p3, %p7510_p4 }
   0xa   : > { %p7563_p7 = pneg %p7511_p5 }
   0xc   : > { %p7564_p8 = pnand %p7563_p7, %p7562_p6 }
   0xe   : > { %p7565_p9 = pneg %p7564_p8 }
  0x10   : > { %p7572_p13 = pnand %p7571_p12, %p7565_p9 }
  0x12   : > { %7575 = shalt.err (!%p7572_p13)
}
  0x13   : > { %s7588_s16 = smov [#allocation3]   ;;  %300 = sbr.rel (%p7654_p2) target bundleno = 1402 (0x57a), region = 56 }
  0x14   : > { %7513 = dma.vmem_to_smem (!%p7511_p5), %s280_s13, 16, %s7588_s16, [#allocation4]  }
  0x1a   : > { %7581 = dma.done.wait (%p7514_p3), [#allocation4], 16  }
  0x1b   : > { %7583 = vsyncadd (%p7514_p3), [#allocation4], 4294967280 }
  0x1c   : > { %306 = sfence }
  0x1d   : > { %v381_v0 = vld [vmem:[%s9563_s4] sm:$0xf]  ;;  %vm479_vm0 = vcmask 1043456   ;;  %p337_p0 = scmp.lt.s32.totalorder %s7647_s10, 1  ;;  %v7589_v1 = vmov 0   ;;  %v901_v3 = vld [vmem:[%s9561_s2 + $0xd0] sm:$0xff] }
  0x1e   : > { %6584 = vmatprep.subr.msk.mxu0 %vm479_vm0, %v381_v0  ;;  %7527 = vset.pattern.permute.xlu0 %v7589_v1  ;;  %v899_v2 = vld [vmem:[%s9561_s2 + $0xc0] sm:$0xff]  ;;  %v900_v4 = vld [vmem:[%s9561_s2 + $0xc8] sm:$0xff]  ;;  %vm382_vm1 = vcmask 31744   ;;  %v902_v5 = vld [vmem:[%s9561_s2 + $0xd8] sm:$0xff]  ;;  %v7590_v17 = vmov 0.0   ;;  %s379_s14 = sld [smem:[#allocation3]] }
  0x1f   : > { %6585 = vmatpush3.msk.msra.mxu0 %vm479_vm0, %v381_v0  ;;  %s9966_s10 = smov (!%p337_p0, %s7647_s10), 1  ;;  %1968 = vperm.xlu0 %7527, %v899_v2   ;;  %v903_v9 = vld [vmem:[%s9561_s2 + $0xe0] sm:$0xff]  ;;  %v904_v11 = vld [vmem:[%s9561_s2 + $0xe8] sm:$0xff]  ;;  %v905_v13 = vld [vmem:[%s9561_s2 + $0xf0] sm:$0xff]  ;;  %808 = vst.msk [vmem:[#allocation2 + $0x118] sm:$0xff] %vm382_vm1, %v7590_v17 }
  0x20   : > { %7528 = vset.pattern.permute.xlu1 %v7589_v1  ;;  %s6130_s25 = sshll.u32 %s9966_s10, 8  ;;  %v906_v15 = vld [vmem:[%s9561_s2 + $0xf8] sm:$0xff]  ;;  %809 = vst.msk [vmem:[#allocation2 + $0x120] sm:$0xff] %vm382_vm1, %v7590_v17  ;;  %805 = vst.msk [vmem:[#allocation2] sm:$0xff] %vm382_vm1, %v7590_v17  ;;  %v843_v18 = vld [vmem:[%s9560_s1] sm:$0xff]  ;;  %s6131_s24 = sshll.u32 %s9966_s10, 6 }
  0x21   : > { %1978 = vperm.xlu1 %7528, %v901_v3   ;;  %s7691_s28 = scalar_lea.vmem %s9559_s0, %s6130_s25  ;;  %806 = vst.msk [vmem:[#allocation2 + $0x8] sm:$0xff] %vm382_vm1, %v7590_v17  ;;  %807 = vst.msk [vmem:[#allocation2 + $0x10] sm:$0xff] %vm382_vm1, %v7590_v17  ;;  %v844_v20 = vld [vmem:[%s9560_s1 + $0x8] sm:$0xff]  ;;  %v845_v22 = vld [vmem:[%s9560_s1 + $0x10] sm:$0xff]  ;;  %s9538_s27 = scalar_lea.vmem %s9568_s9, %s6131_s24 }
  0x22   : > { %v347_v6 = vld [vmem:[%s7691_s28] sm:$0xff]  ;;  %v348_v7 = vld [vmem:[%s7691_s28 + $0x8] sm:$0xff]  ;;  %v349_v8 = vld [vmem:[%s7691_s28 + $0x10] sm:$0xff]  ;;  %810 = vst.msk [vmem:[#allocation2 + $0x128] sm:$0xff] %vm382_vm1, %v7590_v17 }
  0x23   : > { %1973 = vperm.xlu0 %7527, %v900_v4   ;;  %6586 = vmatprep.mubr.msk.f32.mxu0 %vm382_vm1, %v347_v6  ;;  %v350_v10 = vld [vmem:[%s7691_s28 + $0x18] sm:$0xff]  ;;  %v351_v12 = vld [vmem:[%s7691_s28 + $0x20] sm:$0xff]  ;;  %v352_v14 = vld [vmem:[%s7691_s28 + $0x28] sm:$0xff] }
  0x24   : > { %6587 = vmatmul.mubr.msk.f32.vlgmr.msra.gmra.mrb[0].mxu0 %vm382_vm1, %v348_v7  ;;  %v353_v16 = vld [vmem:[%s7691_s28 + $0x30] sm:$0xff]  ;;  %v354_v19 = vld [vmem:[%s7691_s28 + $0x38] sm:$0xff]  ;;  %v355_v21 = vld [vmem:[%s7691_s28 + $0x40] sm:$0xff] }
  0x25   : > { %1983 = vperm.xlu1 %7528, %v902_v5   ;;  %6589 = vmatprep.mubr.msk.f32.mxu0 %vm382_vm1, %v349_v8  ;;  %v356_v23 = vld [vmem:[%s7691_s28 + $0x48] sm:$0xff]  ;;  %v846_v24 = vld [vmem:[%s9560_s1 + $0x18] sm:$0xff]  ;;  %v357_v25 = vld [vmem:[%s7691_s28 + $0x50] sm:$0xff] }
  0x26   : > { %v847_v26 = vld [vmem:[%s9560_s1 + $0x20] sm:$0xff]  ;;  %v358_v27 = vld [vmem:[%s7691_s28 + $0x58] sm:$0xff]  ;;  %v848_v28 = vld [vmem:[%s9560_s1 + $0x28] sm:$0xff] }
  0x27   : > { %1988 = vperm.xlu0 %7527, %v903_v9   ;;  %v359_v29 = vld [vmem:[%s7691_s28 + $0x60] sm:$0xff]  ;;  %v849_v30 = vld [vmem:[%s9560_s1 + $0x30] sm:$0xff]  ;;  %v360_v31 = vld [vmem:[%s7691_s28 + $0x68] sm:$0xff] }
  0x28   : > { %6590 = vmatmul.mubr.msk.f32.gmra.mrb[2].mxu0 %vm382_vm1, %v350_v10  ;;  %v850_v32 = vld [vmem:[%s9560_s1 + $0x38] sm:$0xff]  ;;  %v361_v33 = vld [vmem:[%s7691_s28 + $0x70] sm:$0xff]  ;;  %v851_v34 = vld [vmem:[%s9560_s1 + $0x40] sm:$0xff] }
  0x29   : > { %1993 = vperm.xlu1 %7528, %v904_v11   ;;  %6592 = vmatprep.mubr.msk.f32.mxu0 %vm382_vm1, %v351_v12  ;;  %v362_v35 = vld [vmem:[%s7691_s28 + $0x78] sm:$0xff]  ;;  %v852_v36 = vld [vmem:[%s9560_s1 + $0x48] sm:$0xff]  ;;  %v363_v37 = vld [vmem:[%s7691_s28 + $0x80] sm:$0xff] }
  0x2a   : > { %v853_v38 = vld [vmem:[%s9560_s1 + $0x50] sm:$0xff]  ;;  %v364_v39 = vld [vmem:[%s7691_s28 + $0x88] sm:$0xff]  ;;  %v854_v40 = vld [vmem:[%s9560_s1 + $0x58] sm:$0xff] }
  0x2b   : > { %1998 = vperm.xlu0 %7527, %v905_v13   ;;  %v365_v41 = vld [vmem:[%s7691_s28 + $0x90] sm:$0xff]  ;;  %v855_v42 = vld [vmem:[%s9560_s1 + $0x60] sm:$0xff]  ;;  %v366_v43 = vld [vmem:[%s7691_s28 + $0x98] sm:$0xff] }
  0x2c   : > { %6593 = vmatmul.mubr.msk.f32.gmra.mrb[4].mxu0 %vm382_vm1, %v352_v14  ;;  %v856_v44 = vld [vmem:[%s9560_s1 + $0x68] sm:$0xff]  ;;  %v367_v45 = vld [vmem:[%s7691_s28 + $0xa0] sm:$0xff]  ;;  %v857_v46 = vld [vmem:[%s9560_s1 + $0x70] sm:$0xff] }
  0x2d   : > { %2003 = vperm.xlu1 %7528, %v906_v15   ;;  %6595 = vmatprep.mubr.msk.f32.mxu0 %vm382_vm1, %v353_v16  ;;  %v368_v47 = vld [vmem:[%s7691_s28 + $0xa8] sm:$0xff]  ;;  %v858_v48 = vld [vmem:[%s9560_s1 + $0x78] sm:$0xff]  ;;  %v369_v49 = vld [vmem:[%s7691_s28 + $0xb0] sm:$0xff] }
  0x2e   : > { %v859_v50 = vld [vmem:[%s9560_s1 + $0x80] sm:$0xff]  ;;  %v370_v51 = vld [vmem:[%s7691_s28 + $0xb8] sm:$0xff]  ;;  %v860_v52 = vld [vmem:[%s9560_s1 + $0x88] sm:$0xff] }
  0x2f   : > { %941 = vperm.xlu0 %7527, %v843_v18   ;;  %v371_v53 = vld [vmem:[%s7691_s28 + $0xc0] sm:$0xff]  ;;  %v861_v54 = vld [vmem:[%s9560_s1 + $0x90] sm:$0xff]  ;;  %v372_v55 = vld [vmem:[%s7691_s28 + $0xc8] sm:$0xff] }
  0x30   : > { %6596 = vmatmul.mubr.msk.f32.gmra.mrb[6].mxu0 %vm382_vm1, %v354_v19  ;;  %v862_v56 = vld [vmem:[%s9560_s1 + $0x98] sm:$0xff]  ;;  %v373_v57 = vld [vmem:[%s7691_s28 + $0xd0] sm:$0xff]  ;;  %v863_v58 = vld [vmem:[%s9560_s1 + $0xa0] sm:$0xff] }
  0x31   : > { %946 = vperm.xlu1 %7528, %v844_v20   ;;  %6598 = vmatprep.mubr.msk.f32.mxu0 %vm382_vm1, %v355_v21  ;;  %v374_v59 = vld [vmem:[%s7691_s28 + $0xd8] sm:$0xff]  ;;  %v864_v60 = vld [vmem:[%s9560_s1 + $0xa8] sm:$0xff]  ;;  %v375_v61 = vld [vmem:[%s7691_s28 + $0xe0] sm:$0xff] }
  0x32   : > { %v865_v62 = vld [vmem:[%s9560_s1 + $0xb0] sm:$0xff]  ;;  %v376_v63 = vld [vmem:[%s7691_s28 + $0xe8] sm:$0xff]  ;;  %v866_v0 = vld [vmem:[%s9560_s1 + $0xb8] sm:$0xff] }
  0x33   : > { %951 = vperm.xlu0 %7527, %v845_v22   ;;  %v377_v1 = vld [vmem:[%s7691_s28 + $0xf0] sm:$0xff]  ;;  %v867_v2 = vld [vmem:[%s9560_s1 + $0xc0] sm:$0xff]  ;;  %v378_v3 = vld [vmem:[%s7691_s28 + $0xf8] sm:$0xff] }
  0x34   : > { %6599 = vmatmul.mubr.msk.f32.gmra.mrb[8].mxu0 %vm382_vm1, %v356_v23  ;;  %v868_v4 = vld [vmem:[%s9560_s1 + $0xc8] sm:$0xff]  ;;  %v869_v5 = vld [vmem:[%s9560_s1 + $0xd0] sm:$0xff]  ;;  %v870_v6 = vld [vmem:[%s9560_s1 + $0xd8] sm:$0xff] }
  0x35   : > { %956 = vperm.xlu1 %7528, %v846_v24   ;;  %6601 = vmatprep.mubr.msk.f32.mxu0 %vm382_vm1, %v357_v25  ;;  %v871_v7 = vld [vmem:[%s9560_s1 + $0xe0] sm:$0xff]  ;;  %v872_v8 = vld [vmem:[%s9560_s1 + $0xe8] sm:$0xff]  ;;  %v873_v9 = vld [vmem:[%s9560_s1 + $0xf0] sm:$0xff] }
  0x36   : > { %v874_v10 = vld [vmem:[%s9560_s1 + $0xf8] sm:$0xff]  ;;  %v875_v11 = vld [vmem:[%s9561_s2] sm:$0xff]  ;;  %v876_v12 = vld [vmem:[%s9561_s2 + $0x8] sm:$0xff] }
  0x37   : > { %961 = vperm.xlu0 %7527, %v847_v26   ;;  %v877_v13 = vld [vmem:[%s9561_s2 + $0x10] sm:$0xff]  ;;  %v878_v14 = vld [vmem:[%s9561_s2 + $0x18] sm:$0xff]  ;;  %v879_v15 = vld [vmem:[%s9561_s2 + $0x20] sm:$0xff] }
  0x38   : > { %6602 = vmatmul.mubr.msk.f32.gmra.mrb[10].mxu0 %vm382_vm1, %v358_v27  ;;  %v880_v16 = vld [vmem:[%s9561_s2 + $0x28] sm:$0xff]  ;;  %v881_v17 = vld [vmem:[%s9561_s2 + $0x30] sm:$0xff]  ;;  %v882_v18 = vld [vmem:[%s9561_s2 + $0x38] sm:$0xff] }
  0x39   : > { %966 = vperm.xlu1 %7528, %v848_v28   ;;  %6604 = vmatprep.mubr.msk.f32.mxu0 %vm382_vm1, %v359_v29  ;;  %v883_v19 = vld [vmem:[%s9561_s2 + $0x40] sm:$0xff]  ;;  %v884_v20 = vld [vmem:[%s9561_s2 + $0x48] sm:$0xff]  ;;  %v885_v22 = vld [vmem:[%s9561_s2 + $0x50] sm:$0xff] }
  0x3a   : > { %v5757_v21 = vld [vmem:[%s9564_s5 + $0x4] sm:$0xf]  ;;  %v1132_v23 = vld [vmem:[#allocation2 + $0x8] sm:$0xff]  ;;  %v1133_v24 = vld [vmem:[#allocation2 + $0x10] sm:$0xff] }
  0x3b   : > { %971 = vperm.xlu0 %7527, %v849_v30   ;;  %6634 = vmatprep.subr.msk.mxu0 %vm479_vm0, %v5757_v21  ;;  %v886_v25 = vld [vmem:[%s9561_s2 + $0x58] sm:$0xff]  ;;  %v887_v26 = vld [vmem:[%s9561_s2 + $0x60] sm:$0xff]  ;;  %v888_v27 = vld [vmem:[%s9561_s2 + $0x68] sm:$0xff] }
  0x3c   : > { %6605 = vmatmul.mubr.msk.f32.gmra.mrb[12].mxu0 %vm382_vm1, %v360_v31  ;;  %v889_v28 = vld [vmem:[%s9561_s2 + $0x70] sm:$0xff]  ;;  %v890_v29 = vld [vmem:[%s9561_s2 + $0x78] sm:$0xff]  ;;  %v891_v30 = vld [vmem:[%s9561_s2 + $0x80] sm:$0xff] }
  0x3d   : > { %976 = vperm.xlu1 %7528, %v850_v32   ;;  %6607 = vmatprep.mubr.msk.f32.mxu0 %vm382_vm1, %v361_v33  ;;  %v892_v31 = vld [vmem:[%s9561_s2 + $0x88] sm:$0xff]  ;;  %v893_v32 = vld [vmem:[%s9561_s2 + $0x90] sm:$0xff]  ;;  %v894_v33 = vld [vmem:[%s9561_s2 + $0x98] sm:$0xff] }
  0x3e   : > { %6635 = vmatpush3.msk.msra.mxu0 %vm479_vm0, %v5757_v21 }
  0x3f   : > { %981 = vperm.xlu0 %7527, %v851_v34   ;;  %v895_v34 = vld [vmem:[%s9561_s2 + $0xa0] sm:$0xff] }
  0x40   : > { %6608 = vmatmul.mubr.msk.f32.gmra.mrb[14].mxu0 %vm382_vm1, %v362_v35  ;;  %v896_v35 = vld [vmem:[%s9561_s2 + $0xa8] sm:$0xff] }
  0x41   : > { %986 = vperm.xlu1 %7528, %v852_v36   ;;  %6610 = vmatprep.mubr.msk.f32.mxu0 %vm382_vm1, %v363_v37  ;;  %v897_v36 = vld [vmem:[%s9561_s2 + $0xb0] sm:$0xff]  ;;  %v898_v37 = vld [vmem:[%s9561_s2 + $0xb8] sm:$0xff] }
  0x43   : > { %991 = vperm.xlu0 %7527, %v853_v38  }
  0x44   : > { %6611 = vmatmul.mubr.msk.f32.gmra.mrb[16].mxu0 %vm382_vm1, %v364_v39 }
  0x45   : > { %996 = vperm.xlu1 %7528, %v854_v40   ;;  %6613 = vmatprep.mubr.msk.f32.mxu0 %vm382_vm1, %v365_v41 }
  0x47   : > { %1001 = vperm.xlu0 %7527, %v855_v42  }
  0x48   : > { %6614 = vmatmul.mubr.msk.f32.gmra.mrb[18].mxu0 %vm382_vm1, %v366_v43 }
  0x49   : > { %1006 = vperm.xlu1 %7528, %v856_v44   ;;  %6616 = vmatprep.mubr.msk.f32.mxu0 %vm382_vm1, %v367_v45 }
  0x4b   : > { %1011 = vperm.xlu0 %7527, %v857_v46  }
  0x4c   : > { %6617 = vmatmul.mubr.msk.f32.gmra.mrb[20].mxu0 %vm382_vm1, %v368_v47 }
  0x4d   : > { %1016 = vperm.xlu1 %7528, %v858_v48   ;;  %6619 = vmatprep.mubr.msk.f32.mxu0 %vm382_vm1, %v369_v49 }
  0x4f   : > { %1021 = vperm.xlu0 %7527, %v859_v50  }
  0x50   : > { %6620 = vmatmul.mubr.msk.f32.gmra.mrb[22].mxu0 %vm382_vm1, %v370_v51 }
  0x51   : > { %1026 = vperm.xlu1 %7528, %v860_v52   ;;  %6622 = vmatprep.mubr.msk.f32.mxu0 %vm382_vm1, %v371_v53  ;;  %v7984_v52 = vld [vmem:[%s9564_s5 + $0x8] sm:$0xf] }
  0x52   : > { %7216 = vmatprep.subr.msk.mxu1 %vm479_vm0, %v7984_v52 }
  0x53   : > { %1031 = vperm.xlu0 %7527, %v861_v54   ;;  %7217 = vmatpush3.msk.msra.mxu1 %vm479_vm0, %v7984_v52 }
  0x54   : > { %6623 = vmatmul.mubr.msk.f32.gmra.mrb[24].mxu0 %vm382_vm1, %v372_v55 }
  0x55   : > { %1036 = vperm.xlu1 %7528, %v862_v56   ;;  %6625 = vmatprep.mubr.msk.f32.mxu0 %vm382_vm1, %v373_v57  ;;  %v1131_v57 = vld [vmem:[%s9564_s5] sm:$0xf] }
  0x56   : > { %6684 = vmatprep.subr.msk.mxu0 %vm479_vm0, %v1131_v57 }
  0x57   : > { %1041 = vperm.xlu0 %7527, %v863_v58  }
  0x58   : > { %6626 = vmatmul.mubr.msk.f32.gmra.mrb[26].mxu0 %vm382_vm1, %v374_v59 }
  0x59   : > { %1046 = vperm.xlu1 %7528, %v864_v60   ;;  %6628 = vmatprep.mubr.msk.f32.mxu0 %vm382_vm1, %v375_v61  ;;  %v8014_v61 = vld [vmem:[%s9564_s5 + $0xc] sm:$0xf] }
  0x5a   : > { %6784 = vmatprep.subr.msk.mxu1 %vm479_vm0, %v8014_v61 }
  0x5b   : > { %1051 = vperm.xlu0 %7527, %v865_v62  }
  0x5c   : > { %6629 = vmatmul.mubr.msk.f32.gmra.mrb[28].mxu0 %vm382_vm1, %v376_v63 }
  0x5d   : > { %1056 = vperm.xlu1 %7528, %v866_v0   ;;  %6631 = vmatprep.mubr.msk.f32.mxu0 %vm382_vm1, %v377_v1 }
  0x5f   : > { %1061 = vperm.xlu0 %7527, %v867_v2  }
  0x60   : > { %6632 = vmatmul.mubr.msk.f32.gmra.mrb[30].mxu0 %vm382_vm1, %v378_v3 }
  0x61   : > { %1066 = vperm.xlu1 %7528, %v868_v4   ;;  %6636 = vmatprep.mubr.msk.f32.mxu0 %vm382_vm1, %v1132_v23 }
  0x63   : > { %1071 = vperm.xlu0 %7527, %v869_v5  }
  0x64   : > { %6637 = vmatmul.mubr.msk.f32.vlgmr.msra.gmra.mrb[32].mxu0 %vm382_vm1, %v1133_v24 }
  0x65   : > { %1076 = vperm.xlu1 %7528, %v870_v6   ;;  %6685 = vmatpush3.msk.msra.mxu0 %vm479_vm0, %v1131_v57 }
  0x66   : > { %6734 = vmatprep.subr.msk.mxu0 %vm479_vm0, %v7984_v52 }
  0x67   : > { %1081 = vperm.xlu0 %7527, %v871_v7  }
  0x69   : > { %1086 = vperm.xlu1 %7528, %v872_v8  }
  0x6b   : > { %1091 = vperm.xlu0 %7527, %v873_v9  }
  0x6d   : > { %1096 = vperm.xlu1 %7528, %v874_v10  }
  0x6f   : > { %1848 = vperm.xlu0 %7527, %v875_v11  }
  0x71   : > { %1853 = vperm.xlu1 %7528, %v876_v12  }
  0x73   : > { %1858 = vperm.xlu0 %7527, %v877_v13  }
  0x75   : > { %1863 = vperm.xlu1 %7528, %v878_v14  }
  0x77   : > { %1868 = vperm.xlu0 %7527, %v879_v15  }
  0x79   : > { %1873 = vperm.xlu1 %7528, %v880_v16  }
  0x7b   : > { %1878 = vperm.xlu0 %7527, %v881_v17  }
  0x7d   : > { %1883 = vperm.xlu1 %7528, %v882_v18  }
  0x7f   : > { %1888 = vperm.xlu0 %7527, %v883_v19  }
  0x81   : > { %1893 = vperm.xlu1 %7528, %v884_v20   ;;  %v8062_v20 = vstv %s379_s14 }
  0x83   : > { %1898 = vperm.xlu0 %7527, %v885_v22  }
  0x85   : > { %1903 = vperm.xlu1 %7528, %v886_v25  }
  0x87   : > { %1908 = vperm.xlu0 %7527, %v887_v26  }
  0x89   : > { %1913 = vperm.xlu1 %7528, %v888_v27  }
  0x8b   : > { %1918 = vperm.xlu0 %7527, %v889_v28  }
  0x8d   : > { %1923 = vperm.xlu1 %7528, %v890_v29  }
  0x8f   : > { %1928 = vperm.xlu0 %7527, %v891_v30  }
  0x91   : > { %1933 = vperm.xlu1 %7528, %v892_v31  }
  0x93   : > { %1938 = vperm.xlu0 %7527, %v893_v32  }
  0x95   : > { %1943 = vperm.xlu1 %7528, %v894_v33  }
  0x97   : > { %1948 = vperm.xlu0 %7527, %v895_v34  }
  0x99   : > { %1953 = vperm.xlu1 %7528, %v896_v35  }
  0x9b   : > { %1958 = vperm.xlu0 %7527, %v897_v36  }
  0x9d   : > { %1963 = vperm.xlu1 %7528, %v898_v37  }
  0x9e   : > { %v7953_v38 = vpop.permute.xlu0 %1968 }
  0x9f   : > { %9674 = vst [vmem:[#allocation6_spill] sm:$0xff] %v7953_v38 }
  0xa0   : > { %v7955_v39 = vpop.permute.xlu1 %1978 }
  0xa1   : > { %9675 = vst [vmem:[#allocation7_spill] sm:$0xff] %v7955_v39 }
  0xa2   : > { %v7957_v40 = vpop.permute.xlu0 %1973 }
  0xa4   : > { %v7959_v41 = vpop.permute.xlu1 %1983 }
  0xa5   : > { %9676 = vst [vmem:[#allocation8_spill] sm:$0xff] %v7959_v41 }
  0xa6   : > { %v7961_v42 = vpop.permute.xlu0 %1988 }
  0xa7   : > { %9677 = vst [vmem:[#allocation9_spill] sm:$0xff] %v7961_v42 }
  0xa8   : > { %v7963_v43 = vpop.permute.xlu1 %1993 }
  0xa9   : > { %9678 = vst [vmem:[#allocation10_spill] sm:$0xff] %v7963_v43 }
  0xaa   : > { %v7965_v44 = vpop.permute.xlu0 %1998 }
  0xab   : > { %9679 = vst [vmem:[#allocation11_spill] sm:$0xff] %v7965_v44 }
  0xac   : > { %v7967_v45 = vpop.permute.xlu1 %2003 }
  0xae   : > { %v7969_v46 = vpop.permute.xlu0 %941 }
  0xb0   : > { %v7971_v47 = vpop.permute.xlu1 %946 }
  0xb2   : > { %v7973_v48 = vpop.permute.xlu0 %951 }
  0xb4   : > { %v7975_v49 = vpop.permute.xlu1 %956 }
  0xb6   : > { %v7977_v50 = vpop.permute.xlu0 %961 }
  0xb7   : > { %9680 = vst [vmem:[#allocation12_spill] sm:$0xff] %v7977_v50 }
  0xb8   : > { %v7979_v51 = vpop.permute.xlu1 %966 }
  0xb9   : > { %9681 = vst [vmem:[#allocation13_spill] sm:$0xff] %v7979_v51 }
  0xba   : > { %v7988_v53 = vpop.permute.xlu0 %971 }
  0xbb   : > { %9682 = vst [vmem:[#allocation14_spill] sm:$0xff] %v7988_v53 }
  0xbc   : > { %v7992_v54 = vpop.permute.xlu1 %976 }
  0xbd   : > { %9683 = vst [vmem:[#allocation15_spill] sm:$0xff] %v7992_v54 }
  0xbe   : > { %v7994_v55 = vpop.permute.xlu0 %981 }
  0xbf   : > { %9684 = vst [vmem:[#allocation16_spill] sm:$0xff] %v7994_v55 }
  0xc0   : > { %v7996_v56 = vpop.permute.xlu1 %986 }
  0xc1   : > { %9685 = vst [vmem:[#allocation17_spill] sm:$0xff] %v7996_v56 }
  0xc2   : > { %v8001_v58 = vpop.permute.xlu0 %991 }
  0xc3   : > { %9686 = vst [vmem:[#allocation18_spill] sm:$0xff] %v8001_v58 }
  0xc4   : > { %v8005_v59 = vpop.permute.xlu1 %996 }
  0xc5   : > { %9687 = vst [vmem:[#allocation19_spill] sm:$0xff] %v8005_v59 }
  0xc6   : > { %v8009_v60 = vpop.permute.xlu0 %1001 }
  0xc7   : > { %9688 = vst [vmem:[#allocation20_spill] sm:$0xff] %v8009_v60 }
  0xc8   : > { %v8018_v62 = vpop.permute.xlu1 %1006 }
  0xc9   : > { %9689 = vst [vmem:[#allocation21_spill] sm:$0xff] %v8018_v62 }
  0xca   : > { %v8020_v63 = vpop.permute.xlu0 %1011 }
  0xcb   : > { %9690 = vst [vmem:[#allocation22_spill] sm:$0xff] %v8020_v63 }
  0xcc   : > { %v8022_v0 = vpop.permute.xlu1 %1016 }
  0xcd   : > { %9691 = vst [vmem:[#allocation23_spill] sm:$0xff] %v8022_v0 }
  0xce   : > { %v8024_v1 = vpop.permute.xlu0 %1021 }
  0xcf   : > { %9692 = vst [vmem:[#allocation24_spill] sm:$0xff] %v8024_v1 }
  0xd0   : > { %v8026_v2 = vpop.permute.xlu1 %1026 }
  0xd1   : > { %9693 = vst [vmem:[#allocation25_spill] sm:$0xff] %v8026_v2 }
  0xd2   : > { %v8028_v3 = vpop.permute.xlu0 %1031 }
  0xd3   : > { %9694 = vst [vmem:[#allocation26_spill] sm:$0xff] %v8028_v3 }
  0xd4   : > { %v8030_v4 = vpop.permute.xlu1 %1036 }
  0xd5   : > { %9695 = vst [vmem:[#allocation27_spill] sm:$0xff] %v8030_v4 }
  0xd6   : > { %v8032_v5 = vpop.permute.xlu0 %1041 }
  0xd7   : > { %9696 = vst [vmem:[#allocation28_spill] sm:$0xff] %v8032_v5 }
  0xd8   : > { %v8034_v6 = vpop.permute.xlu1 %1046 }
  0xd9   : > { %9697 = vst [vmem:[#allocation29_spill] sm:$0xff] %v8034_v6 }
  0xda   : > { %v8036_v7 = vpop.permute.xlu0 %1051 }
  0xdb   : > { %9698 = vst [vmem:[#allocation30_spill] sm:$0xff] %v8036_v7 }
  0xdc   : > { %v8038_v8 = vpop.permute.xlu1 %1056 }
  0xdd   : > { %9699 = vst [vmem:[#allocation31_spill] sm:$0xff] %v8038_v8 }
  0xde   : > { %v8040_v9 = vpop.permute.xlu0 %1061 }
  0xdf   : > { %9700 = vst [vmem:[#allocation32_spill] sm:$0xff] %v8040_v9 }
  0xe0   : > { %v8042_v10 = vpop.permute.xlu1 %1066 }
  0xe1   : > { %9701 = vst [vmem:[#allocation33_spill] sm:$0xff] %v8042_v10 }
  0xe2   : > { %v8044_v11 = vpop.permute.xlu0 %1071 }
  0xe3   : > { %9702 = vst [vmem:[#allocation34_spill] sm:$0xff] %v8044_v11 }
  0xe4   : > { %v8046_v12 = vpop.permute.xlu1 %1076 }
  0xe5   : > { %9703 = vst [vmem:[#allocation35_spill] sm:$0xff] %v8046_v12 }
  0xe6   : > { %v8048_v13 = vpop.permute.xlu0 %1081 }
  0xe7   : > { %9704 = vst [vmem:[#allocation36_spill] sm:$0xff] %v8048_v13 }
  0xe8   : > { %v8050_v14 = vpop.permute.xlu1 %1086 }
  0xe9   : > { %9705 = vst [vmem:[#allocation37_spill] sm:$0xff] %v8050_v14 }
  0xea   : > { %v8052_v15 = vpop.permute.xlu0 %1091 }
  0xeb   : > { %9706 = vst [vmem:[#allocation38_spill] sm:$0xff] %v8052_v15 }
  0xec   : > { %v8054_v16 = vpop.permute.xlu1 %1096 }
  0xed   : > { %9707 = vst [vmem:[#allocation39_spill] sm:$0xff] %v8054_v16 }
  0xee   : > { %v8056_v17 = vpop.permute.xlu0 %1848 }
  0xef   : > { %9708 = vst [vmem:[#allocation40_spill] sm:$0xff] %v8056_v17 }
  0xf0   : > { %v8058_v18 = vpop.permute.xlu1 %1853 }
  0xf1   : > { %9709 = vst [vmem:[#allocation41_spill] sm:$0xff] %v8058_v18 }
  0xf2   : > { %v8060_v19 = vpop.permute.xlu0 %1858 }
  0xf3   : > { %9710 = vst [vmem:[#allocation42_spill] sm:$0xff] %v8060_v19 }
  0xf4   : > { %v8064_v22 = vpop.permute.xlu1 %1863 }
  0xf5   : > { %9711 = vst [vmem:[#allocation43_spill] sm:$0xff] %v8064_v22 }
  0xf6   : > { %v8068_v27 = vpop.permute.xlu0 %1868 }
  0xf7   : > { %v6588_v21 = vpop.f32.mrb[0].mxu0 }
  0xf8   : > { %vm709_vm2 = vcmp.ge.f32.partialorder %v6588_v21, 0.0  ;;  %v742_v23 = vmul.f32 %v6588_v21, %v8062_v20  ;;  %v549_v24 = vpop.f32.mrb[1].mxu0  ;;  %v8074_v33 = vpop.permute.xlu1 %1873 }
  0xf9   : > { %vm708_vm3 = vcmp.ge.f32.partialorder %v549_v24, 0.0  ;;  %v741_v25 = vmul.f32 %v8062_v20, %v549_v24 }
  0xfa   : > { %v774_v26 = vsel %vm709_vm2, %v6588_v21, %v742_v23  ;;  %v8079_v21 = vpop.permute.xlu0 %1878 }
  0xfb   : > { %812 = vst.msk [vmem:[#allocation2 + $0x20] sm:$0xff] %vm382_vm1, %v774_v26  ;;  %v773_v28 = vsel %vm708_vm3, %v549_v24, %v741_v25  ;;  %v6591_v29 = vpop.f32.mrb[2].mxu0  ;;  %9712 = vst [vmem:[#allocation44_spill] sm:$0xff] %v8079_v21 }
  0xfc   : > { %811 = vst.msk [vmem:[#allocation2 + $0x18] sm:$0xff] %vm382_vm1, %v773_v28  ;;  %vm711_vm4 = vcmp.ge.f32.partialorder %v6591_v29, 0.0  ;;  %v744_v30 = vmul.f32 %v6591_v29, %v8062_v20  ;;  %v559_v31 = vpop.f32.mrb[3].mxu0 }
  0xfd   : > { %vm710_vm5 = vcmp.ge.f32.partialorder %v559_v31, 0.0  ;;  %v743_v32 = vmul.f32 %v8062_v20, %v559_v31 }
  0xfe   : > { %v776_v34 = vsel %vm711_vm4, %v6591_v29, %v744_v30  ;;  %v8085_v30 = vpop.permute.xlu1 %1883 }
  0xff   : > { %814 = vst.msk [vmem:[#allocation2 + $0x30] sm:$0xff] %vm382_vm1, %v776_v34  ;;  %v775_v35 = vsel %vm710_vm5, %v559_v31, %v743_v32  ;;  %v6594_v36 = vpop.f32.mrb[4].mxu0  ;;  %9714 = vst [vmem:[#allocation46_spill] sm:$0xff] %v8085_v30 }
 0x100   : > { %813 = vst.msk [vmem:[#allocation2 + $0x28] sm:$0xff] %vm382_vm1, %v775_v35  ;;  %vm713_vm6 = vcmp.ge.f32.partialorder %v6594_v36, 0.0  ;;  %v746_v37 = vmul.f32 %v6594_v36, %v8062_v20  ;;  %v569_v57 = vpop.f32.mrb[5].mxu0 }
 0x101   : > { %vm712_vm7 = vcmp.ge.f32.partialorder %v569_v57, 0.0  ;;  %v745_v23 = vmul.f32 %v8062_v20, %v569_v57 }
 0x102   : > { %v778_v24 = vsel %vm713_vm6, %v6594_v36, %v746_v37  ;;  %v1135_v34 = vld [vmem:[#allocation2 + $0x20] sm:$0xff]  ;;  %v8096_v37 = vpop.permute.xlu0 %1888 }
 0x103   : > { %v8082_v25 = vld [vmem:[#allocation2 + $0x19] sm:$0xff]  ;;  %816 = vst.msk [vmem:[#allocation2 + $0x40] sm:$0xff] %vm382_vm1, %v778_v24  ;;  %v777_v26 = vsel %vm712_vm7, %v569_v57, %v745_v23  ;;  %v6597_v28 = vpop.f32.mrb[6].mxu0  ;;  %9716 = vst [vmem:[#allocation48_spill] sm:$0xff] %v8096_v37 }
 0x104   : > { %9713 = vst [vmem:[#allocation45_spill] sm:$0xff] %v8082_v25  ;;  %v1134_v29 = vld [vmem:[#allocation2 + $0x18] sm:$0xff]  ;;  %v8089_v31 = vmul.f32 %v8082_v25, %v8056_v17  ;;  %815 = vst.msk [vmem:[#allocation2 + $0x38] sm:$0xff] %vm382_vm1, %v777_v26  ;;  %vm715_vm8 = vcmp.ge.f32.partialorder %v6597_v28, 0.0  ;;  %v579_v32 = vpop.f32.mrb[7].mxu0  ;;  %v748_v35 = vmul.f32 %v6597_v28, %v8062_v20 }
 0x105   : > { %6639 = vmatprep.mubr.msk.f32.mxu0 %vm382_vm1, %v1134_v29  ;;  %vm714_vm9 = vcmp.ge.f32.partialorder %v579_v32, 0.0  ;;  %v747_v36 = vmul.f32 %v8062_v20, %v579_v32 }
 0x106   : > { %9715 = vst [vmem:[#allocation47_spill] sm:$0xff] %v8089_v31  ;;  %6640 = vmatmul.mubr.msk.f32.gmra.mrb[34].mxu0 %vm382_vm1, %v1135_v34  ;;  %v780_v24 = vsel %vm715_vm8, %v6597_v28, %v748_v35 }
 0x107   : > { %v8098_v57 = vld [vmem:[#allocation2 + $0x29] sm:$0xff]  ;;  %v8100_v23 = vld [vmem:[#allocation2 + $0x21] sm:$0xff]  ;;  %v779_v26 = vsel %vm714_vm9, %v579_v32, %v747_v36  ;;  %v6600_v31 = vpop.f32.mrb[8].mxu0  ;;  %818 = vst.msk [vmem:[#allocation2 + $0x50] sm:$0xff] %vm382_vm1, %v780_v24  ;;  %v8119_v36 = vpop.permute.xlu1 %1893 }
 0x108   : > { %9717 = vst [vmem:[#allocation49_spill] sm:$0xff] %v8098_v57  ;;  %9718 = vst [vmem:[#allocation50_spill] sm:$0xff] %v8100_v23  ;;  %v1136_v25 = vld [vmem:[#allocation2 + $0x28] sm:$0xff]  ;;  %v8104_v29 = vmul.f32 %v8098_v57, %v8056_v17  ;;  %v8108_v16 = vmul.f32 %v8100_v23, %v8058_v18  ;;  %v8112_v34 = vmul.f32 %v8098_v57, %v8060_v19  ;;  %v589_v28 = vpop.f32.mrb[9].mxu0  ;;  %v1137_v32 = vld [vmem:[#allocation2 + $0x30] sm:$0xff]  ;;  %vm717_vm10 = vcmp.ge.f32.partialorder %v6600_v31, 0.0 }
 0x109   : > { %817 = vst.msk [vmem:[#allocation2 + $0x48] sm:$0xff] %vm382_vm1, %v779_v26  ;;  %6642 = vmatprep.mubr.msk.f32.mxu0 %vm382_vm1, %v1136_v25  ;;  %v750_v35 = vmul.f32 %v6600_v31, %v8062_v20  ;;  %vm716_vm11 = vcmp.ge.f32.partialorder %v589_v28, 0.0 }
 0x10a   : > { %9719 = vst [vmem:[#allocation51_spill] sm:$0xff] %v8104_v29  ;;  %9720 = vst [vmem:[#allocation52_spill] sm:$0xff] %v8108_v16  ;;  %6643 = vmatmul.mubr.msk.f32.gmra.mrb[36].mxu0 %vm382_vm1, %v1137_v32  ;;  %v749_v29 = vmul.f32 %v8062_v20, %v589_v28 }
 0x10b   : > { %9721 = vst [vmem:[#allocation53_spill] sm:$0xff] %v8112_v34  ;;  %v8122_v16 = vld [vmem:[#allocation2 + $0x31] sm:$0xff]  ;;  %v8124_v34 = vld [vmem:[#allocation2 + $0x39] sm:$0xff]  ;;  %v782_v24 = vsel %vm717_vm10, %v6600_v31, %v750_v35  ;;  %v6603_v26 = vpop.f32.mrb[10].mxu0 }
 0x10c   : > { %9722 = vst [vmem:[#allocation54_spill] sm:$0xff] %v8122_v16  ;;  %9723 = vst [vmem:[#allocation55_spill] sm:$0xff] %v8124_v34  ;;  %v8126_v57 = vld [vmem:[#allocation2 + $0x38] sm:$0xff]  ;;  %v8130_v25 = vmul.f32 %v8122_v16, %v8058_v18  ;;  %v8134_v32 = vmul.f32 %v8124_v34, %v8060_v19  ;;  %v8138_v23 = vmul.f32 %v8122_v16, %v8064_v22  ;;  %v599_v31 = vpop.f32.mrb[11].mxu0  ;;  %v1139_v35 = vld [vmem:[#allocation2 + $0x40] sm:$0xff]  ;;  %vm719_vm12 = vcmp.ge.f32.partialorder %v6603_v26, 0.0  ;;  %v8160_v16 = vpop.permute.xlu1 %1903 }
 0x10d   : > { %9724 = vst [vmem:[#allocation56_spill] sm:$0xff] %v8126_v57  ;;  %v8142_v17 = vmul.f32 %v8124_v34, %v8068_v27  ;;  %820 = vst.msk [vmem:[#allocation2 + $0x60] sm:$0xff] %vm382_vm1, %v782_v24  ;;  %6645 = vmatprep.mubr.msk.f32.mxu0 %vm382_vm1, %v8126_v57  ;;  %v781_v19 = vsel %vm716_vm11, %v589_v28, %v749_v29  ;;  %vm718_vm13 = vcmp.ge.f32.partialorder %v599_v31, 0.0 }
 0x10e   : > { %9725 = vst [vmem:[#allocation57_spill] sm:$0xff] %v8130_v25  ;;  %9726 = vst [vmem:[#allocation58_spill] sm:$0xff] %v8134_v32  ;;  %v8147_v25 = vpop.permute.xlu0 %1898  ;;  %6646 = vmatmul.mubr.msk.f32.gmra.mrb[38].mxu0 %vm382_vm1, %v1139_v35  ;;  %v752_v32 = vmul.f32 %v6603_v26, %v8062_v20  ;;  %v8180_v15 = vld [vmem:[#allocation2 + $0x50] sm:$0xff] }
 0x10f   : > { %9727 = vst [vmem:[#allocation59_spill] sm:$0xff] %v8138_v23  ;;  %9728 = vst [vmem:[#allocation60_spill] sm:$0xff] %v8142_v17  ;;  %v751_v17 = vmul.f32 %v8062_v20, %v599_v31  ;;  %v6606_v57 = vpop.f32.mrb[12].mxu0 }
 0x110   : > { %819 = vst.msk [vmem:[#allocation2 + $0x58] sm:$0xff] %vm382_vm1, %v781_v19  ;;  %v8154_v24 = vld [vmem:[#allocation2 + $0x41] sm:$0xff]  ;;  %v8156_v23 = vld [vmem:[#allocation2 + $0x49] sm:$0xff]  ;;  %9732 = vst [vmem:[#allocation64_spill] sm:$0xff] %v8160_v16  ;;  %v609_v18 = vpop.f32.mrb[13].mxu0  ;;  %vm721_vm14 = vcmp.ge.f32.partialorder %v6606_v57, 0.0 }
 0x111   : > { %9729 = vst [vmem:[#allocation61_spill] sm:$0xff] %v8154_v24  ;;  %9730 = vst [vmem:[#allocation62_spill] sm:$0xff] %v8156_v23  ;;  %v8158_v34 = vld [vmem:[#allocation2 + $0x48] sm:$0xff]  ;;  %v8164_v29 = vmul.f32 %v8154_v24, %v8064_v22  ;;  %v8168_v19 = vmul.f32 %v8156_v23, %v8068_v27  ;;  %v8172_v28 = vmul.f32 %v8154_v24, %v8074_v33  ;;  %vm720_vm15 = vcmp.ge.f32.partialorder %v609_v18, 0.0 }
 0x112   : > { %9731 = vst [vmem:[#allocation63_spill] sm:$0xff] %v8158_v34  ;;  %v8176_v35 = vmul.f32 %v8156_v23, %v8079_v21  ;;  %6648 = vmatprep.mubr.msk.f32.mxu0 %vm382_vm1, %v8158_v34  ;;  %9737 = vst [vmem:[#allocation69_spill] sm:$0xff] %v8180_v15  ;;  %v783_v22 = vsel %vm718_vm13, %v599_v31, %v751_v17 }
 0x113   : > { %9733 = vst [vmem:[#allocation65_spill] sm:$0xff] %v8164_v29  ;;  %9734 = vst [vmem:[#allocation66_spill] sm:$0xff] %v8168_v19  ;;  %v784_v29 = vsel %vm719_vm12, %v6603_v26, %v752_v32  ;;  %6649 = vmatmul.mubr.msk.f32.gmra.mrb[40].mxu0 %vm382_vm1, %v8180_v15  ;;  %v754_v19 = vmul.f32 %v6606_v57, %v8062_v20  ;;  %v6609_v34 = vpop.f32.mrb[14].mxu0  ;;  %v8201_v15 = vpop.permute.xlu1 %1913 }
 0x114   : > { %9735 = vst [vmem:[#allocation67_spill] sm:$0xff] %v8172_v28  ;;  %9736 = vst [vmem:[#allocation68_spill] sm:$0xff] %v8176_v35  ;;  %v753_v35 = vmul.f32 %v8062_v20, %v609_v18  ;;  %v8189_v28 = vpop.permute.xlu0 %1908  ;;  %vm723_vm2 = vcmp.ge.f32.partialorder %v6609_v34, 0.0  ;;  %v756_v17 = vmul.f32 %v6609_v34, %v8062_v20  ;;  %v619_v26 = vpop.f32.mrb[15].mxu0 }
 0x115   : > { %822 = vst.msk [vmem:[#allocation2 + $0x70] sm:$0xff] %vm382_vm1, %v784_v29  ;;  %821 = vst.msk [vmem:[#allocation2 + $0x68] sm:$0xff] %vm382_vm1, %v783_v22  ;;  %v786_v23 = vsel %vm721_vm14, %v6606_v57, %v754_v19  ;;  %vm722_vm3 = vcmp.ge.f32.partialorder %v619_v26, 0.0  ;;  %v755_v22 = vmul.f32 %v8062_v20, %v619_v26  ;;  %v8221_v19 = vld [vmem:[#allocation2 + $0x60] sm:$0xff] }
 0x116   : > { %9738 = vst [vmem:[#allocation70_spill] sm:$0xff] %v8189_v28  ;;  %v785_v24 = vsel %vm720_vm15, %v609_v18, %v753_v35  ;;  %824 = vst.msk [vmem:[#allocation2 + $0x80] sm:$0xff] %vm382_vm1, %v786_v23  ;;  %v788_v35 = vsel %vm723_vm2, %v6609_v34, %v756_v17 }
 0x117   : > { %v8192_v32 = vld [vmem:[#allocation2 + $0x51] sm:$0xff]  ;;  %v8194_v31 = vld [vmem:[#allocation2 + $0x59] sm:$0xff]  ;;  %823 = vst.msk [vmem:[#allocation2 + $0x78] sm:$0xff] %vm382_vm1, %v785_v24  ;;  %9742 = vst [vmem:[#allocation74_spill] sm:$0xff] %v8201_v15 }
 0x118   : > { %9739 = vst [vmem:[#allocation71_spill] sm:$0xff] %v8192_v32  ;;  %9740 = vst [vmem:[#allocation72_spill] sm:$0xff] %v8194_v31  ;;  %v8199_v29 = vld [vmem:[#allocation2 + $0x58] sm:$0xff]  ;;  %v8205_v18 = vmul.f32 %v8192_v32, %v8074_v33  ;;  %v8209_v57 = vmul.f32 %v8194_v31, %v8079_v21  ;;  %v8213_v23 = vmul.f32 %v8192_v32, %v8085_v30 }
 0x119   : > { %9741 = vst [vmem:[#allocation73_spill] sm:$0xff] %v8199_v29  ;;  %v8217_v24 = vmul.f32 %v8194_v31, %v8096_v37  ;;  %6651 = vmatprep.mubr.msk.f32.mxu0 %vm382_vm1, %v8199_v29  ;;  %9747 = vst [vmem:[#allocation79_spill] sm:$0xff] %v8221_v19  ;;  %v8229_v31 = vpop.permute.xlu0 %1918 }
 0x11a   : > { %9743 = vst [vmem:[#allocation75_spill] sm:$0xff] %v8205_v18  ;;  %9744 = vst [vmem:[#allocation76_spill] sm:$0xff] %v8209_v57  ;;  %v787_v18 = vsel %vm722_vm3, %v619_v26, %v755_v22  ;;  %6652 = vmatmul.mubr.msk.f32.gmra.mrb[42].mxu0 %vm382_vm1, %v8221_v19  ;;  %v6612_v57 = vpop.f32.mrb[16].mxu0 }
 0x11b   : > { %9745 = vst [vmem:[#allocation77_spill] sm:$0xff] %v8213_v23  ;;  %9746 = vst [vmem:[#allocation78_spill] sm:$0xff] %v8217_v24  ;;  %vm725_vm4 = vcmp.ge.f32.partialorder %v6612_v57, 0.0  ;;  %v758_v23 = vmul.f32 %v6612_v57, %v8062_v20  ;;  %v629_v24 = vpop.f32.mrb[17].mxu0 }
 0x11c   : > { %826 = vst.msk [vmem:[#allocation2 + $0x90] sm:$0xff] %vm382_vm1, %v788_v35  ;;  %825 = vst.msk [vmem:[#allocation2 + $0x88] sm:$0xff] %vm382_vm1, %v787_v18  ;;  %v8231_v29 = vld [vmem:[#allocation2 + $0x61] sm:$0xff]  ;;  %v8233_v32 = vld [vmem:[#allocation2 + $0x69] sm:$0xff]  ;;  %vm724_vm5 = vcmp.ge.f32.partialorder %v629_v24, 0.0  ;;  %v757_v34 = vmul.f32 %v8062_v20, %v629_v24 }
 0x11d   : > { %9748 = vst [vmem:[#allocation80_spill] sm:$0xff] %v8231_v29  ;;  %9749 = vst [vmem:[#allocation81_spill] sm:$0xff] %v8233_v32  ;;  %v8236_v17 = vld [vmem:[#allocation2 + $0x68] sm:$0xff]  ;;  %v8240_v26 = vmul.f32 %v8231_v29, %v8085_v30  ;;  %v8244_v22 = vmul.f32 %v8233_v32, %v8096_v37  ;;  %v8248_v18 = vmul.f32 %v8231_v29, %v8119_v36  ;;  %v8256_v19 = vld [vmem:[#allocation2 + $0x70] sm:$0xff] }
 0x11e   : > { %9750 = vst [vmem:[#allocation82_spill] sm:$0xff] %v8236_v17  ;;  %v8252_v35 = vmul.f32 %v8233_v32, %v8147_v25  ;;  %6654 = vmatprep.mubr.msk.f32.mxu0 %vm382_vm1, %v8236_v17  ;;  %9755 = vst [vmem:[#allocation87_spill] sm:$0xff] %v8256_v19  ;;  %v790_v21 = vsel %vm725_vm4, %v6612_v57, %v758_v23  ;;  %v789_v30 = vsel %vm724_vm5, %v629_v24, %v757_v34  ;;  %v8262_v37 = vld [vmem:[#allocation2 + $0x71] sm:$0xff] }
 0x11f   : > { %9751 = vst [vmem:[#allocation83_spill] sm:$0xff] %v8240_v26  ;;  %9752 = vst [vmem:[#allocation84_spill] sm:$0xff] %v8244_v22  ;;  %6655 = vmatmul.mubr.msk.f32.gmra.mrb[44].mxu0 %vm382_vm1, %v8256_v19  ;;  %v6615_v26 = vpop.f32.mrb[18].mxu0  ;;  %v8260_v22 = vpop.permute.xlu1 %1923  ;;  %v8269_v57 = vld [vmem:[#allocation2 + $0x78] sm:$0xff]  ;;  %v8273_v23 = vmul.f32 %v8262_v37, %v8119_v36  ;;  %v8281_v34 = vmul.f32 %v8262_v37, %v8160_v16  ;;  %v8289_v19 = vld [vmem:[#allocation2 + $0x80] sm:$0xff] }
 0x120   : > { %9753 = vst [vmem:[#allocation85_spill] sm:$0xff] %v8248_v18  ;;  %9754 = vst [vmem:[#allocation86_spill] sm:$0xff] %v8252_v35  ;;  %v8264_v18 = vld [vmem:[#allocation2 + $0x79] sm:$0xff]  ;;  %vm727_vm6 = vcmp.ge.f32.partialorder %v6615_v26, 0.0  ;;  %v760_v35 = vmul.f32 %v6615_v26, %v8062_v20  ;;  %v639_v17 = vpop.f32.mrb[19].mxu0  ;;  %6657 = vmatprep.mubr.msk.f32.mxu0 %vm382_vm1, %v8269_v57 }
 0x121   : > { %9756 = vst [vmem:[#allocation88_spill] sm:$0xff] %v8260_v22  ;;  %9757 = vst [vmem:[#allocation89_spill] sm:$0xff] %v8262_v37  ;;  %v8277_v24 = vmul.f32 %v8264_v18, %v8147_v25  ;;  %vm726_vm7 = vcmp.ge.f32.partialorder %v639_v17, 0.0 }
 0x122   : > { %9758 = vst [vmem:[#allocation90_spill] sm:$0xff] %v8264_v18  ;;  %828 = vst.msk [vmem:[#allocation2 + $0xa0] sm:$0xff] %vm382_vm1, %v790_v21  ;;  %v8285_v21 = vmul.f32 %v8264_v18, %v8189_v28 }
 0x123   : > { %827 = vst.msk [vmem:[#allocation2 + $0x98] sm:$0xff] %vm382_vm1, %v789_v30  ;;  %9759 = vst [vmem:[#allocation91_spill] sm:$0xff] %v8269_v57  ;;  %v792_v30 = vsel %vm727_vm6, %v6615_v26, %v760_v35  ;;  %v8293_v32 = vld [vmem:[#allocation2 + $0x81] sm:$0xff]  ;;  %6658 = vmatmul.mubr.msk.f32.gmra.mrb[46].mxu0 %vm382_vm1, %v8289_v19  ;;  %v8322_v29 = vpop.permute.xlu1 %1933 }
 0x124   : > { %9760 = vst [vmem:[#allocation92_spill] sm:$0xff] %v8273_v23  ;;  %9761 = vst [vmem:[#allocation93_spill] sm:$0xff] %v8277_v24  ;;  %v8291_v23 = vpop.permute.xlu0 %1928  ;;  %v8295_v24 = vld [vmem:[#allocation2 + $0x89] sm:$0xff]  ;;  %v8305_v26 = vmul.f32 %v8293_v32, %v8160_v16  ;;  %v8313_v57 = vmul.f32 %v8293_v32, %v8201_v15 }
 0x125   : > { %9762 = vst [vmem:[#allocation94_spill] sm:$0xff] %v8281_v34  ;;  %9763 = vst [vmem:[#allocation95_spill] sm:$0xff] %v8285_v21  ;;  %v759_v34 = vmul.f32 %v8062_v20, %v639_v17  ;;  %v6618_v21 = vpop.f32.mrb[20].mxu0  ;;  %v8301_v18 = vld [vmem:[#allocation2 + $0x88] sm:$0xff]  ;;  %v8309_v35 = vmul.f32 %v8295_v24, %v8189_v28 }
 0x126   : > { %9764 = vst [vmem:[#allocation96_spill] sm:$0xff] %v8289_v19  ;;  %9765 = vst [vmem:[#allocation97_spill] sm:$0xff] %v8291_v23  ;;  %v649_v19 = vpop.f32.mrb[21].mxu0  ;;  %6660 = vmatprep.mubr.msk.f32.mxu0 %vm382_vm1, %v8301_v18  ;;  %vm729_vm8 = vcmp.ge.f32.partialorder %v6618_v21, 0.0 }
 0x127   : > { %9766 = vst [vmem:[#allocation98_spill] sm:$0xff] %v8293_v32  ;;  %9767 = vst [vmem:[#allocation99_spill] sm:$0xff] %v8295_v24  ;;  %v791_v37 = vsel %vm726_vm7, %v639_v17, %v759_v34  ;;  %vm728_vm9 = vcmp.ge.f32.partialorder %v649_v19, 0.0  ;;  %v6621_v17 = vpop.f32.mrb[22].mxu0 }
 0x128   : > { %830 = vst.msk [vmem:[#allocation2 + $0xb0] sm:$0xff] %vm382_vm1, %v792_v30  ;;  %9768 = vst [vmem:[#allocation100_spill] sm:$0xff] %v8301_v18  ;;  %v8317_v30 = vmul.f32 %v8295_v24, %v8229_v31  ;;  %v659_v16 = vpop.f32.mrb[23].mxu0  ;;  %vm731_vm10 = vcmp.ge.f32.partialorder %v6621_v17, 0.0 }
 0x129   : > { %9769 = vst [vmem:[#allocation101_spill] sm:$0xff] %v8305_v26  ;;  %9770 = vst [vmem:[#allocation102_spill] sm:$0xff] %v8309_v35  ;;  %v762_v35 = vmul.f32 %v6618_v21, %v8062_v20  ;;  %v761_v26 = vmul.f32 %v8062_v20, %v649_v19  ;;  %vm730_vm11 = vcmp.ge.f32.partialorder %v659_v16, 0.0 }
 0x12a   : > { %9771 = vst [vmem:[#allocation103_spill] sm:$0xff] %v8313_v57  ;;  %9772 = vst [vmem:[#allocation104_spill] sm:$0xff] %v8317_v30  ;;  %v8327_v57 = vld [vmem:[#allocation2 + $0x90] sm:$0xff]  ;;  %v8331_v30 = vld [vmem:[#allocation2 + $0x99] sm:$0xff] }
 0x12b   : > { %9773 = vst [vmem:[#allocation105_spill] sm:$0xff] %v8322_v29  ;;  %829 = vst.msk [vmem:[#allocation2 + $0xa8] sm:$0xff] %vm382_vm1, %v791_v37  ;;  %v8329_v24 = vld [vmem:[#allocation2 + $0x91] sm:$0xff]  ;;  %6661 = vmatmul.mubr.msk.f32.gmra.mrb[48].mxu0 %vm382_vm1, %v8327_v57  ;;  %v8343_v18 = vmul.f32 %v8331_v30, %v8229_v31  ;;  %v8351_v28 = vmul.f32 %v8331_v30, %v8291_v23 }
 0x12c   : > { %9774 = vst [vmem:[#allocation106_spill] sm:$0xff] %v8327_v57  ;;  %9775 = vst [vmem:[#allocation107_spill] sm:$0xff] %v8329_v24  ;;  %v8335_v34 = vld [vmem:[#allocation2 + $0x98] sm:$0xff]  ;;  %v8339_v37 = vmul.f32 %v8329_v24, %v8201_v15  ;;  %v8347_v32 = vmul.f32 %v8329_v24, %v8260_v22  ;;  %v8353_v57 = vpop.permute.xlu0 %1938  ;;  %v793_v15 = vsel %vm728_vm9, %v649_v19, %v761_v26 }
 0x12d   : > { %9776 = vst [vmem:[#allocation108_spill] sm:$0xff] %v8331_v30  ;;  %9777 = vst [vmem:[#allocation109_spill] sm:$0xff] %v8335_v34  ;;  %6663 = vmatprep.mubr.msk.f32.mxu0 %vm382_vm1, %v8335_v34  ;;  %v8367_v34 = vpop.permute.xlu1 %1943 }
 0x12e   : > { %9778 = vst [vmem:[#allocation110_spill] sm:$0xff] %v8339_v37  ;;  %9779 = vst [vmem:[#allocation111_spill] sm:$0xff] %v8343_v18  ;;  %v794_v37 = vsel %vm729_vm8, %v6618_v21, %v762_v35  ;;  %v764_v18 = vmul.f32 %v6621_v17, %v8062_v20  ;;  %v6624_v21 = vpop.f32.mrb[24].mxu0 }
 0x12f   : > { %9780 = vst [vmem:[#allocation112_spill] sm:$0xff] %v8347_v32  ;;  %9781 = vst [vmem:[#allocation113_spill] sm:$0xff] %v8351_v28  ;;  %v763_v28 = vmul.f32 %v8062_v20, %v659_v16  ;;  %v8363_v32 = vld [vmem:[#allocation2 + $0xa0] sm:$0xff]  ;;  %vm733_vm12 = vcmp.ge.f32.partialorder %v6624_v21, 0.0  ;;  %v766_v26 = vmul.f32 %v6624_v21, %v8062_v20 }
 0x130   : > { %9782 = vst [vmem:[#allocation114_spill] sm:$0xff] %v8353_v57  ;;  %832 = vst.msk [vmem:[#allocation2 + $0xc0] sm:$0xff] %vm382_vm1, %v794_v37  ;;  %6664 = vmatmul.mubr.msk.f32.gmra.mrb[50].mxu0 %vm382_vm1, %v8363_v32  ;;  %v796_v35 = vsel %vm731_vm10, %v6621_v17, %v764_v18 }
 0x131   : > { %831 = vst.msk [vmem:[#allocation2 + $0xb8] sm:$0xff] %vm382_vm1, %v793_v15  ;;  %9783 = vst [vmem:[#allocation115_spill] sm:$0xff] %v8363_v32  ;;  %v795_v19 = vsel %vm730_vm11, %v659_v16, %v763_v28  ;;  %v669_v15 = vpop.f32.mrb[25].mxu0 }
 0x132   : > { %v8370_v37 = vld [vmem:[#allocation2 + $0xa1] sm:$0xff]  ;;  %v8372_v30 = vld [vmem:[#allocation2 + $0xa9] sm:$0xff]  ;;  %834 = vst.msk [vmem:[#allocation2 + $0xd0] sm:$0xff] %vm382_vm1, %v796_v35  ;;  %833 = vst.msk [vmem:[#allocation2 + $0xc8] sm:$0xff] %vm382_vm1, %v795_v19  ;;  %vm732_vm13 = vcmp.ge.f32.partialorder %v669_v15, 0.0  ;;  %v765_v32 = vmul.f32 %v8062_v20, %v669_v15  ;;  %v8395_v35 = vpop.permute.xlu0 %1948 }
 0x133   : > { %9784 = vst [vmem:[#allocation116_spill] sm:$0xff] %v8370_v37  ;;  %9785 = vst [vmem:[#allocation117_spill] sm:$0xff] %v8372_v30  ;;  %v8377_v24 = vld [vmem:[#allocation2 + $0xa8] sm:$0xff]  ;;  %v8381_v16 = vmul.f32 %v8370_v37, %v8260_v22  ;;  %v8385_v28 = vmul.f32 %v8372_v30, %v8291_v23  ;;  %v8389_v18 = vmul.f32 %v8370_v37, %v8322_v29  ;;  %v8399_v19 = vld [vmem:[#allocation2 + $0xb0] sm:$0xff]  ;;  %v8411_v37 = vpop.permute.xlu1 %1953 }
 0x134   : > { %9786 = vst [vmem:[#allocation118_spill] sm:$0xff] %v8377_v24  ;;  %v8393_v17 = vmul.f32 %v8372_v30, %v8353_v57  ;;  %9791 = vst [vmem:[#allocation123_spill] sm:$0xff] %v8395_v35  ;;  %6666 = vmatprep.mubr.msk.f32.mxu0 %vm382_vm1, %v8377_v24  ;;  %v797_v22 = vsel %vm732_vm13, %v669_v15, %v765_v32 }
 0x135   : > { %9787 = vst [vmem:[#allocation119_spill] sm:$0xff] %v8381_v16  ;;  %9788 = vst [vmem:[#allocation120_spill] sm:$0xff] %v8385_v28  ;;  %v798_v16 = vsel %vm733_vm12, %v6624_v21, %v766_v26  ;;  %6667 = vmatmul.mubr.msk.f32.gmra.mrb[52].mxu0 %vm382_vm1, %v8399_v19  ;;  %v6627_v28 = vpop.f32.mrb[26].mxu0 }
 0x136   : > { %9789 = vst [vmem:[#allocation121_spill] sm:$0xff] %v8389_v18  ;;  %9790 = vst [vmem:[#allocation122_spill] sm:$0xff] %v8393_v17  ;;  %vm735_vm14 = vcmp.ge.f32.partialorder %v6627_v28, 0.0  ;;  %v768_v17 = vmul.f32 %v6627_v28, %v8062_v20  ;;  %v679_v18 = vpop.f32.mrb[27].mxu0 }
 0x137   : > { %9792 = vst [vmem:[#allocation124_spill] sm:$0xff] %v8399_v19  ;;  %836 = vst.msk [vmem:[#allocation2 + $0xe0] sm:$0xff] %vm382_vm1, %v798_v16  ;;  %vm734_vm15 = vcmp.ge.f32.partialorder %v679_v18, 0.0  ;;  %v767_v32 = vmul.f32 %v8062_v20, %v679_v18  ;;  %v8434_v19 = vld [vmem:[#allocation2 + $0xc0] sm:$0xff] }
 0x138   : > { %835 = vst.msk [vmem:[#allocation2 + $0xd8] sm:$0xff] %vm382_vm1, %v797_v22  ;;  %v8407_v30 = vld [vmem:[#allocation2 + $0xb1] sm:$0xff]  ;;  %v8409_v24 = vld [vmem:[#allocation2 + $0xb9] sm:$0xff]  ;;  %9800 = vst [vmem:[#allocation132_spill] sm:$0xff] %v8434_v19  ;;  %v800_v23 = vsel %vm735_vm14, %v6627_v28, %v768_v17 }
 0x139   : > { %9793 = vst [vmem:[#allocation125_spill] sm:$0xff] %v8407_v30  ;;  %9794 = vst [vmem:[#allocation126_spill] sm:$0xff] %v8409_v24  ;;  %v8414_v21 = vld [vmem:[#allocation2 + $0xb8] sm:$0xff]  ;;  %v8418_v26 = vmul.f32 %v8407_v30, %v8322_v29  ;;  %v8422_v22 = vmul.f32 %v8409_v24, %v8353_v57  ;;  %v8426_v15 = vmul.f32 %v8407_v30, %v8367_v34  ;;  %v4462_v57 = vld [vmem:[#allocation2 + $0xc9] sm:$0xff]  ;;  %v8440_v30 = vpop.permute.xlu0 %1958 }
 0x13a   : > { %9795 = vst [vmem:[#allocation127_spill] sm:$0xff] %v8414_v21  ;;  %v8430_v16 = vmul.f32 %v8409_v24, %v8395_v35  ;;  %6669 = vmatprep.mubr.msk.f32.mxu0 %vm382_vm1, %v8414_v21  ;;  %v799_v29 = vsel %vm734_vm15, %v679_v18, %v767_v32  ;;  %838 = vst.msk [vmem:[#allocation2 + $0xf0] sm:$0xff] %vm382_vm1, %v800_v23  ;;  %v8445_v21 = vld [vmem:[#allocation2 + $0xc8] sm:$0xff]  ;;  %v8452_v18 = vmul.f32 %v4462_v57, %v8395_v35 }
 0x13b   : > { %9796 = vst [vmem:[#allocation128_spill] sm:$0xff] %v8418_v26  ;;  %9797 = vst [vmem:[#allocation129_spill] sm:$0xff] %v8422_v22  ;;  %6670 = vmatmul.mubr.msk.f32.gmra.mrb[54].mxu0 %vm382_vm1, %v8434_v19  ;;  %v6630_v26 = vpop.f32.mrb[28].mxu0  ;;  %v8438_v22 = vld [vmem:[#allocation2 + $0xc1] sm:$0xff]  ;;  %v8459_v23 = vmul.f32 %v4462_v57, %v8440_v30  ;;  %v8464_v19 = vld [vmem:[#allocation2 + $0xd0] sm:$0xff] }
 0x13c   : > { %9798 = vst [vmem:[#allocation130_spill] sm:$0xff] %v8426_v15  ;;  %9799 = vst [vmem:[#allocation131_spill] sm:$0xff] %v8430_v16  ;;  %vm737_vm2 = vcmp.ge.f32.partialorder %v6630_v26, 0.0  ;;  %v770_v16 = vmul.f32 %v6630_v26, %v8062_v20  ;;  %v689_v15 = vpop.f32.mrb[29].mxu0  ;;  %v8449_v28 = vmul.f32 %v8438_v22, %v8367_v34  ;;  %v8456_v17 = vmul.f32 %v8438_v22, %v8411_v37 }
 0x13d   : > { %9801 = vst [vmem:[#allocation133_spill] sm:$0xff] %v8438_v22  ;;  %837 = vst.msk [vmem:[#allocation2 + $0xe8] sm:$0xff] %vm382_vm1, %v799_v29  ;;  %6672 = vmatprep.mubr.msk.f32.mxu0 %vm382_vm1, %v8445_v21  ;;  %vm736_vm3 = vcmp.ge.f32.partialorder %v689_v15, 0.0  ;;  %v769_v32 = vmul.f32 %v8062_v20, %v689_v15 }
 0x13e   : > { %9802 = vst [vmem:[#allocation134_spill] sm:$0xff] %v8445_v21  ;;  %9803 = vst [vmem:[#allocation135_spill] sm:$0xff] %v8449_v28  ;;  %v802_v29 = vsel %vm737_vm2, %v6630_v26, %v770_v16 }
 0x13f   : > { %9804 = vst [vmem:[#allocation136_spill] sm:$0xff] %v8452_v18  ;;  %9805 = vst [vmem:[#allocation137_spill] sm:$0xff] %v8456_v17  ;;  %v4463_v28 = vld [vmem:[#allocation2 + $0xd1] sm:$0xff]  ;;  %v8466_v24 = vld [vmem:[#allocation2 + $0xd9] sm:$0xff]  ;;  %v8468_v18 = vpop.permute.xlu1 %1963  ;;  %6673 = vmatmul.mubr.msk.f32.gmra.mrb[56].mxu0 %vm382_vm1, %v8464_v19  ;;  %v6633_v17 = vpop.f32.mrb[30].mxu0  ;;  %v801_v35 = vsel %vm736_vm3, %v689_v15, %v769_v32 }
 0x140   : > { %9806 = vst [vmem:[#allocation138_spill] sm:$0xff] %v8459_v23  ;;  %840 = vst.msk [vmem:[#allocation2 + $0x100] sm:$0xff] %vm382_vm1, %v802_v29  ;;  %v2030_v23 = vmul.f32 %v4462_v57, %v7953_v38  ;;  %v8474_v21 = vld [vmem:[#allocation2 + $0xd8] sm:$0xff]  ;;  %v8477_v26 = vmul.f32 %v4463_v28, %v8411_v37  ;;  %v8481_v16 = vmul.f32 %v8466_v24, %v8440_v30  ;;  %v699_v29 = vpop.f32.mrb[31].mxu0  ;;  %vm739_vm4 = vcmp.ge.f32.partialorder %v6633_v17, 0.0  ;;  %v8492_v38 = vld [vmem:[#allocation2 + $0xe0] sm:$0xff] }
 0x141   : > { %9807 = vst [vmem:[#allocation139_spill] sm:$0xff] %v8474_v21  ;;  %v8484_v22 = vmul.f32 %v4463_v28, %v8468_v18  ;;  %6675 = vmatprep.mubr.msk.f32.mxu0 %vm382_vm1, %v8474_v21  ;;  %839 = vst.msk [vmem:[#allocation2 + $0xf8] sm:$0xff] %vm382_vm1, %v801_v35  ;;  %v772_v57 = vmul.f32 %v6633_v17, %v8062_v20  ;;  %vm738_vm5 = vcmp.ge.f32.partialorder %v699_v29, 0.0 }
 0x142   : > { %9808 = vst [vmem:[#allocation140_spill] sm:$0xff] %v8477_v26  ;;  %9809 = vst [vmem:[#allocation141_spill] sm:$0xff] %v8481_v16  ;;  %6772 = vmatprep.mubr.msk.f32.mxu1 %vm382_vm1, %v2030_v23  ;;  %v771_v26 = vmul.f32 %v8062_v20, %v699_v29  ;;  %v2031_v16 = vmul.f32 %v4463_v28, %v7957_v40  ;;  %v2032_v15 = vmul.f32 %v8466_v24, %v7955_v39  ;;  %v5892_v20 = vld [vmem:[%s9564_s5 + $0x10] sm:$0xf] }
 0x143   : > { %9810 = vst [vmem:[#allocation142_spill] sm:$0xff] %v8484_v22  ;;  %v804_v22 = vsel %vm739_vm4, %v6633_v17, %v772_v57  ;;  %6676 = vmatmul.mubr.msk.f32.gmra.mrb[58].mxu0 %vm382_vm1, %v8492_v38 }
 0x144   : > { %v8497_v32 = vld [vmem:[#allocation2 + $0xe1] sm:$0xff]  ;;  %v803_v21 = vsel %vm738_vm5, %v699_v29, %v771_v26  ;;  %842 = vst.msk [vmem:[#allocation2 + $0x110] sm:$0xff] %vm382_vm1, %v804_v22  ;;  %6773 = vmatmul.mubr.msk.f32.vlgmr.msra.gmra.mrb[0].mxu1 %vm382_vm1, %v2031_v16  ;;  %v8517_v17 = vld [vmem:[#allocation2 + $0xe9] sm:$0xff] }
 0x145   : > { %v8501_v35 = vld [vmem:[#allocation2 + $0xe8] sm:$0xff]  ;;  %v8508_v23 = vmul.f32 %v8497_v32, %v8468_v18  ;;  %841 = vst.msk [vmem:[#allocation2 + $0x108] sm:$0xff] %vm382_vm1, %v803_v21  ;;  %v2033_v28 = vmul.f32 %v8497_v32, %v7959_v41  ;;  %6775 = vmatprep.mubr.msk.f32.mxu1 %vm382_vm1, %v2032_v15  ;;  %v2034_v26 = vmul.f32 %v7961_v42, %v8517_v17  ;;  %v8524_v22 = vld [vmem:[#allocation2 + $0xf0] sm:$0xff] }
 0x146   : > { %6678 = vmatprep.mubr.msk.f32.mxu0 %vm382_vm1, %v8501_v35  ;;  %6785 = vmatpush3.msk.msra.mxu1 %vm479_vm0, %v8014_v61  ;;  %v907_v21 = vld [vmem:[#allocation2 + $0x7] sm:$0xff]  ;;  %v909_v41 = vld [vmem:[#allocation2 + $0x17] sm:$0xff] }
 0x147   : > { %9811 = vst [vmem:[#allocation143_spill] sm:$0xff] %v8508_v23  ;;  %6834 = vmatprep.subr.msk.mxu1 %vm479_vm0, %v5892_v20  ;;  %6679 = vmatmul.mubr.msk.f32.gmra.mrb[60].mxu0 %vm382_vm1, %v8524_v22  ;;  %v1099_v23 = vmul.f32 %v7969_v46, %v907_v21  ;;  %v8544_v42 = vld [vmem:[#allocation2 + $0x100] sm:$0xff]  ;;  %v1101_v21 = vmul.f32 %v7973_v48, %v909_v41 }
 0x148   : > { %6776 = vmatmul.mubr.msk.f32.gmra.mrb[2].mxu1 %vm382_vm1, %v2033_v28  ;;  %v8530_v16 = vld [vmem:[#allocation2 + $0xf8] sm:$0xff]  ;;  %v908_v28 = vld [vmem:[#allocation2 + $0xf] sm:$0xff] }
 0x149   : > { %v8532_v29 = vld [vmem:[#allocation2 + $0xf1] sm:$0xff]  ;;  %v8534_v57 = vld [vmem:[#allocation2 + $0xf9] sm:$0xff]  ;;  %6778 = vmatprep.mubr.msk.f32.mxu1 %vm382_vm1, %v2034_v26  ;;  %6681 = vmatprep.mubr.msk.f32.mxu0 %vm382_vm1, %v8530_v16 }
 0x14a   : > { %9812 = vst [vmem:[#allocation144_spill] sm:$0xff] %v8532_v29  ;;  %9813 = vst [vmem:[#allocation145_spill] sm:$0xff] %v8534_v57  ;;  %v2035_v61 = vmul.f32 %v7963_v43, %v8532_v29  ;;  %v2036_v15 = vmul.f32 %v7965_v44, %v8534_v57  ;;  %v1100_v44 = vmul.f32 %v7971_v47, %v908_v28  ;;  %v910_v43 = vld [vmem:[#allocation2 + $0x1f] sm:$0xff]  ;;  %v8559_v29 = vld [vmem:[#allocation2 + $0x27] sm:$0xff] }
 0x14b   : > { %6682 = vmatmul.mubr.msk.f32.gmra.mrb[62].mxu0 %vm382_vm1, %v8544_v42  ;;  %v2428_v57 = vmul.f32 %v7969_v46, %v909_v41  ;;  %v2430_v41 = vmul.f32 %v7973_v48, %v8559_v29  ;;  %v8575_v28 = vld [vmem:[#allocation2 + $0x37] sm:$0xff] }
 0x14c   : > { %v8548_v39 = vld [vmem:[#allocation2 + $0x101] sm:$0xff]  ;;  %6686 = vmatprep.mubr.msk.f32.mxu0 %vm382_vm1, %v1099_v23  ;;  %6779 = vmatmul.mubr.msk.f32.gmra.mrb[4].mxu1 %vm382_vm1, %v2035_v61  ;;  %v1102_v23 = vmul.f32 %v7975_v49, %v910_v43  ;;  %v1103_v61 = vmul.f32 %v7977_v50, %v8559_v29 }
 0x14d   : > { %v2037_v26 = vmul.f32 %v7967_v45, %v8548_v39  ;;  %6781 = vmatprep.mubr.msk.f32.mxu1 %vm382_vm1, %v2036_v15  ;;  %v8570_v15 = vld [vmem:[#allocation2 + $0x2f] sm:$0xff] }
 0x14f   : > { %6687 = vmatmul.mubr.msk.f32.vlgmr.msra.gmra.mrb[32].mxu0 %vm382_vm1, %v1100_v44  ;;  %v2429_v44 = vmul.f32 %v7971_v47, %v910_v43  ;;  %v1104_v43 = vmul.f32 %v7979_v51, %v8570_v15 }
 0x150   : > { %6689 = vmatprep.mubr.msk.f32.mxu0 %vm382_vm1, %v1101_v21  ;;  %6782 = vmatmul.mubr.msk.f32.gmra.mrb[6].mxu1 %vm382_vm1, %v2037_v26  ;;  %v2431_v26 = vmul.f32 %v7975_v49, %v8570_v15  ;;  %v8592_v21 = vld [vmem:[#allocation2 + $0x3f] sm:$0xff] }
 0x151   : > { %6786 = vmatprep.mubr.msk.f32.mxu1 %vm382_vm1, %v2428_v57  ;;  %6735 = vmatpush3.msk.msra.mxu0 %vm479_vm0, %v7984_v52  ;;  %v8580_v57 = vld [vmem:[%s9564_s5 + $0x14] sm:$0xf]  ;;  %v1105_v52 = vmul.f32 %v7988_v53, %v8575_v28 }
 0x153   : > { %6690 = vmatmul.mubr.msk.f32.gmra.mrb[34].mxu0 %vm382_vm1, %v1102_v23  ;;  %v2432_v23 = vmul.f32 %v7977_v50, %v8575_v28  ;;  %v8615_v50 = vld [vmem:[#allocation2 + $0x57] sm:$0xff] }
 0x154   : > { %6692 = vmatprep.mubr.msk.f32.mxu0 %vm382_vm1, %v1103_v61  ;;  %6787 = vmatmul.mubr.msk.f32.vlgmr.msra.gmra.mrb[8].mxu1 %vm382_vm1, %v2429_v44  ;;  %v8599_v61 = vld [vmem:[#allocation2 + $0x47] sm:$0xff] }
 0x155   : > { %6789 = vmatprep.mubr.msk.f32.mxu1 %vm382_vm1, %v2430_v41  ;;  %6835 = vmatpush3.msk.msra.mxu1 %vm479_vm0, %v5892_v20  ;;  %v1106_v20 = vmul.f32 %v7992_v54, %v8592_v21  ;;  %v1107_v44 = vmul.f32 %v7994_v55, %v8599_v61  ;;  %v2433_v41 = vmul.f32 %v7979_v51, %v8592_v21  ;;  %v8626_v51 = vld [vmem:[#allocation2 + $0x5f] sm:$0xff] }
 0x156   : > { %6884 = vmatprep.subr.msk.mxu1 %vm479_vm0, %v8580_v57 }
 0x157   : > { %6693 = vmatmul.mubr.msk.f32.gmra.mrb[36].mxu0 %vm382_vm1, %v1104_v43  ;;  %v8610_v43 = vld [vmem:[#allocation2 + $0x4f] sm:$0xff] }
 0x158   : > { %6695 = vmatprep.mubr.msk.f32.mxu0 %vm382_vm1, %v1105_v52  ;;  %6790 = vmatmul.mubr.msk.f32.gmra.mrb[10].mxu1 %vm382_vm1, %v2431_v26  ;;  %v2434_v52 = vmul.f32 %v7988_v53, %v8599_v61  ;;  %v1108_v26 = vmul.f32 %v7996_v56, %v8610_v43  ;;  %v8631_v53 = vld [vmem:[#allocation2 + $0x67] sm:$0xff] }
 0x159   : > { %6792 = vmatprep.mubr.msk.f32.mxu1 %vm382_vm1, %v2432_v23  ;;  %v1109_v23 = vmul.f32 %v8001_v58, %v8615_v50 }
 0x15b   : > { %6696 = vmatmul.mubr.msk.f32.gmra.mrb[38].mxu0 %vm382_vm1, %v1106_v20  ;;  %v2435_v20 = vmul.f32 %v7992_v54, %v8610_v43  ;;  %v8642_v54 = vld [vmem:[#allocation2 + $0x6f] sm:$0xff] }
 0x15c   : > { %6698 = vmatprep.mubr.msk.f32.mxu0 %vm382_vm1, %v1107_v44  ;;  %6793 = vmatmul.mubr.msk.f32.gmra.mrb[12].mxu1 %vm382_vm1, %v2433_v41  ;;  %v2436_v44 = vmul.f32 %v7994_v55, %v8615_v50  ;;  %v1110_v41 = vmul.f32 %v8005_v59, %v8626_v51  ;;  %v8647_v55 = vld [vmem:[#allocation2 + $0x77] sm:$0xff] }
 0x15d   : > { %6795 = vmatprep.mubr.msk.f32.mxu1 %vm382_vm1, %v2434_v52  ;;  %v1111_v52 = vmul.f32 %v8009_v60, %v8631_v53 }
 0x15f   : > { %6699 = vmatmul.mubr.msk.f32.gmra.mrb[40].mxu0 %vm382_vm1, %v1108_v26  ;;  %v2437_v26 = vmul.f32 %v7996_v56, %v8626_v51  ;;  %v8658_v56 = vld [vmem:[#allocation2 + $0x7f] sm:$0xff] }
 0x160   : > { %6701 = vmatprep.mubr.msk.f32.mxu0 %vm382_vm1, %v1109_v23  ;;  %6796 = vmatmul.mubr.msk.f32.gmra.mrb[14].mxu1 %vm382_vm1, %v2435_v20  ;;  %v2438_v23 = vmul.f32 %v8001_v58, %v8631_v53  ;;  %v1112_v20 = vmul.f32 %v8018_v62, %v8642_v54  ;;  %v8663_v58 = vld [vmem:[#allocation2 + $0x87] sm:$0xff] }
 0x161   : > { %6798 = vmatprep.mubr.msk.f32.mxu1 %vm382_vm1, %v2436_v44  ;;  %v1113_v44 = vmul.f32 %v8020_v63, %v8647_v55 }
 0x163   : > { %6702 = vmatmul.mubr.msk.f32.gmra.mrb[42].mxu0 %vm382_vm1, %v1110_v41  ;;  %v2439_v41 = vmul.f32 %v8005_v59, %v8642_v54  ;;  %v8674_v59 = vld [vmem:[#allocation2 + $0x8f] sm:$0xff] }
 0x164   : > { %6704 = vmatprep.mubr.msk.f32.mxu0 %vm382_vm1, %v1111_v52  ;;  %6799 = vmatmul.mubr.msk.f32.gmra.mrb[16].mxu1 %vm382_vm1, %v2437_v26  ;;  %v2440_v52 = vmul.f32 %v8009_v60, %v8647_v55  ;;  %v1114_v26 = vmul.f32 %v8022_v0, %v8658_v56  ;;  %v8679_v60 = vld [vmem:[#allocation2 + $0x97] sm:$0xff] }
 0x165   : > { %6801 = vmatprep.mubr.msk.f32.mxu1 %vm382_vm1, %v2438_v23  ;;  %v1115_v23 = vmul.f32 %v8024_v1, %v8663_v58 }
 0x167   : > { %6705 = vmatmul.mubr.msk.f32.gmra.mrb[44].mxu0 %vm382_vm1, %v1112_v20  ;;  %v2441_v20 = vmul.f32 %v8018_v62, %v8658_v56  ;;  %v8690_v62 = vld [vmem:[#allocation2 + $0x9f] sm:$0xff] }
 0x168   : > { %6707 = vmatprep.mubr.msk.f32.mxu0 %vm382_vm1, %v1113_v44  ;;  %6802 = vmatmul.mubr.msk.f32.gmra.mrb[18].mxu1 %vm382_vm1, %v2439_v41  ;;  %v2442_v44 = vmul.f32 %v8020_v63, %v8663_v58  ;;  %v1116_v41 = vmul.f32 %v8026_v2, %v8674_v59  ;;  %v8695_v63 = vld [vmem:[#allocation2 + $0xa7] sm:$0xff] }
 0x169   : > { %6804 = vmatprep.mubr.msk.f32.mxu1 %vm382_vm1, %v2440_v52  ;;  %v1117_v52 = vmul.f32 %v8028_v3, %v8679_v60 }
 0x16b   : > { %6708 = vmatmul.mubr.msk.f32.gmra.mrb[46].mxu0 %vm382_vm1, %v1114_v26  ;;  %v2443_v26 = vmul.f32 %v8022_v0, %v8674_v59  ;;  %v8706_v0 = vld [vmem:[#allocation2 + $0xaf] sm:$0xff] }
 0x16c   : > { %6710 = vmatprep.mubr.msk.f32.mxu0 %vm382_vm1, %v1115_v23  ;;  %6805 = vmatmul.mubr.msk.f32.gmra.mrb[20].mxu1 %vm382_vm1, %v2441_v20  ;;  %v2444_v23 = vmul.f32 %v8024_v1, %v8679_v60  ;;  %v1118_v20 = vmul.f32 %v8030_v4, %v8690_v62  ;;  %v8711_v1 = vld [vmem:[#allocation2 + $0xb7] sm:$0xff] }
 0x16d   : > { %6807 = vmatprep.mubr.msk.f32.mxu1 %vm382_vm1, %v2442_v44  ;;  %v1119_v44 = vmul.f32 %v8032_v5, %v8695_v63 }
 0x16f   : > { %6711 = vmatmul.mubr.msk.f32.gmra.mrb[48].mxu0 %vm382_vm1, %v1116_v41  ;;  %v2445_v41 = vmul.f32 %v8026_v2, %v8690_v62  ;;  %v8722_v2 = vld [vmem:[#allocation2 + $0xbf] sm:$0xff] }
 0x170   : > { %6713 = vmatprep.mubr.msk.f32.mxu0 %vm382_vm1, %v1117_v52  ;;  %6808 = vmatmul.mubr.msk.f32.gmra.mrb[22].mxu1 %vm382_vm1, %v2443_v26  ;;  %v2446_v52 = vmul.f32 %v8028_v3, %v8695_v63  ;;  %v1120_v26 = vmul.f32 %v8034_v6, %v8706_v0  ;;  %v8727_v3 = vld [vmem:[#allocation2 + $0xc7] sm:$0xff] }
 0x171   : > { %6810 = vmatprep.mubr.msk.f32.mxu1 %vm382_vm1, %v2444_v23  ;;  %v1121_v23 = vmul.f32 %v8036_v7, %v8711_v1 }
 0x173   : > { %6714 = vmatmul.mubr.msk.f32.gmra.mrb[50].mxu0 %vm382_vm1, %v1118_v20  ;;  %v2447_v20 = vmul.f32 %v8030_v4, %v8706_v0  ;;  %v8738_v4 = vld [vmem:[#allocation2 + $0xcf] sm:$0xff] }
 0x174   : > { %6716 = vmatprep.mubr.msk.f32.mxu0 %vm382_vm1, %v1119_v44  ;;  %6811 = vmatmul.mubr.msk.f32.gmra.mrb[24].mxu1 %vm382_vm1, %v2445_v41  ;;  %v2448_v44 = vmul.f32 %v8032_v5, %v8711_v1  ;;  %v1122_v41 = vmul.f32 %v8038_v8, %v8722_v2  ;;  %v8743_v5 = vld [vmem:[#allocation2 + $0xd7] sm:$0xff] }
 0x175   : > { %6813 = vmatprep.mubr.msk.f32.mxu1 %vm382_vm1, %v2446_v52  ;;  %v1123_v52 = vmul.f32 %v8040_v9, %v8727_v3  ;;  %9814 = vst [vmem:[#allocation146_spill] sm:$0xff] %v8743_v5 }
 0x177   : > { %6717 = vmatmul.mubr.msk.f32.gmra.mrb[52].mxu0 %vm382_vm1, %v1120_v26  ;;  %v2449_v26 = vmul.f32 %v8034_v6, %v8722_v2  ;;  %v8754_v6 = vld [vmem:[#allocation2 + $0xdf] sm:$0xff] }
 0x178   : > { %6719 = vmatprep.mubr.msk.f32.mxu0 %vm382_vm1, %v1121_v23  ;;  %6814 = vmatmul.mubr.msk.f32.gmra.mrb[26].mxu1 %vm382_vm1, %v2447_v20  ;;  %v2450_v23 = vmul.f32 %v8036_v7, %v8727_v3  ;;  %v1124_v20 = vmul.f32 %v8042_v10, %v8738_v4  ;;  %9815 = vst [vmem:[#allocation147_spill] sm:$0xff] %v8754_v6  ;;  %v8759_v7 = vld [vmem:[#allocation2 + $0xe7] sm:$0xff] }
 0x179   : > { %6816 = vmatprep.mubr.msk.f32.mxu1 %vm382_vm1, %v2448_v44  ;;  %v1125_v44 = vmul.f32 %v8044_v11, %v8743_v5  ;;  %9816 = vst [vmem:[#allocation148_spill] sm:$0xff] %v8759_v7 }
 0x17b   : > { %6720 = vmatmul.mubr.msk.f32.gmra.mrb[54].mxu0 %vm382_vm1, %v1122_v41  ;;  %v2451_v41 = vmul.f32 %v8038_v8, %v8738_v4  ;;  %v8770_v8 = vld [vmem:[#allocation2 + $0xef] sm:$0xff] }
 0x17c   : > { %6722 = vmatprep.mubr.msk.f32.mxu0 %vm382_vm1, %v1123_v52  ;;  %6817 = vmatmul.mubr.msk.f32.gmra.mrb[28].mxu1 %vm382_vm1, %v2449_v26  ;;  %v2452_v52 = vmul.f32 %v8040_v9, %v8743_v5  ;;  %v1126_v26 = vmul.f32 %v8046_v12, %v8754_v6  ;;  %9817 = vst [vmem:[#allocation149_spill] sm:$0xff] %v8770_v8  ;;  %v8775_v9 = vld [vmem:[#allocation2 + $0xf7] sm:$0xff] }
 0x17d   : > { %6819 = vmatprep.mubr.msk.f32.mxu1 %vm382_vm1, %v2450_v23  ;;  %v1127_v23 = vmul.f32 %v8048_v13, %v8759_v7  ;;  %9818 = vst [vmem:[#allocation150_spill] sm:$0xff] %v8775_v9  ;;  %v1815_v5 = vld [vmem:[#allocation2 + $0x11] sm:$0xff] }
 0x17f   : > { %6723 = vmatmul.mubr.msk.f32.gmra.mrb[56].mxu0 %vm382_vm1, %v1124_v20  ;;  %v2453_v20 = vmul.f32 %v8042_v10, %v8754_v6  ;;  %v8786_v6 = vld [vmem:[#allocation2 + $0xff] sm:$0xff] }
 0x180   : > { %6725 = vmatprep.mubr.msk.f32.mxu0 %vm382_vm1, %v1125_v44  ;;  %6820 = vmatmul.mubr.msk.f32.gmra.mrb[30].mxu1 %vm382_vm1, %v2451_v41  ;;  %v2454_v44 = vmul.f32 %v8044_v11, %v8759_v7  ;;  %v1128_v41 = vmul.f32 %v8050_v14, %v8770_v8  ;;  %v1814_v11 = vld [vmem:[#allocation2 + $0x9] sm:$0xff] }
 0x181   : > { %6822 = vmatprep.mubr.msk.f32.mxu1 %vm382_vm1, %v2452_v52  ;;  %v9819_v52 = vld [vmem:[#allocation38_spill] sm:$0xff] }
 0x182   : > { %v1129_v10 = vmul.f32 %v9819_v52, %v8775_v9 }
 0x183   : > { %6726 = vmatmul.mubr.msk.f32.gmra.mrb[58].mxu0 %vm382_vm1, %v1126_v26  ;;  %v2455_v26 = vmul.f32 %v8046_v12, %v8770_v8  ;;  %v9821_v12 = vld [vmem:[#allocation40_spill] sm:$0xff] }
 0x184   : > { %6728 = vmatprep.mubr.msk.f32.mxu0 %vm382_vm1, %v1127_v23  ;;  %6823 = vmatmul.mubr.msk.f32.gmra.mrb[0].mxu1 %vm382_vm1, %v2453_v20  ;;  %v2456_v23 = vmul.f32 %v8048_v13, %v8775_v9  ;;  %v8793_v20 = vld [vmem:[#allocation2 + $0x107] sm:$0xff]  ;;  %v2006_v8 = vmul.f32 %v9821_v12, %v1814_v11  ;;  %v8804_v13 = vld [vmem:[#allocation2 + $0x10f] sm:$0xff] }
 0x185   : > { %6825 = vmatprep.mubr.msk.f32.mxu1 %vm382_vm1, %v2454_v44  ;;  %v9820_v44 = vld [vmem:[#allocation39_spill] sm:$0xff]  ;;  %v9823_v11 = vld [vmem:[#allocation42_spill] sm:$0xff]  ;;  %v9824_v12 = vld [vmem:[#allocation45_spill] sm:$0xff] }
 0x186   : > { %v1130_v7 = vmul.f32 %v9820_v44, %v8786_v6  ;;  %v2008_v9 = vmul.f32 %v9824_v12, %v9823_v11  ;;  %v9830_v11 = vld [vmem:[#allocation55_spill] sm:$0xff] }
 0x187   : > { %6729 = vmatmul.mubr.msk.f32.gmra.mrb[60].mxu0 %vm382_vm1, %v1128_v41  ;;  %v2457_v41 = vmul.f32 %v8050_v14, %v8786_v6  ;;  %v2459_v14 = vmul.f32 %v8804_v13, %v9820_v44 }
 0x188   : > { %6731 = vmatprep.mubr.msk.f32.mxu0 %vm382_vm1, %v1129_v10  ;;  %6826 = vmatmul.mubr.msk.f32.gmra.mrb[2].mxu1 %vm382_vm1, %v2455_v26  ;;  %v2458_v10 = vmul.f32 %v8793_v20, %v9819_v52  ;;  %v9822_v26 = vld [vmem:[#allocation41_spill] sm:$0xff]  ;;  %v9826_v52 = vld [vmem:[#allocation50_spill] sm:$0xff] }
 0x189   : > { %6828 = vmatprep.mubr.msk.f32.mxu1 %vm382_vm1, %v2456_v23  ;;  %v2007_v23 = vmul.f32 %v9822_v26, %v1815_v5  ;;  %v9827_v5 = vld [vmem:[#allocation49_spill] sm:$0xff]  ;;  %v2819_v26 = vld [vmem:[#allocation2 + $0x20] sm:$0xff] }
 0x18b   : > { %6732 = vmatmul.mubr.msk.f32.gmra.mrb[62].mxu0 %vm382_vm1, %v1130_v7  ;;  %v2818_v7 = vld [vmem:[#allocation2 + $0x18] sm:$0xff] }
 0x18c   : > { %6736 = vmatprep.mubr.msk.f32.mxu0 %vm382_vm1, %v2006_v8  ;;  %6829 = vmatmul.mubr.msk.f32.gmra.mrb[4].mxu1 %vm382_vm1, %v2457_v41  ;;  %v9825_v8 = vld [vmem:[#allocation43_spill] sm:$0xff] }
 0x18d   : > { %6831 = vmatprep.mubr.msk.f32.mxu1 %vm382_vm1, %v2458_v10  ;;  %v2009_v41 = vmul.f32 %v9826_v52, %v9825_v8  ;;  %v2010_v10 = vmul.f32 %v9827_v5, %v8068_v27  ;;  %v9829_v27 = vld [vmem:[#allocation44_spill] sm:$0xff]  ;;  %v9832_v8 = vld [vmem:[#allocation61_spill] sm:$0xff] }
 0x18e   : > { %v2012_v12 = vmul.f32 %v9830_v11, %v9829_v27  ;;  %v9833_v5 = vld [vmem:[#allocation56_spill] sm:$0xff]  ;;  %v9837_v11 = vld [vmem:[#allocation63_spill] sm:$0xff] }
 0x18f   : > { %6737 = vmatmul.mubr.msk.f32.vlgmr.msra.gmra.mrb[32].mxu0 %vm382_vm1, %v2007_v23  ;;  %v8826_v23 = vld [vmem:[%s9564_s5 + $0x18] sm:$0xf] }
 0x190   : > { %6739 = vmatprep.mubr.msk.f32.mxu0 %vm382_vm1, %v2008_v9  ;;  %6832 = vmatmul.mubr.msk.f32.gmra.mrb[6].mxu1 %vm382_vm1, %v2459_v14  ;;  %v8830_v9 = vld [vmem:[#allocation2 + $0x28] sm:$0xff]  ;;  %v9828_v14 = vld [vmem:[#allocation54_spill] sm:$0xff] }
 0x191   : > { %6836 = vmatprep.mubr.msk.f32.mxu1 %vm382_vm1, %v2818_v7  ;;  %v2011_v52 = vmul.f32 %v9828_v14, %v8074_v33  ;;  %v8843_v7 = vld [vmem:[#allocation2 + $0x30] sm:$0xff]  ;;  %v8855_v14 = vld [vmem:[#allocation2 + $0x40] sm:$0xff] }
 0x192   : > { %v9831_v33 = vld [vmem:[#allocation46_spill] sm:$0xff] }
 0x193   : > { %6740 = vmatmul.mubr.msk.f32.gmra.mrb[34].mxu0 %vm382_vm1, %v2009_v41  ;;  %v2013_v41 = vmul.f32 %v9832_v8, %v9831_v33  ;;  %v9839_v8 = vld [vmem:[#allocation69_spill] sm:$0xff] }
 0x194   : > { %6742 = vmatprep.mubr.msk.f32.mxu0 %vm382_vm1, %v2010_v10  ;;  %6837 = vmatmul.mubr.msk.f32.vlgmr.msra.gmra.mrb[8].mxu1 %vm382_vm1, %v2819_v26  ;;  %v9835_v10 = vld [vmem:[#allocation62_spill] sm:$0xff] }
 0x195   : > { %6839 = vmatprep.mubr.msk.f32.mxu1 %vm382_vm1, %v8830_v9  ;;  %6885 = vmatpush3.msk.msra.mxu1 %vm479_vm0, %v8580_v57  ;;  %v9834_v57 = vld [vmem:[#allocation48_spill] sm:$0xff] }
 0x196   : > { %6934 = vmatprep.subr.msk.mxu1 %vm479_vm0, %v8826_v23  ;;  %v2014_v26 = vmul.f32 %v9835_v10, %v9834_v57  ;;  %v9842_v10 = vld [vmem:[#allocation73_spill] sm:$0xff] }
 0x197   : > { %6743 = vmatmul.mubr.msk.f32.gmra.mrb[36].mxu0 %vm382_vm1, %v2011_v52  ;;  %v9836_v52 = vld [vmem:[#allocation71_spill] sm:$0xff] }
 0x198   : > { %6745 = vmatprep.mubr.msk.f32.mxu0 %vm382_vm1, %v2012_v12  ;;  %6840 = vmatmul.mubr.msk.f32.gmra.mrb[10].mxu1 %vm382_vm1, %v8843_v7  ;;  %v2015_v27 = vmul.f32 %v9836_v52, %v8119_v36  ;;  %v9838_v12 = vld [vmem:[#allocation72_spill] sm:$0xff]  ;;  %v9843_v36 = vld [vmem:[#allocation70_spill] sm:$0xff] }
 0x199   : > { %6842 = vmatprep.mubr.msk.f32.mxu1 %vm382_vm1, %v9833_v5  ;;  %v2016_v33 = vmul.f32 %v9838_v12, %v8147_v25  ;;  %v9841_v5 = vld [vmem:[#allocation80_spill] sm:$0xff]  ;;  %v9845_v25 = vld [vmem:[#allocation79_spill] sm:$0xff] }
 0x19b   : > { %6746 = vmatmul.mubr.msk.f32.gmra.mrb[38].mxu0 %vm382_vm1, %v2013_v41  ;;  %v9840_v41 = vld [vmem:[#allocation64_spill] sm:$0xff] }
 0x19c   : > { %6748 = vmatprep.mubr.msk.f32.mxu0 %vm382_vm1, %v2014_v26  ;;  %6843 = vmatmul.mubr.msk.f32.gmra.mrb[12].mxu1 %vm382_vm1, %v8855_v14  ;;  %v2017_v57 = vmul.f32 %v9841_v5, %v9840_v41  ;;  %v9844_v26 = vld [vmem:[#allocation81_spill] sm:$0xff]  ;;  %v9850_v5 = vld [vmem:[#allocation87_spill] sm:$0xff] }
 0x19d   : > { %6845 = vmatprep.mubr.msk.f32.mxu1 %vm382_vm1, %v9837_v11  ;;  %v2018_v52 = vmul.f32 %v9844_v26, %v9843_v36  ;;  %v9847_v11 = vld [vmem:[#allocation89_spill] sm:$0xff]  ;;  %v9853_v26 = vld [vmem:[#allocation91_spill] sm:$0xff] }
 0x19f   : > { %6749 = vmatmul.mubr.msk.f32.gmra.mrb[40].mxu0 %vm382_vm1, %v2015_v27  ;;  %v9846_v27 = vld [vmem:[#allocation74_spill] sm:$0xff] }
 0x1a0   : > { %6751 = vmatprep.mubr.msk.f32.mxu0 %vm382_vm1, %v2016_v33  ;;  %6846 = vmatmul.mubr.msk.f32.gmra.mrb[14].mxu1 %vm382_vm1, %v9839_v8  ;;  %v2019_v12 = vmul.f32 %v9847_v11, %v9846_v27  ;;  %v9848_v33 = vld [vmem:[#allocation82_spill] sm:$0xff]  ;;  %v9857_v11 = vld [vmem:[#allocation105_spill] sm:$0xff] }
 0x1a1   : > { %6848 = vmatprep.mubr.msk.f32.mxu1 %vm382_vm1, %v9842_v10  ;;  %v9849_v8 = vld [vmem:[#allocation90_spill] sm:$0xff] }
 0x1a2   : > { %v2020_v41 = vmul.f32 %v9849_v8, %v8229_v31  ;;  %v9852_v10 = vld [vmem:[#allocation98_spill] sm:$0xff]  ;;  %v9856_v31 = vld [vmem:[#allocation96_spill] sm:$0xff] }
 0x1a3   : > { %6752 = vmatmul.mubr.msk.f32.gmra.mrb[42].mxu0 %vm382_vm1, %v2017_v57  ;;  %v9851_v57 = vld [vmem:[#allocation88_spill] sm:$0xff] }
 0x1a4   : > { %6754 = vmatprep.mubr.msk.f32.mxu0 %vm382_vm1, %v2018_v52  ;;  %6849 = vmatmul.mubr.msk.f32.gmra.mrb[16].mxu1 %vm382_vm1, %v9845_v25  ;;  %v2021_v36 = vmul.f32 %v9852_v10, %v9851_v57  ;;  %v9854_v52 = vld [vmem:[#allocation97_spill] sm:$0xff]  ;;  %v9855_v25 = vld [vmem:[#allocation99_spill] sm:$0xff]  ;;  %v9859_v8 = vld [vmem:[#allocation100_spill] sm:$0xff] }
 0x1a5   : > { %6851 = vmatprep.mubr.msk.f32.mxu1 %vm382_vm1, %v9848_v33  ;;  %v2022_v27 = vmul.f32 %v9855_v25, %v9854_v52  ;;  %v9862_v10 = vld [vmem:[#allocation106_spill] sm:$0xff]  ;;  %v9864_v52 = vld [vmem:[#allocation109_spill] sm:$0xff]  ;;  %v9865_v25 = vld [vmem:[#allocation123_spill] sm:$0xff] }
 0x1a7   : > { %6755 = vmatmul.mubr.msk.f32.gmra.mrb[44].mxu0 %vm382_vm1, %v2019_v12  ;;  %v9858_v12 = vld [vmem:[#allocation107_spill] sm:$0xff] }
 0x1a8   : > { %6757 = vmatprep.mubr.msk.f32.mxu0 %vm382_vm1, %v2020_v41  ;;  %6852 = vmatmul.mubr.msk.f32.gmra.mrb[18].mxu1 %vm382_vm1, %v9850_v5  ;;  %v2023_v33 = vmul.f32 %v9858_v12, %v9857_v11  ;;  %v9860_v41 = vld [vmem:[#allocation114_spill] sm:$0xff]  ;;  %v9861_v5 = vld [vmem:[#allocation108_spill] sm:$0xff]  ;;  %v9867_v11 = vld [vmem:[#allocation115_spill] sm:$0xff] }
 0x1a9   : > { %6854 = vmatprep.mubr.msk.f32.mxu1 %vm382_vm1, %v9853_v26  ;;  %v2024_v57 = vmul.f32 %v9861_v5, %v9860_v41  ;;  %v9868_v12 = vld [vmem:[#allocation125_spill] sm:$0xff]  ;;  %v9871_v5 = vld [vmem:[#allocation124_spill] sm:$0xff] }
 0x1ab   : > { %6758 = vmatmul.mubr.msk.f32.gmra.mrb[46].mxu0 %vm382_vm1, %v2021_v36  ;;  %v9863_v36 = vld [vmem:[#allocation116_spill] sm:$0xff] }
 0x1ac   : > { %6760 = vmatprep.mubr.msk.f32.mxu0 %vm382_vm1, %v2022_v27  ;;  %6855 = vmatmul.mubr.msk.f32.gmra.mrb[20].mxu1 %vm382_vm1, %v9856_v31  ;;  %v2025_v26 = vmul.f32 %v9863_v36, %v8367_v34  ;;  %v9866_v27 = vld [vmem:[#allocation117_spill] sm:$0xff]  ;;  %v9870_v34 = vld [vmem:[#allocation126_spill] sm:$0xff]  ;;  %v9873_v36 = vld [vmem:[#allocation127_spill] sm:$0xff] }
 0x1ad   : > { %6857 = vmatprep.mubr.msk.f32.mxu1 %vm382_vm1, %v9859_v8  ;;  %v2026_v31 = vmul.f32 %v9866_v27, %v9865_v25  ;;  %v9869_v8 = vld [vmem:[#allocation118_spill] sm:$0xff]  ;;  %v2028_v41 = vmul.f32 %v9870_v34, %v8440_v30  ;;  %v9881_v25 = vld [vmem:[#allocation60_spill] sm:$0xff]  ;;  %v9882_v27 = vld [vmem:[#allocation67_spill] sm:$0xff] }
 0x1ae   : > { %v9875_v30 = vld [vmem:[#allocation134_spill] sm:$0xff]  ;;  %v9889_v34 = vld [vmem:[#allocation95_spill] sm:$0xff] }
 0x1af   : > { %6761 = vmatmul.mubr.msk.f32.gmra.mrb[48].mxu0 %vm382_vm1, %v2023_v33  ;;  %v2027_v33 = vmul.f32 %v9868_v12, %v8411_v37  ;;  %v9874_v37 = vld [vmem:[#allocation132_spill] sm:$0xff]  ;;  %v9885_v12 = vld [vmem:[#allocation78_spill] sm:$0xff] }
 0x1b0   : > { %6763 = vmatprep.mubr.msk.f32.mxu0 %vm382_vm1, %v2024_v57  ;;  %6858 = vmatmul.mubr.msk.f32.gmra.mrb[22].mxu1 %vm382_vm1, %v9862_v10  ;;  %v9872_v57 = vld [vmem:[#allocation133_spill] sm:$0xff] }
 0x1b1   : > { %6860 = vmatprep.mubr.msk.f32.mxu1 %vm382_vm1, %v9864_v52  ;;  %v2029_v10 = vmul.f32 %v9872_v57, %v8468_v18  ;;  %v9876_v52 = vld [vmem:[#allocation139_spill] sm:$0xff]  ;;  %v8955_v18 = vld [vmem:[#allocation2 + $0x108] sm:$0xff]  ;;  %v9892_v57 = vld [vmem:[#allocation112_spill] sm:$0xff] }
 0x1b3   : > { %6764 = vmatmul.mubr.msk.f32.gmra.mrb[50].mxu0 %vm382_vm1, %v2025_v26  ;;  %v7529_v26 = vld [vmem:[%s7691_s28] sm:$0xff] }
 0x1b4   : > { %6766 = vmatprep.mubr.msk.f32.mxu0 %vm382_vm1, %v2026_v31  ;;  %6861 = vmatmul.mubr.msk.f32.gmra.mrb[24].mxu1 %vm382_vm1, %v9867_v11  ;;  %v9883_v31 = vld [vmem:[#allocation68_spill] sm:$0xff]  ;;  %v9884_v11 = vld [vmem:[#allocation77_spill] sm:$0xff] }
 0x1b5   : > { %6863 = vmatprep.mubr.msk.f32.mxu1 %vm382_vm1, %v9869_v8  ;;  %v9888_v8 = vld [vmem:[#allocation94_spill] sm:$0xff] }
 0x1b7   : > { %6767 = vmatmul.mubr.msk.f32.gmra.mrb[52].mxu0 %vm382_vm1, %v2027_v33  ;;  %v9887_v33 = vld [vmem:[#allocation86_spill] sm:$0xff] }
 0x1b8   : > { %6769 = vmatprep.mubr.msk.f32.mxu0 %vm382_vm1, %v2028_v41  ;;  %6864 = vmatmul.mubr.msk.f32.gmra.mrb[26].mxu1 %vm382_vm1, %v9871_v5  ;;  %v9890_v41 = vld [vmem:[#allocation103_spill] sm:$0xff]  ;;  %v9891_v5 = vld [vmem:[#allocation104_spill] sm:$0xff] }
 0x1b9   : > { %6866 = vmatprep.mubr.msk.f32.mxu1 %vm382_vm1, %v9873_v36  ;;  %v9894_v36 = vld [vmem:[#allocation121_spill] sm:$0xff] }
 0x1bb   : > { %6770 = vmatmul.mubr.msk.f32.gmra.mrb[54].mxu0 %vm382_vm1, %v2029_v10  ;;  %v9893_v10 = vld [vmem:[#allocation113_spill] sm:$0xff] }
 0x1bc   : > { %6867 = vmatmul.mubr.msk.f32.gmra.mrb[28].mxu1 %vm382_vm1, %v9874_v37  ;;  %7086 = vmatprep.mubr.msk.f32.mxu0 %vm382_vm1, %v7529_v26  ;;  %v9895_v37 = vld [vmem:[#allocation122_spill] sm:$0xff] }
 0x1bd   : > { %6869 = vmatprep.mubr.msk.f32.mxu1 %vm382_vm1, %v9875_v30  ;;  %v9896_v26 = vld [vmem:[#allocation130_spill] sm:$0xff]  ;;  %v9897_v30 = vld [vmem:[#allocation131_spill] sm:$0xff] }
 0x1c0   : > { %6870 = vmatmul.mubr.msk.f32.gmra.mrb[30].mxu1 %vm382_vm1, %v8464_v19  ;;  %v8959_v19 = vld [vmem:[#allocation2 + $0x110] sm:$0xff] }
 0x1c1   : > { %6872 = vmatprep.mubr.msk.f32.mxu1 %vm382_vm1, %v9876_v52  ;;  %v9898_v52 = vld [vmem:[#allocation137_spill] sm:$0xff] }
 0x1c4   : > { %6873 = vmatmul.mubr.msk.f32.gmra.mrb[0].mxu1 %vm382_vm1, %v8492_v38  ;;  %v9877_v38 = vld [vmem:[#allocation47_spill] sm:$0xff] }
 0x1c5   : > { %6875 = vmatprep.mubr.msk.f32.mxu1 %vm382_vm1, %v8501_v35  ;;  %v5994_v35 = vld [vmem:[%s9564_s5 + $0x1c] sm:$0xf] }
 0x1c8   : > { %6876 = vmatmul.mubr.msk.f32.gmra.mrb[2].mxu1 %vm382_vm1, %v8524_v22  ;;  %v9878_v22 = vld [vmem:[#allocation52_spill] sm:$0xff] }
 0x1c9   : > { %6878 = vmatprep.mubr.msk.f32.mxu1 %vm382_vm1, %v8530_v16  ;;  %v9880_v16 = vld [vmem:[#allocation59_spill] sm:$0xff] }
 0x1cc   : > { %6879 = vmatmul.mubr.msk.f32.gmra.mrb[4].mxu1 %vm382_vm1, %v8544_v42  ;;  %v9879_v42 = vld [vmem:[#allocation53_spill] sm:$0xff] }
 0x1cd   : > { %6881 = vmatprep.mubr.msk.f32.mxu1 %vm382_vm1, %v8955_v18 }
 0x1d0   : > { %6882 = vmatmul.mubr.msk.f32.gmra.mrb[6].mxu1 %vm382_vm1, %v8959_v19 }
 0x1d1   : > { %6886 = vmatprep.mubr.msk.f32.mxu1 %vm382_vm1, %v9877_v38  ;;  %v9899_v38 = vld [vmem:[#allocation138_spill] sm:$0xff] }
 0x1d4   : > { %6887 = vmatmul.mubr.msk.f32.vlgmr.msra.gmra.mrb[8].mxu1 %vm382_vm1, %v9878_v22  ;;  %v9900_v22 = vld [vmem:[#allocation6_spill] sm:$0xff] }
 0x1d5   : > { %6889 = vmatprep.mubr.msk.f32.mxu1 %vm382_vm1, %v9879_v42  ;;  %6935 = vmatpush3.msk.msra.mxu1 %vm479_vm0, %v8826_v23  ;;  %v9886_v23 = vld [vmem:[#allocation85_spill] sm:$0xff]  ;;  %v3264_v42 = vmul.f32 %v8466_v24, %v9900_v22 }
 0x1d6   : > { %6984 = vmatprep.subr.msk.mxu1 %vm479_vm0, %v5994_v35  ;;  %v9906_v24 = vld [vmem:[#allocation9_spill] sm:$0xff] }
 0x1d8   : > { %6890 = vmatmul.mubr.msk.f32.gmra.mrb[10].mxu1 %vm382_vm1, %v9880_v16  ;;  %v9901_v16 = vld [vmem:[#allocation142_spill] sm:$0xff] }
 0x1d9   : > { %6892 = vmatprep.mubr.msk.f32.mxu1 %vm382_vm1, %v9881_v25  ;;  %v3265_v25 = vmul.f32 %v8497_v32, %v7957_v40  ;;  %v9907_v32 = vld [vmem:[#allocation10_spill] sm:$0xff] }
 0x1dc   : > { %6893 = vmatmul.mubr.msk.f32.gmra.mrb[12].mxu1 %vm382_vm1, %v9882_v27  ;;  %v9902_v27 = vld [vmem:[#allocation7_spill] sm:$0xff] }
 0x1dd   : > { %6895 = vmatprep.mubr.msk.f32.mxu1 %vm382_vm1, %v9883_v31  ;;  %v3266_v31 = vmul.f32 %v9902_v27, %v8517_v17  ;;  %v9908_v17 = vld [vmem:[#allocation11_spill] sm:$0xff] }
 0x1e0   : > { %6896 = vmatmul.mubr.msk.f32.gmra.mrb[14].mxu1 %vm382_vm1, %v9884_v11  ;;  %v9903_v11 = vld [vmem:[#allocation144_spill] sm:$0xff] }
 0x1e1   : > { %6898 = vmatprep.mubr.msk.f32.mxu1 %vm382_vm1, %v9885_v12  ;;  %v9904_v12 = vld [vmem:[#allocation8_spill] sm:$0xff] }
 0x1e4   : > { %6899 = vmatmul.mubr.msk.f32.gmra.mrb[16].mxu1 %vm382_vm1, %v9886_v23  ;;  %v3267_v23 = vmul.f32 %v9904_v12, %v9903_v11  ;;  %v9920_v11 = vld [vmem:[#allocation23_spill] sm:$0xff] }
 0x1e5   : > { %6901 = vmatprep.mubr.msk.f32.mxu1 %vm382_vm1, %v9887_v33  ;;  %v9905_v33 = vld [vmem:[#allocation145_spill] sm:$0xff] }
 0x1e8   : > { %6902 = vmatmul.mubr.msk.f32.gmra.mrb[18].mxu1 %vm382_vm1, %v9888_v8  ;;  %v3268_v8 = vmul.f32 %v9906_v24, %v9905_v33  ;;  %v9922_v33 = vld [vmem:[#allocation25_spill] sm:$0xff] }
 0x1e9   : > { %6904 = vmatprep.mubr.msk.f32.mxu1 %vm382_vm1, %v9889_v34  ;;  %v9031_v34 = vld [vmem:[#allocation2 + $0x109] sm:$0xff] }
 0x1ec   : > { %6905 = vmatmul.mubr.msk.f32.gmra.mrb[20].mxu1 %vm382_vm1, %v9890_v41  ;;  %v3269_v41 = vmul.f32 %v9907_v32, %v8548_v39  ;;  %v3663_v39 = vmul.f32 %v7971_v47, %v8570_v15  ;;  %v9909_v47 = vld [vmem:[#allocation12_spill] sm:$0xff] }
 0x1ed   : > { %6907 = vmatprep.mubr.msk.f32.mxu1 %vm382_vm1, %v9891_v5  ;;  %v3270_v5 = vmul.f32 %v9031_v34, %v9908_v17 }
 0x1f0   : > { %6908 = vmatmul.mubr.msk.f32.gmra.mrb[22].mxu1 %vm382_vm1, %v9892_v57  ;;  %v9038_v57 = vld [vmem:[#allocation2 + $0x111] sm:$0xff] }
 0x1f1   : > { %6910 = vmatprep.mubr.msk.f32.mxu1 %vm382_vm1, %v9893_v10  ;;  %v3271_v10 = vmul.f32 %v9038_v57, %v7967_v45 }
 0x1f4   : > { %6911 = vmatmul.mubr.msk.f32.gmra.mrb[24].mxu1 %vm382_vm1, %v9894_v36  ;;  %v3662_v36 = vmul.f32 %v7969_v46, %v8559_v29  ;;  %v3665_v46 = vmul.f32 %v7975_v49, %v8592_v21  ;;  %v9910_v29 = vld [vmem:[#allocation13_spill] sm:$0xff]  ;;  %v9912_v49 = vld [vmem:[#allocation15_spill] sm:$0xff] }
 0x1f5   : > { %6913 = vmatprep.mubr.msk.f32.mxu1 %vm382_vm1, %v9895_v37  ;;  %v3664_v37 = vmul.f32 %v7973_v48, %v8575_v28  ;;  %v3666_v48 = vmul.f32 %v9909_v47, %v8599_v61  ;;  %v3667_v15 = vmul.f32 %v9910_v29, %v8610_v43  ;;  %v9911_v28 = vld [vmem:[#allocation14_spill] sm:$0xff]  ;;  %v3669_v21 = vmul.f32 %v9912_v49, %v8626_v51  ;;  %v9931_v47 = vld [vmem:[#allocation148_spill] sm:$0xff]  ;;  %v9933_v29 = vld [vmem:[#allocation149_spill] sm:$0xff] }
 0x1f8   : > { %6914 = vmatmul.mubr.msk.f32.gmra.mrb[26].mxu1 %vm382_vm1, %v9896_v26  ;;  %v9055_v26 = vld [vmem:[%s9564_s5 + $0x20] sm:$0xf] }
 0x1f9   : > { %6916 = vmatprep.mubr.msk.f32.mxu1 %vm382_vm1, %v9897_v30  ;;  %v3668_v30 = vmul.f32 %v9911_v28, %v8615_v50  ;;  %v9935_v28 = vld [vmem:[#allocation150_spill] sm:$0xff] }
 0x1fc   : > { %6917 = vmatmul.mubr.msk.f32.gmra.mrb[28].mxu1 %vm382_vm1, %v9898_v52  ;;  %v9914_v52 = vld [vmem:[#allocation17_spill] sm:$0xff] }
 0x1fd   : > { %6919 = vmatprep.mubr.msk.f32.mxu1 %vm382_vm1, %v9899_v38  ;;  %v3671_v43 = vmul.f32 %v9914_v52, %v8642_v54  ;;  %v9915_v38 = vld [vmem:[#allocation18_spill] sm:$0xff] }
 0x1fe   : > { %v3672_v50 = vmul.f32 %v9915_v38, %v8647_v55  ;;  %v9939_v38 = vld [vmem:[#allocation37_spill] sm:$0xff] }
 0x200   : > { %6920 = vmatmul.mubr.msk.f32.gmra.mrb[30].mxu1 %vm382_vm1, %v9901_v16  ;;  %v9917_v16 = vld [vmem:[#allocation20_spill] sm:$0xff] }
 0x201   : > { %6922 = vmatprep.mubr.msk.f32.mxu1 %vm382_vm1, %v3264_v42  ;;  %v9916_v42 = vld [vmem:[#allocation19_spill] sm:$0xff] }
 0x202   : > { %v3673_v51 = vmul.f32 %v9916_v42, %v8658_v56  ;;  %v3677_v56 = vmul.f32 %v9920_v11, %v8690_v62  ;;  %v3661_v42 = vld [vmem:[#allocation2 + $0x11f] sm:$0xff] }
 0x203   : > { %v7532_v11 = vld [vmem:[%s7691_s28 + $0x18] sm:$0xff] }
 0x204   : > { %6923 = vmatmul.mubr.msk.f32.gmra.mrb[0].mxu1 %vm382_vm1, %v3265_v25  ;;  %v9918_v25 = vld [vmem:[#allocation21_spill] sm:$0xff] }
 0x205   : > { %6925 = vmatprep.mubr.msk.f32.mxu1 %vm382_vm1, %v3266_v31  ;;  %v3675_v54 = vmul.f32 %v9918_v25, %v8674_v59  ;;  %v9919_v31 = vld [vmem:[#allocation22_spill] sm:$0xff]  ;;  %v3679_v59 = vmul.f32 %v9922_v33, %v8706_v0  ;;  %v7530_v25 = vld [vmem:[%s7691_s28 + $0x8] sm:$0xff] }
 0x206   : > { %v3676_v55 = vmul.f32 %v9919_v31, %v8679_v60  ;;  %v7534_v33 = vld [vmem:[%s7691_s28 + $0x28] sm:$0xff] }
 0x208   : > { %6926 = vmatmul.mubr.msk.f32.gmra.mrb[2].mxu1 %vm382_vm1, %v3267_v23  ;;  %v9921_v23 = vld [vmem:[#allocation24_spill] sm:$0xff] }
 0x209   : > { %6928 = vmatprep.mubr.msk.f32.mxu1 %vm382_vm1, %v3268_v8  ;;  %v9923_v8 = vld [vmem:[#allocation26_spill] sm:$0xff] }
 0x20a   : > { %v3680_v60 = vmul.f32 %v9923_v8, %v8711_v1 }
 0x20c   : > { %6929 = vmatmul.mubr.msk.f32.gmra.mrb[4].mxu1 %vm382_vm1, %v3269_v41  ;;  %v9924_v41 = vld [vmem:[#allocation27_spill] sm:$0xff] }
 0x20d   : > { %6931 = vmatprep.mubr.msk.f32.mxu1 %vm382_vm1, %v3270_v5  ;;  %v3681_v62 = vmul.f32 %v9924_v41, %v8722_v2  ;;  %v9925_v5 = vld [vmem:[#allocation28_spill] sm:$0xff] }
 0x20e   : > { %v4059_v41 = vld [vmem:[#allocation2 + $0x60] sm:$0xff] }
 0x210   : > { %6932 = vmatmul.mubr.msk.f32.gmra.mrb[6].mxu1 %vm382_vm1, %v3271_v10  ;;  %v9926_v10 = vld [vmem:[#allocation29_spill] sm:$0xff] }
 0x211   : > { %6936 = vmatprep.mubr.msk.f32.mxu1 %vm382_vm1, %v3662_v36  ;;  %v3683_v0 = vmul.f32 %v9926_v10, %v8738_v4  ;;  %v9927_v36 = vld [vmem:[#allocation146_spill] sm:$0xff] }
 0x214   : > { %6937 = vmatmul.mubr.msk.f32.vlgmr.msra.gmra.mrb[8].mxu1 %vm382_vm1, %v3663_v39  ;;  %v9928_v39 = vld [vmem:[#allocation30_spill] sm:$0xff] }
 0x215   : > { %6939 = vmatprep.mubr.msk.f32.mxu1 %vm382_vm1, %v3664_v37  ;;  %6985 = vmatpush3.msk.msra.mxu1 %vm479_vm0, %v5994_v35  ;;  %v9913_v35 = vld [vmem:[#allocation16_spill] sm:$0xff]  ;;  %v3684_v1 = vmul.f32 %v9928_v39, %v9927_v36  ;;  %v9929_v37 = vld [vmem:[#allocation147_spill] sm:$0xff]  ;;  %v4061_v36 = vld [vmem:[#allocation2 + $0x70] sm:$0xff] }
 0x216   : > { %7034 = vmatprep.subr.msk.mxu1 %vm479_vm0, %v9055_v26  ;;  %v3670_v61 = vmul.f32 %v9913_v35, %v8631_v53  ;;  %v3674_v53 = vmul.f32 %v9917_v16, %v8663_v58  ;;  %v3678_v58 = vmul.f32 %v9921_v23, %v8695_v63  ;;  %v3682_v63 = vmul.f32 %v9925_v5, %v8727_v3  ;;  %v4060_v5 = vld [vmem:[#allocation2 + $0x68] sm:$0xff] }
 0x217   : > { %v7538_v39 = vld [vmem:[%s7691_s28 + $0x48] sm:$0xff] }
 0x218   : > { %6940 = vmatmul.mubr.msk.f32.gmra.mrb[10].mxu1 %vm382_vm1, %v3665_v46  ;;  %v9930_v46 = vld [vmem:[#allocation31_spill] sm:$0xff] }
 0x219   : > { %6942 = vmatprep.mubr.msk.f32.mxu1 %vm382_vm1, %v3666_v48  ;;  %v3685_v2 = vmul.f32 %v9930_v46, %v9929_v37  ;;  %v9932_v48 = vld [vmem:[#allocation32_spill] sm:$0xff]  ;;  %v7539_v37 = vld [vmem:[%s7691_s28 + $0x50] sm:$0xff] }
 0x21a   : > { %v3686_v3 = vmul.f32 %v9932_v48, %v9931_v47  ;;  %v4063_v47 = vld [vmem:[#allocation2 + $0x80] sm:$0xff]  ;;  %v7540_v48 = vld [vmem:[%s7691_s28 + $0x58] sm:$0xff] }
 0x21c   : > { %6943 = vmatmul.mubr.msk.f32.gmra.mrb[12].mxu1 %vm382_vm1, %v3667_v15  ;;  %v9934_v15 = vld [vmem:[#allocation33_spill] sm:$0xff] }
 0x21d   : > { %6945 = vmatprep.mubr.msk.f32.mxu1 %vm382_vm1, %v3668_v30  ;;  %v3687_v4 = vmul.f32 %v9934_v15, %v9933_v29  ;;  %v9936_v30 = vld [vmem:[#allocation34_spill] sm:$0xff]  ;;  %v7541_v29 = vld [vmem:[%s7691_s28 + $0x60] sm:$0xff] }
 0x21e   : > { %v3688_v49 = vmul.f32 %v9936_v30, %v9935_v28  ;;  %v4065_v28 = vld [vmem:[#allocation2 + $0x90] sm:$0xff]  ;;  %v7542_v30 = vld [vmem:[%s7691_s28 + $0x68] sm:$0xff] }
 0x220   : > { %6946 = vmatmul.mubr.msk.f32.gmra.mrb[14].mxu1 %vm382_vm1, %v3669_v21  ;;  %v9937_v21 = vld [vmem:[#allocation35_spill] sm:$0xff] }
 0x221   : > { %6948 = vmatprep.mubr.msk.f32.mxu1 %vm382_vm1, %v3670_v61  ;;  %v3689_v35 = vmul.f32 %v9937_v21, %v8786_v6  ;;  %v9938_v61 = vld [vmem:[#allocation36_spill] sm:$0xff]  ;;  %v3693_v6 = vmul.f32 %v3661_v42, %v9820_v44  ;;  %v7543_v21 = vld [vmem:[%s7691_s28 + $0x70] sm:$0xff] }
 0x222   : > { %v3690_v52 = vmul.f32 %v8793_v20, %v9938_v61  ;;  %v4962_v20 = vld [vmem:[%s9566_s7] sm:$0xf] }
 0x223   : > { %7084 = vmatprep.subr.msk.mxu0 %vm479_vm0, %v4962_v20 }
 0x224   : > { %6949 = vmatmul.mubr.msk.f32.gmra.mrb[16].mxu1 %vm382_vm1, %v3671_v43  ;;  %v3660_v43 = vld [vmem:[#allocation2 + $0x117] sm:$0xff]  ;;  %7085 = vmatpush3.msk.msra.mxu0 %vm479_vm0, %v4962_v20 }
 0x225   : > { %6951 = vmatprep.mubr.msk.f32.mxu1 %vm382_vm1, %v3672_v50  ;;  %v3691_v50 = vmul.f32 %v8804_v13, %v9939_v38  ;;  %v4961_v13 = vld [vmem:[%s9565_s6] sm:$0xf]  ;;  %7087 = vmatmul.mubr.msk.f32.vlgmr.msra.gmra.mrb[64].mxu0 %vm382_vm1, %v7530_v25  ;;  %v4068_v38 = vld [vmem:[#allocation2 + $0xa8] sm:$0xff]  ;;  %v4070_v20 = vld [vmem:[#allocation2 + $0xb8] sm:$0xff] }
 0x226   : > { %7134 = vmatprep.subr.msk.mxu0 %vm479_vm0, %v4961_v13 }
 0x227   : > { %7135 = vmatpush3.msk.msra.mxu0 %vm479_vm0, %v4961_v13  ;;  %v7547_v13 = vld [vmem:[%s7691_s28 + $0x90] sm:$0xff] }
 0x228   : > { %6952 = vmatmul.mubr.msk.f32.gmra.mrb[18].mxu1 %vm382_vm1, %v3673_v51  ;;  %v9940_v51 = vld [vmem:[#allocation38_spill] sm:$0xff] }
 0x229   : > { %6954 = vmatprep.mubr.msk.f32.mxu1 %vm382_vm1, %v3674_v53  ;;  %v3692_v16 = vmul.f32 %v3660_v43, %v9940_v51  ;;  %v7544_v43 = vld [vmem:[%s7691_s28 + $0x78] sm:$0xff] }
 0x22c   : > { %6955 = vmatmul.mubr.msk.f32.gmra.mrb[20].mxu1 %vm382_vm1, %v3675_v54  ;;  %v4054_v54 = vld [vmem:[#allocation2 + $0x38] sm:$0xff] }
 0x22d   : > { %6957 = vmatprep.mubr.msk.f32.mxu1 %vm382_vm1, %v3676_v55 }
 0x230   : > { %6958 = vmatmul.mubr.msk.f32.gmra.mrb[22].mxu1 %vm382_vm1, %v3677_v56  ;;  %v7533_v56 = vld [vmem:[%s7691_s28 + $0x20] sm:$0xff] }
 0x231   : > { %6960 = vmatprep.mubr.msk.f32.mxu1 %vm382_vm1, %v3678_v58  ;;  %v4057_v58 = vld [vmem:[#allocation2 + $0x50] sm:$0xff] }
 0x234   : > { %6961 = vmatmul.mubr.msk.f32.gmra.mrb[24].mxu1 %vm382_vm1, %v3679_v59  ;;  %v4058_v59 = vld [vmem:[#allocation2 + $0x58] sm:$0xff] }
 0x235   : > { %6963 = vmatprep.mubr.msk.f32.mxu1 %vm382_vm1, %v3680_v60 }
 0x238   : > { %6964 = vmatmul.mubr.msk.f32.gmra.mrb[26].mxu1 %vm382_vm1, %v3681_v62  ;;  %v7536_v62 = vld [vmem:[%s7691_s28 + $0x38] sm:$0xff] }
 0x239   : > { %6966 = vmatprep.mubr.msk.f32.mxu1 %vm382_vm1, %v3682_v63  ;;  %v7537_v63 = vld [vmem:[%s7691_s28 + $0x40] sm:$0xff] }
 0x23c   : > { %6967 = vmatmul.mubr.msk.f32.gmra.mrb[28].mxu1 %vm382_vm1, %v3683_v0 }
 0x23d   : > { %6969 = vmatprep.mubr.msk.f32.mxu1 %vm382_vm1, %v3684_v1  ;;  %v4062_v1 = vld [vmem:[#allocation2 + $0x78] sm:$0xff] }
 0x240   : > { %6970 = vmatmul.mubr.msk.f32.gmra.mrb[30].mxu1 %vm382_vm1, %v3685_v2 }
 0x241   : > { %6972 = vmatprep.mubr.msk.f32.mxu1 %vm382_vm1, %v3686_v3  ;;  %v4064_v3 = vld [vmem:[#allocation2 + $0x88] sm:$0xff] }
 0x244   : > { %6973 = vmatmul.mubr.msk.f32.gmra.mrb[0].mxu1 %vm382_vm1, %v3687_v4 }
 0x245   : > { %6975 = vmatprep.mubr.msk.f32.mxu1 %vm382_vm1, %v3688_v49  ;;  %v4066_v49 = vld [vmem:[#allocation2 + $0x98] sm:$0xff] }
 0x248   : > { %6976 = vmatmul.mubr.msk.f32.gmra.mrb[2].mxu1 %vm382_vm1, %v3689_v35 }
 0x249   : > { %6978 = vmatprep.mubr.msk.f32.mxu1 %vm382_vm1, %v3690_v52  ;;  %v4067_v52 = vld [vmem:[#allocation2 + $0xa0] sm:$0xff] }
 0x24c   : > { %6979 = vmatmul.mubr.msk.f32.gmra.mrb[4].mxu1 %vm382_vm1, %v3691_v50  ;;  %v7545_v50 = vld [vmem:[%s7691_s28 + $0x80] sm:$0xff] }
 0x24d   : > { %6981 = vmatprep.mubr.msk.f32.mxu1 %vm382_vm1, %v3692_v16  ;;  %v4069_v16 = vld [vmem:[#allocation2 + $0xb0] sm:$0xff] }
 0x250   : > { %6982 = vmatmul.mubr.msk.f32.gmra.mrb[6].mxu1 %vm382_vm1, %v3693_v6  ;;  %v7546_v6 = vld [vmem:[%s7691_s28 + $0x88] sm:$0xff] }
 0x251   : > { %6986 = vmatprep.mubr.msk.f32.mxu1 %vm382_vm1, %v8830_v9  ;;  %v7531_v9 = vld [vmem:[%s7691_s28 + $0x10] sm:$0xff] }
 0x252   : > { %v9156_v53 = vpop.f32.mrb[56].mxu0  ;;  %7089 = vmatprep.mubr.msk.f32.mxu0 %vm382_vm1, %v7531_v9  ;;  %v4071_v9 = vld [vmem:[#allocation2 + $0xc0] sm:$0xff] }
 0x253   : > { %v9159_v44 = vpop.f32.mrb[57].mxu0  ;;  %7090 = vmatmul.mubr.msk.f32.gmra.mrb[66].mxu0 %vm382_vm1, %v7532_v11  ;;  %v7548_v11 = vld [vmem:[%s7691_s28 + $0x98] sm:$0xff] }
 0x254   : > { %6987 = vmatmul.mubr.msk.f32.vlgmr.msra.gmra.mrb[8].mxu1 %vm382_vm1, %v8843_v7  ;;  %v4056_v7 = vld [vmem:[#allocation2 + $0x48] sm:$0xff]  ;;  %7092 = vmatprep.mubr.msk.f32.mxu0 %vm382_vm1, %v7533_v56  ;;  %v7549_v56 = vld [vmem:[%s7691_s28 + $0xa0] sm:$0xff] }
 0x255   : > { %6989 = vmatprep.mubr.msk.f32.mxu1 %vm382_vm1, %v4054_v54  ;;  %7035 = vmatpush3.msk.msra.mxu1 %vm479_vm0, %v9055_v26 }
 0x256   : > { %v9171_v31 = vpop.f32.mrb[58].mxu0 }
 0x257   : > { %v9174_v55 = vpop.f32.mrb[59].mxu0  ;;  %7093 = vmatmul.mubr.msk.f32.gmra.mrb[68].mxu0 %vm382_vm1, %v7534_v33 }
 0x258   : > { %6990 = vmatmul.mubr.msk.f32.gmra.mrb[10].mxu1 %vm382_vm1, %v8855_v14  ;;  %v7535_v14 = vld [vmem:[%s7691_s28 + $0x30] sm:$0xff] }
 0x259   : > { %6992 = vmatprep.mubr.msk.f32.mxu1 %vm382_vm1, %v4056_v7  ;;  %7095 = vmatprep.mubr.msk.f32.mxu0 %vm382_vm1, %v7535_v14  ;;  %v4072_v7 = vld [vmem:[#allocation2 + $0xc8] sm:$0xff] }
 0x25a   : > { %v9183_v26 = vpop.f32.mrb[60].mxu0  ;;  %v7550_v14 = vld [vmem:[%s7691_s28 + $0xa8] sm:$0xff] }
 0x25b   : > { %v9185_v23 = vpop.f32.mrb[61].mxu0  ;;  %7096 = vmatmul.mubr.msk.f32.gmra.mrb[70].mxu0 %vm382_vm1, %v7536_v62  ;;  %v7551_v62 = vld [vmem:[%s7691_s28 + $0xb0] sm:$0xff] }
 0x25c   : > { %6993 = vmatmul.mubr.msk.f32.gmra.mrb[12].mxu1 %vm382_vm1, %v4057_v58  ;;  %7098 = vmatprep.mubr.msk.f32.mxu0 %vm382_vm1, %v7537_v63 }
 0x25d   : > { %6995 = vmatprep.mubr.msk.f32.mxu1 %vm382_vm1, %v4058_v59  ;;  %v4073_v59 = vld [vmem:[#allocation2 + $0xd0] sm:$0xff] }
 0x25e   : > { %v9193_v8 = vpop.f32.mrb[62].mxu0 }
 0x25f   : > { %v9195_v60 = vpop.f32.mrb[63].mxu0  ;;  %7099 = vmatmul.mubr.msk.f32.gmra.mrb[72].mxu0 %vm382_vm1, %v7538_v39  ;;  %v7552_v39 = vld [vmem:[%s7691_s28 + $0xb8] sm:$0xff] }
 0x260   : > { %6996 = vmatmul.mubr.msk.f32.gmra.mrb[14].mxu1 %vm382_vm1, %v4059_v41  ;;  %7101 = vmatprep.mubr.msk.f32.mxu0 %vm382_vm1, %v7539_v37  ;;  %v4074_v41 = vld [vmem:[#allocation2 + $0xd8] sm:$0xff]  ;;  %v7553_v37 = vld [vmem:[%s7691_s28 + $0xc0] sm:$0xff] }
 0x261   : > { %6998 = vmatprep.mubr.msk.f32.mxu1 %vm382_vm1, %v4060_v5 }
 0x262   : > { %v9203_v10 = vpop.f32.mrb[32].mxu0 }
 0x263   : > { %v9205_v0 = vpop.f32.mrb[33].mxu0  ;;  %7102 = vmatmul.mubr.msk.f32.gmra.mrb[74].mxu0 %vm382_vm1, %v7540_v48 }
 0x264   : > { %6999 = vmatmul.mubr.msk.f32.gmra.mrb[16].mxu1 %vm382_vm1, %v4061_v36  ;;  %7104 = vmatprep.mubr.msk.f32.mxu0 %vm382_vm1, %v7541_v29  ;;  %v4075_v36 = vld [vmem:[#allocation2 + $0xe0] sm:$0xff]  ;;  %v7554_v29 = vld [vmem:[%s7691_s28 + $0xc8] sm:$0xff] }
 0x265   : > { %7001 = vmatprep.mubr.msk.f32.mxu1 %vm382_vm1, %v4062_v1  ;;  %v4076_v1 = vld [vmem:[#allocation2 + $0xe8] sm:$0xff] }
 0x266   : > { %v9213_v46 = vpop.f32.mrb[34].mxu0 }
 0x267   : > { %v9215_v2 = vpop.f32.mrb[35].mxu0  ;;  %7105 = vmatmul.mubr.msk.f32.gmra.mrb[76].mxu0 %vm382_vm1, %v7542_v30  ;;  %v7555_v30 = vld [vmem:[%s7691_s28 + $0xd0] sm:$0xff] }
 0x268   : > { %7002 = vmatmul.mubr.msk.f32.gmra.mrb[18].mxu1 %vm382_vm1, %v4063_v47  ;;  %7107 = vmatprep.mubr.msk.f32.mxu0 %vm382_vm1, %v7543_v21 }
 0x269   : > { %7004 = vmatprep.mubr.msk.f32.mxu1 %vm382_vm1, %v4064_v3  ;;  %v4077_v3 = vld [vmem:[#allocation2 + $0xf0] sm:$0xff] }
 0x26a   : > { %v9223_v15 = vpop.f32.mrb[36].mxu0 }
 0x26b   : > { %v9225_v4 = vpop.f32.mrb[37].mxu0  ;;  %7108 = vmatmul.mubr.msk.f32.gmra.mrb[78].mxu0 %vm382_vm1, %v7544_v43  ;;  %v7556_v43 = vld [vmem:[%s7691_s28 + $0xd8] sm:$0xff] }
 0x26c   : > { %7005 = vmatmul.mubr.msk.f32.gmra.mrb[20].mxu1 %vm382_vm1, %v4065_v28  ;;  %7110 = vmatprep.mubr.msk.f32.mxu0 %vm382_vm1, %v7545_v50  ;;  %v4078_v28 = vld [vmem:[#allocation2 + $0xf8] sm:$0xff] }
 0x26d   : > { %7007 = vmatprep.mubr.msk.f32.mxu1 %vm382_vm1, %v4066_v49 }
 0x26e   : > { %v9233_v35 = vpop.f32.mrb[38].mxu0 }
 0x26f   : > { %v9235_v61 = vpop.f32.mrb[39].mxu0  ;;  %7111 = vmatmul.mubr.msk.f32.gmra.mrb[80].mxu0 %vm382_vm1, %v7546_v6 }
 0x270   : > { %7008 = vmatmul.mubr.msk.f32.gmra.mrb[22].mxu1 %vm382_vm1, %v4067_v52  ;;  %7113 = vmatprep.mubr.msk.f32.mxu0 %vm382_vm1, %v7547_v13  ;;  %v4079_v52 = vld [vmem:[#allocation2 + $0x100] sm:$0xff]  ;;  %v7559_v13 = vld [vmem:[%s7691_s28 + $0xf0] sm:$0xff] }
 0x271   : > { %7010 = vmatprep.mubr.msk.f32.mxu1 %vm382_vm1, %v4068_v38  ;;  %v7557_v38 = vld [vmem:[%s7691_s28 + $0xe0] sm:$0xff] }
 0x272   : > { %v9243_v42 = vpop.f32.mrb[40].mxu0 }
 0x273   : > { %v9245_v51 = vpop.f32.mrb[41].mxu0  ;;  %7114 = vmatmul.mubr.msk.f32.gmra.mrb[82].mxu0 %vm382_vm1, %v7548_v11 }
 0x274   : > { %7011 = vmatmul.mubr.msk.f32.gmra.mrb[24].mxu1 %vm382_vm1, %v4069_v16  ;;  %7116 = vmatprep.mubr.msk.f32.mxu0 %vm382_vm1, %v7549_v56  ;;  %v4082_v16 = vld [vmem:[#allocation2 + $0x118] sm:$0xff] }
 0x275   : > { %7013 = vmatprep.mubr.msk.f32.mxu1 %vm382_vm1, %v4070_v20  ;;  %v7558_v20 = vld [vmem:[%s7691_s28 + $0xe8] sm:$0xff]  ;;  %v9941_v56 = vld [vmem:[#allocation51_spill] sm:$0xff] }
 0x276   : > { %v9253_v25 = vpop.f32.mrb[42].mxu0 }
 0x277   : > { %v9255_v54 = vpop.f32.mrb[43].mxu0  ;;  %7117 = vmatmul.mubr.msk.f32.gmra.mrb[84].mxu0 %vm382_vm1, %v7550_v14  ;;  %v9944_v14 = vld [vmem:[#allocation65_spill] sm:$0xff] }
 0x278   : > { %7014 = vmatmul.mubr.msk.f32.gmra.mrb[26].mxu1 %vm382_vm1, %v4071_v9  ;;  %7119 = vmatprep.mubr.msk.f32.mxu0 %vm382_vm1, %v7551_v62  ;;  %v4083_v9 = vld [vmem:[#allocation2 + $0x120] sm:$0xff]  ;;  %v9946_v62 = vld [vmem:[#allocation75_spill] sm:$0xff] }
 0x279   : > { %7016 = vmatprep.mubr.msk.f32.mxu1 %vm382_vm1, %v4072_v7  ;;  %v7560_v7 = vld [vmem:[%s7691_s28 + $0xf8] sm:$0xff]  ;;  %s5723_s28 = sld [smem:[#allocation3 + $0x1]] }
 0x27a   : > { %v9263_v58 = vpop.f32.mrb[44].mxu0 }
 0x27b   : > { %v9265_v33 = vpop.f32.mrb[45].mxu0  ;;  %7120 = vmatmul.mubr.msk.f32.gmra.mrb[86].mxu0 %vm382_vm1, %v7552_v39  ;;  %v9948_v39 = vld [vmem:[#allocation83_spill] sm:$0xff] }
 0x27c   : > { %7017 = vmatmul.mubr.msk.f32.gmra.mrb[28].mxu1 %vm382_vm1, %v4073_v59  ;;  %7122 = vmatprep.mubr.msk.f32.mxu0 %vm382_vm1, %v7553_v37  ;;  %v9942_v59 = vld [vmem:[#allocation57_spill] sm:$0xff]  ;;  %v9950_v37 = vld [vmem:[#allocation92_spill] sm:$0xff] }
 0x27d   : > { %7019 = vmatprep.mubr.msk.f32.mxu1 %vm382_vm1, %v4074_v41  ;;  %v9945_v41 = vld [vmem:[#allocation66_spill] sm:$0xff] }
 0x27e   : > { %v9273_v5 = vpop.f32.mrb[46].mxu0 }
 0x27f   : > { %v9275_v63 = vpop.f32.mrb[47].mxu0  ;;  %7123 = vmatmul.mubr.msk.f32.gmra.mrb[88].mxu0 %vm382_vm1, %v7554_v29  ;;  %v9952_v29 = vld [vmem:[#allocation101_spill] sm:$0xff] }
 0x280   : > { %7020 = vmatmul.mubr.msk.f32.gmra.mrb[30].mxu1 %vm382_vm1, %v4075_v36  ;;  %7125 = vmatprep.mubr.msk.f32.mxu0 %vm382_vm1, %v7555_v30  ;;  %v9947_v36 = vld [vmem:[#allocation76_spill] sm:$0xff]  ;;  %v9954_v30 = vld [vmem:[#allocation110_spill] sm:$0xff] }
 0x281   : > { %7022 = vmatprep.mubr.msk.f32.mxu1 %vm382_vm1, %v4076_v1  ;;  %v9949_v1 = vld [vmem:[#allocation84_spill] sm:$0xff] }
 0x282   : > { %v9283_v47 = vpop.f32.mrb[48].mxu0 }
 0x283   : > { %v9285_v48 = vpop.f32.mrb[49].mxu0  ;;  %7126 = vmatmul.mubr.msk.f32.gmra.mrb[90].mxu0 %vm382_vm1, %v7556_v43  ;;  %v9956_v43 = vld [vmem:[#allocation119_spill] sm:$0xff] }
 0x284   : > { %7023 = vmatmul.mubr.msk.f32.gmra.mrb[0].mxu1 %vm382_vm1, %v4077_v3  ;;  %7128 = vmatprep.mubr.msk.f32.mxu0 %vm382_vm1, %v7557_v38  ;;  %v9951_v3 = vld [vmem:[#allocation93_spill] sm:$0xff]  ;;  %v9957_v38 = vld [vmem:[#allocation120_spill] sm:$0xff] }
 0x285   : > { %7025 = vmatprep.mubr.msk.f32.mxu1 %vm382_vm1, %v4078_v28  ;;  %v9953_v28 = vld [vmem:[#allocation102_spill] sm:$0xff] }
 0x286   : > { %v9293_v49 = vpop.f32.mrb[50].mxu0 }
 0x287   : > { %v9295_v21 = vpop.f32.mrb[51].mxu0  ;;  %7129 = vmatmul.mubr.msk.f32.gmra.mrb[92].mxu0 %vm382_vm1, %v7558_v20  ;;  %v9959_v20 = vld [vmem:[#allocation129_spill] sm:$0xff] }
 0x288   : > { %7026 = vmatmul.mubr.msk.f32.gmra.mrb[2].mxu1 %vm382_vm1, %v4079_v52  ;;  %7131 = vmatprep.mubr.msk.f32.mxu0 %vm382_vm1, %v7559_v13  ;;  %v9955_v52 = vld [vmem:[#allocation111_spill] sm:$0xff] }
 0x289   : > { %7028 = vmatprep.mubr.msk.f32.mxu1 %vm382_vm1, %v8955_v18  ;;  %v9960_v13 = vld [vmem:[#allocation135_spill] sm:$0xff] }
 0x28a   : > { %v9304_v50 = vpop.f32.mrb[52].mxu0 }
 0x28b   : > { %v9306_v6 = vpop.f32.mrb[53].mxu0  ;;  %7132 = vmatmul.mubr.msk.f32.gmra.mrb[94].mxu0 %vm382_vm1, %v7560_v7  ;;  %v9962_v7 = vld [vmem:[#allocation140_spill] sm:$0xff] }
 0x28c   : > { %7029 = vmatmul.mubr.msk.f32.gmra.mrb[4].mxu1 %vm382_vm1, %v8959_v19  ;;  %v9943_v19 = vld [vmem:[#allocation58_spill] sm:$0xff] }
 0x28d   : > { %7031 = vmatprep.mubr.msk.f32.mxu1 %vm382_vm1, %v4082_v16  ;;  %v9958_v16 = vld [vmem:[#allocation128_spill] sm:$0xff] }
 0x28e   : > { %v9315_v11 = vpop.f32.mrb[54].mxu0 }
 0x28f   : > { %v9317_v18 = vpop.f32.mrb[55].mxu0 }
 0x290   : > { %7032 = vmatmul.mubr.msk.f32.gmra.mrb[6].mxu1 %vm382_vm1, %v4083_v9  ;;  %v9961_v9 = vld [vmem:[#allocation136_spill] sm:$0xff] }
 0x291   : > { %7036 = vmatprep.mubr.msk.f32.mxu1 %vm382_vm1, %v9941_v56  ;;  %v4466_v56 = vld [vmem:[#allocation2 + $0xe9] sm:$0xff] }
 0x294   : > { %7037 = vmatmul.mubr.msk.f32.vlgmr.msra.gmra.mrb[8].mxu1 %vm382_vm1, %v9942_v59  ;;  %v9963_v59 = vld [vmem:[#allocation141_spill] sm:$0xff] }
 0x295   : > { %7039 = vmatprep.mubr.msk.f32.mxu1 %vm382_vm1, %v9943_v19  ;;  %v4498_v19 = vmul.f32 %v4466_v56, %v9900_v22  ;;  %v4502_v22 = vmul.f32 %v9031_v34, %v9906_v24  ;;  %v9388_v34 = vstv %s5723_s28 }
 0x298   : > { %7040 = vmatmul.mubr.msk.f32.gmra.mrb[10].mxu1 %vm382_vm1, %v9944_v14  ;;  %v4467_v14 = vld [vmem:[#allocation2 + $0xf1] sm:$0xff] }
 0x299   : > { %7042 = vmatprep.mubr.msk.f32.mxu1 %vm382_vm1, %v9945_v41  ;;  %v9964_v41 = vld [vmem:[#allocation143_spill] sm:$0xff] }
 0x29c   : > { %7043 = vmatmul.mubr.msk.f32.gmra.mrb[12].mxu1 %vm382_vm1, %v9946_v62  ;;  %v4468_v62 = vld [vmem:[#allocation2 + $0xf9] sm:$0xff] }
 0x29d   : > { %7045 = vmatprep.mubr.msk.f32.mxu1 %vm382_vm1, %v9947_v36  ;;  %v4499_v36 = vmul.f32 %v4467_v14, %v7957_v40  ;;  %v4503_v40 = vmul.f32 %v9038_v57, %v9907_v32 }
 0x2a0   : > { %7046 = vmatmul.mubr.msk.f32.gmra.mrb[14].mxu1 %vm382_vm1, %v9948_v39  ;;  %v4500_v39 = vmul.f32 %v4468_v62, %v9902_v27 }
 0x2a1   : > { %7048 = vmatprep.mubr.msk.f32.mxu1 %vm382_vm1, %v9949_v1  ;;  %v4469_v1 = vld [vmem:[#allocation2 + $0x101] sm:$0xff] }
 0x2a4   : > { %7049 = vmatmul.mubr.msk.f32.gmra.mrb[16].mxu1 %vm382_vm1, %v9950_v37  ;;  %v4501_v37 = vmul.f32 %v4469_v1, %v9904_v12 }
 0x2a5   : > { %7051 = vmatprep.mubr.msk.f32.mxu1 %vm382_vm1, %v9951_v3  ;;  %v4472_v3 = vld [vmem:[#allocation2 + $0x119] sm:$0xff] }
 0x2a6   : > { %v4504_v27 = vmul.f32 %v4472_v3, %v9908_v17 }
 0x2a8   : > { %7052 = vmatmul.mubr.msk.f32.gmra.mrb[18].mxu1 %vm382_vm1, %v9952_v29  ;;  %v4473_v29 = vld [vmem:[#allocation2 + $0x121] sm:$0xff] }
 0x2a9   : > { %7054 = vmatprep.mubr.msk.f32.mxu1 %vm382_vm1, %v9953_v28  ;;  %v4505_v12 = vmul.f32 %v4473_v29, %v7967_v45 }
 0x2ac   : > { %7055 = vmatmul.mubr.msk.f32.gmra.mrb[20].mxu1 %vm382_vm1, %v9954_v30 }
 0x2ad   : > { %7057 = vmatprep.mubr.msk.f32.mxu1 %vm382_vm1, %v9955_v52 }
 0x2b0   : > { %7058 = vmatmul.mubr.msk.f32.gmra.mrb[22].mxu1 %vm382_vm1, %v9956_v43 }
 0x2b1   : > { %7060 = vmatprep.mubr.msk.f32.mxu1 %vm382_vm1, %v9957_v38 }
 0x2b4   : > { %7061 = vmatmul.mubr.msk.f32.gmra.mrb[24].mxu1 %vm382_vm1, %v9958_v16 }
 0x2b5   : > { %7063 = vmatprep.mubr.msk.f32.mxu1 %vm382_vm1, %v9959_v20 }
 0x2b8   : > { %7064 = vmatmul.mubr.msk.f32.gmra.mrb[26].mxu1 %vm382_vm1, %v9960_v13 }
 0x2b9   : > { %7066 = vmatprep.mubr.msk.f32.mxu1 %vm382_vm1, %v9961_v9 }
 0x2bc   : > { %7067 = vmatmul.mubr.msk.f32.gmra.mrb[28].mxu1 %vm382_vm1, %v9962_v7 }
 0x2bd   : > { %7069 = vmatprep.mubr.msk.f32.mxu1 %vm382_vm1, %v9963_v59 }
 0x2c0   : > { %7070 = vmatmul.mubr.msk.f32.gmra.mrb[30].mxu1 %vm382_vm1, %v9964_v41 }
 0x2c1   : > { %7072 = vmatprep.mubr.msk.f32.mxu1 %vm382_vm1, %v4498_v19 }
 0x2c4   : > { %7073 = vmatmul.mubr.msk.f32.gmra.mrb[0].mxu1 %vm382_vm1, %v4499_v36 }
 0x2c5   : > { %7075 = vmatprep.mubr.msk.f32.mxu1 %vm382_vm1, %v4500_v39 }
 0x2c8   : > { %7076 = vmatmul.mubr.msk.f32.gmra.mrb[2].mxu1 %vm382_vm1, %v4501_v37 }
 0x2c9   : > { %7078 = vmatprep.mubr.msk.f32.mxu1 %vm382_vm1, %v4502_v22 }
 0x2cc   : > { %7079 = vmatmul.mubr.msk.f32.gmra.mrb[4].mxu1 %vm382_vm1, %v4503_v40 }
 0x2cd   : > { %7081 = vmatprep.mubr.msk.f32.mxu1 %vm382_vm1, %v4504_v27 }
 0x2d0   : > { %7082 = vmatmul.mubr.msk.f32.gmra.mrb[6].mxu1 %vm382_vm1, %v4505_v12 }
 0x367   : > { %v7038_v24 = vpop.f32.mrb[8].mxu1 }
 0x368   : > { %v7218_v28 = vadd.f32 %v7038_v24, %v9203_v10  ;;  %v4673_v30 = vpop.f32.mrb[9].mxu1 }
 0x369   : > { %v7219_v32 = vadd.f32 %v4673_v30, %v9205_v0 }
 0x36a   : > { %v4898_v17 = vmul.f32 %v7218_v28, %v9388_v34  ;;  %vm4865_vm0 = vcmp.ge.f32.partialorder %v7218_v28, 0.0 }
 0x36b   : > { %vm4864_vm6 = vcmp.ge.f32.partialorder %v7219_v32, 0.0  ;;  %v4897_v57 = vmul.f32 %v7219_v32, %v9388_v34  ;;  %v7041_v52 = vpop.f32.mrb[10].mxu1 }
 0x36c   : > { %v7220_v45 = vadd.f32 %v7041_v52, %v9213_v46  ;;  %v4683_v43 = vpop.f32.mrb[11].mxu1  ;;  %v4930_v20 = vsel %vm4865_vm0, %v7218_v28, %v4898_v17 }
 0x36d   : > { %v7221_v38 = vadd.f32 %v4683_v43, %v9215_v2  ;;  %v4929_v16 = vsel %vm4864_vm6, %v7219_v32, %v4897_v57 }
 0x36e   : > { %v4900_v13 = vmul.f32 %v7220_v45, %v9388_v34  ;;  %7136 = vmatprep.mubr.msk.f32.mxu0 %vm382_vm1, %v4929_v16  ;;  %vm4867_vm7 = vcmp.ge.f32.partialorder %v7220_v45, 0.0 }
 0x36f   : > { %vm4866_vm8 = vcmp.ge.f32.partialorder %v7221_v38, 0.0  ;;  %v4899_v10 = vmul.f32 %v7221_v38, %v9388_v34  ;;  %v7044_v0 = vpop.f32.mrb[12].mxu1  ;;  %7137 = vmatmul.mubr.msk.f32.vlgmr.msra.gmra.mrb[64].mxu0 %vm382_vm1, %v4930_v20 }
 0x370   : > { %v7222_v9 = vadd.f32 %v7044_v0, %v9223_v15  ;;  %v4693_v7 = vpop.f32.mrb[13].mxu1  ;;  %v4932_v59 = vsel %vm4867_vm7, %v7220_v45, %v4900_v13 }
 0x371   : > { %v7223_v46 = vadd.f32 %v4693_v7, %v9225_v4  ;;  %v4931_v56 = vsel %vm4866_vm8, %v7221_v38, %v4899_v10 }
 0x372   : > { %v4902_v2 = vmul.f32 %v7222_v9, %v9388_v34  ;;  %7139 = vmatprep.mubr.msk.f32.mxu0 %vm382_vm1, %v4931_v56  ;;  %vm4869_vm9 = vcmp.ge.f32.partialorder %v7222_v9, 0.0 }
 0x373   : > { %vm4868_vm10 = vcmp.ge.f32.partialorder %v7223_v46, 0.0  ;;  %v4901_v19 = vmul.f32 %v7223_v46, %v9388_v34  ;;  %v7047_v14 = vpop.f32.mrb[14].mxu1  ;;  %7140 = vmatmul.mubr.msk.f32.gmra.mrb[66].mxu0 %vm382_vm1, %v4932_v59 }
 0x374   : > { %v7224_v41 = vadd.f32 %v7047_v14, %v9233_v35  ;;  %v4703_v62 = vpop.f32.mrb[15].mxu1  ;;  %v4934_v39 = vsel %vm4869_vm9, %v7222_v9, %v4902_v2 }
 0x375   : > { %v7225_v15 = vadd.f32 %v4703_v62, %v9235_v61  ;;  %v4933_v36 = vsel %vm4868_vm10, %v7223_v46, %v4901_v19 }
 0x376   : > { %v4904_v4 = vmul.f32 %v7224_v41, %v9388_v34  ;;  %7142 = vmatprep.mubr.msk.f32.mxu0 %vm382_vm1, %v4933_v36  ;;  %vm4871_vm11 = vcmp.ge.f32.partialorder %v7224_v41, 0.0 }
 0x377   : > { %vm4870_vm12 = vcmp.ge.f32.partialorder %v7225_v15, 0.0  ;;  %v4903_v1 = vmul.f32 %v7225_v15, %v9388_v34  ;;  %v7050_v37 = vpop.f32.mrb[16].mxu1  ;;  %7143 = vmatmul.mubr.msk.f32.gmra.mrb[68].mxu0 %vm382_vm1, %v4934_v39 }
 0x378   : > { %v7226_v22 = vadd.f32 %v7050_v37, %v9243_v42  ;;  %v4713_v3 = vpop.f32.mrb[17].mxu1  ;;  %v4936_v27 = vsel %vm4871_vm11, %v7224_v41, %v4904_v4 }
 0x379   : > { %v7227_v35 = vadd.f32 %v4713_v3, %v9245_v51  ;;  %v4935_v40 = vsel %vm4870_vm12, %v7225_v15, %v4903_v1 }
 0x37a   : > { %v4906_v61 = vmul.f32 %v7226_v22, %v9388_v34  ;;  %7145 = vmatprep.mubr.msk.f32.mxu0 %vm382_vm1, %v4935_v40  ;;  %vm4873_vm13 = vcmp.ge.f32.partialorder %v7226_v22, 0.0 }
 0x37b   : > { %vm4872_vm14 = vcmp.ge.f32.partialorder %v7227_v35, 0.0  ;;  %v4905_v29 = vmul.f32 %v7227_v35, %v9388_v34  ;;  %v7053_v12 = vpop.f32.mrb[18].mxu1  ;;  %7146 = vmatmul.mubr.msk.f32.gmra.mrb[70].mxu0 %vm382_vm1, %v4936_v27 }
 0x37c   : > { %v7228_v24 = vadd.f32 %v7053_v12, %v9253_v25  ;;  %v4723_v28 = vpop.f32.mrb[19].mxu1  ;;  %v4938_v32 = vsel %vm4873_vm13, %v7226_v22, %v4906_v61 }
 0x37d   : > { %v7229_v42 = vadd.f32 %v4723_v28, %v9255_v54  ;;  %v4937_v30 = vsel %vm4872_vm14, %v7227_v35, %v4905_v29 }
 0x37e   : > { %v4908_v51 = vmul.f32 %v7228_v24, %v9388_v34  ;;  %7148 = vmatprep.mubr.msk.f32.mxu0 %vm382_vm1, %v4937_v30  ;;  %vm4875_vm15 = vcmp.ge.f32.partialorder %v7228_v24, 0.0 }
 0x37f   : > { %vm4874_vm2 = vcmp.ge.f32.partialorder %v7229_v42, 0.0  ;;  %v4907_v17 = vmul.f32 %v7229_v42, %v9388_v34  ;;  %v7056_v57 = vpop.f32.mrb[20].mxu1  ;;  %7149 = vmatmul.mubr.msk.f32.gmra.mrb[72].mxu0 %vm382_vm1, %v4938_v32 }
 0x380   : > { %v7230_v52 = vadd.f32 %v7056_v57, %v9263_v58  ;;  %v4733_v45 = vpop.f32.mrb[21].mxu1  ;;  %v4940_v38 = vsel %vm4875_vm15, %v7228_v24, %v4908_v51 }
 0x381   : > { %v7231_v25 = vadd.f32 %v4733_v45, %v9265_v33  ;;  %v4939_v43 = vsel %vm4874_vm2, %v7229_v42, %v4907_v17 }
 0x382   : > { %v4910_v54 = vmul.f32 %v7230_v52, %v9388_v34  ;;  %7151 = vmatprep.mubr.msk.f32.mxu0 %vm382_vm1, %v4939_v43  ;;  %vm4877_vm3 = vcmp.ge.f32.partialorder %v7230_v52, 0.0 }
 0x383   : > { %vm4876_vm4 = vcmp.ge.f32.partialorder %v7231_v25, 0.0  ;;  %v4909_v16 = vmul.f32 %v7231_v25, %v9388_v34  ;;  %v7059_v20 = vpop.f32.mrb[22].mxu1  ;;  %7152 = vmatmul.mubr.msk.f32.gmra.mrb[74].mxu0 %vm382_vm1, %v4940_v38 }
 0x384   : > { %v7232_v13 = vadd.f32 %v7059_v20, %v9273_v5  ;;  %v4743_v10 = vpop.f32.mrb[23].mxu1  ;;  %v4942_v9 = vsel %vm4877_vm3, %v7230_v52, %v4910_v54 }
 0x385   : > { %v7233_v58 = vadd.f32 %v4743_v10, %v9275_v63  ;;  %v4941_v0 = vsel %vm4876_vm4, %v7231_v25, %v4909_v16 }
 0x386   : > { %v4912_v33 = vmul.f32 %v7232_v13, %v9388_v34  ;;  %7154 = vmatprep.mubr.msk.f32.mxu0 %vm382_vm1, %v4941_v0  ;;  %vm4879_vm5 = vcmp.ge.f32.partialorder %v7232_v13, 0.0 }
 0x387   : > { %vm4878_vm0 = vcmp.ge.f32.partialorder %v7233_v58, 0.0  ;;  %v4911_v7 = vmul.f32 %v7233_v58, %v9388_v34  ;;  %v7062_v46 = vpop.f32.mrb[24].mxu1  ;;  %7155 = vmatmul.mubr.msk.f32.gmra.mrb[76].mxu0 %vm382_vm1, %v4942_v9 }
 0x388   : > { %v7234_v56 = vadd.f32 %v7062_v46, %v9283_v47  ;;  %v4753_v2 = vpop.f32.mrb[25].mxu1  ;;  %v4944_v19 = vsel %vm4879_vm5, %v7232_v13, %v4912_v33 }
 0x389   : > { %v7235_v5 = vadd.f32 %v4753_v2, %v9285_v48  ;;  %v4943_v59 = vsel %vm4878_vm0, %v7233_v58, %v4911_v7 }
 0x38a   : > { %v4914_v63 = vmul.f32 %v7234_v56, %v9388_v34  ;;  %7157 = vmatprep.mubr.msk.f32.mxu0 %vm382_vm1, %v4943_v59  ;;  %vm4881_vm6 = vcmp.ge.f32.partialorder %v7234_v56, 0.0 }
 0x38b   : > { %vm4880_vm7 = vcmp.ge.f32.partialorder %v7235_v5, 0.0  ;;  %v4913_v14 = vmul.f32 %v7235_v5, %v9388_v34  ;;  %v7065_v41 = vpop.f32.mrb[26].mxu1  ;;  %7158 = vmatmul.mubr.msk.f32.gmra.mrb[78].mxu0 %vm382_vm1, %v4944_v19 }
 0x38c   : > { %v7236_v62 = vadd.f32 %v7065_v41, %v9293_v49  ;;  %v4763_v15 = vpop.f32.mrb[27].mxu1  ;;  %v4946_v4 = vsel %vm4881_vm6, %v7234_v56, %v4914_v63 }
 0x38d   : > { %v7237_v47 = vadd.f32 %v4763_v15, %v9295_v21  ;;  %v4945_v36 = vsel %vm4880_vm7, %v7235_v5, %v4913_v14 }
 0x38e   : > { %v4916_v48 = vmul.f32 %v7236_v62, %v9388_v34  ;;  %7160 = vmatprep.mubr.msk.f32.mxu0 %vm382_vm1, %v4945_v36  ;;  %vm4883_vm8 = vcmp.ge.f32.partialorder %v7236_v62, 0.0 }
 0x38f   : > { %vm4882_vm9 = vcmp.ge.f32.partialorder %v7237_v47, 0.0  ;;  %v4915_v39 = vmul.f32 %v7237_v47, %v9388_v34  ;;  %v7068_v1 = vpop.f32.mrb[28].mxu1  ;;  %7161 = vmatmul.mubr.msk.f32.gmra.mrb[80].mxu0 %vm382_vm1, %v4946_v4 }
 0x390   : > { %v7238_v37 = vadd.f32 %v7068_v1, %v9304_v50  ;;  %v4773_v22 = vpop.f32.mrb[29].mxu1  ;;  %v4948_v35 = vsel %vm4883_vm8, %v7236_v62, %v4916_v48 }
 0x391   : > { %v7239_v49 = vadd.f32 %v4773_v22, %v9306_v6  ;;  %v4947_v3 = vsel %vm4882_vm9, %v7237_v47, %v4915_v39 }
 0x392   : > { %v4918_v21 = vmul.f32 %v7238_v37, %v9388_v34  ;;  %7163 = vmatprep.mubr.msk.f32.mxu0 %vm382_vm1, %v4947_v3  ;;  %vm4885_vm10 = vcmp.ge.f32.partialorder %v7238_v37, 0.0 }
 0x393   : > { %vm4884_vm11 = vcmp.ge.f32.partialorder %v7239_v49, 0.0  ;;  %v4917_v40 = vmul.f32 %v7239_v49, %v9388_v34  ;;  %v7071_v61 = vpop.f32.mrb[30].mxu1  ;;  %7164 = vmatmul.mubr.msk.f32.gmra.mrb[82].mxu0 %vm382_vm1, %v4948_v35 }
 0x394   : > { %v7240_v27 = vadd.f32 %v7071_v61, %v9315_v11  ;;  %v4783_v29 = vpop.f32.mrb[31].mxu1  ;;  %v4950_v24 = vsel %vm4885_vm10, %v7238_v37, %v4918_v21 }
 0x395   : > { %v7241_v50 = vadd.f32 %v4783_v29, %v9317_v18  ;;  %v4949_v12 = vsel %vm4884_vm11, %v7239_v49, %v4917_v40 }
 0x396   : > { %v4920_v6 = vmul.f32 %v7240_v27, %v9388_v34  ;;  %7166 = vmatprep.mubr.msk.f32.mxu0 %vm382_vm1, %v4949_v12  ;;  %vm4887_vm12 = vcmp.ge.f32.partialorder %v7240_v27, 0.0 }
 0x397   : > { %vm4886_vm13 = vcmp.ge.f32.partialorder %v7241_v50, 0.0  ;;  %v4919_v28 = vmul.f32 %v7241_v50, %v9388_v34  ;;  %v7074_v42 = vpop.f32.mrb[0].mxu1  ;;  %7167 = vmatmul.mubr.msk.f32.gmra.mrb[84].mxu0 %vm382_vm1, %v4950_v24 }
 0x398   : > { %v7242_v30 = vadd.f32 %v7074_v42, %v9156_v53  ;;  %v4793_v51 = vpop.f32.mrb[1].mxu1  ;;  %v4952_v17 = vsel %vm4887_vm12, %v7240_v27, %v4920_v6 }
 0x399   : > { %v7243_v11 = vadd.f32 %v4793_v51, %v9159_v44  ;;  %v4951_v32 = vsel %vm4886_vm13, %v7241_v50, %v4919_v28 }
 0x39a   : > { %v4922_v18 = vmul.f32 %v7242_v30, %v9388_v34  ;;  %7169 = vmatprep.mubr.msk.f32.mxu0 %vm382_vm1, %v4951_v32  ;;  %vm4889_vm14 = vcmp.ge.f32.partialorder %v7242_v30, 0.0 }
 0x39b   : > { %vm4888_vm15 = vcmp.ge.f32.partialorder %v7243_v11, 0.0  ;;  %v4921_v57 = vmul.f32 %v7243_v11, %v9388_v34  ;;  %v7077_v52 = vpop.f32.mrb[2].mxu1  ;;  %7170 = vmatmul.mubr.msk.f32.gmra.mrb[86].mxu0 %vm382_vm1, %v4952_v17 }
 0x39c   : > { %v7244_v45 = vadd.f32 %v7077_v52, %v9171_v31  ;;  %v4803_v25 = vpop.f32.mrb[3].mxu1  ;;  %v4954_v54 = vsel %vm4889_vm14, %v7242_v30, %v4922_v18 }
 0x39d   : > { %v7245_v53 = vadd.f32 %v4803_v25, %v9174_v55  ;;  %v4953_v43 = vsel %vm4888_vm15, %v7243_v11, %v4921_v57 }
 0x39e   : > { %v4924_v44 = vmul.f32 %v7244_v45, %v9388_v34  ;;  %7172 = vmatprep.mubr.msk.f32.mxu0 %vm382_vm1, %v4953_v43  ;;  %vm4891_vm2 = vcmp.ge.f32.partialorder %v7244_v45, 0.0 }
 0x39f   : > { %vm4890_vm3 = vcmp.ge.f32.partialorder %v7245_v53, 0.0  ;;  %v4923_v38 = vmul.f32 %v7245_v53, %v9388_v34  ;;  %v7080_v16 = vpop.f32.mrb[4].mxu1  ;;  %7173 = vmatmul.mubr.msk.f32.gmra.mrb[88].mxu0 %vm382_vm1, %v4954_v54 }
 0x3a0   : > { %v7246_v20 = vadd.f32 %v7080_v16, %v9183_v26  ;;  %v4813_v13 = vpop.f32.mrb[5].mxu1  ;;  %v4956_v58 = vsel %vm4891_vm2, %v7244_v45, %v4924_v44 }
 0x3a1   : > { %v7247_v31 = vadd.f32 %v4813_v13, %v9185_v23  ;;  %v4955_v10 = vsel %vm4890_vm3, %v7245_v53, %v4923_v38 }
 0x3a2   : > { %v4926_v55 = vmul.f32 %v7246_v20, %v9388_v34  ;;  %7175 = vmatprep.mubr.msk.f32.mxu0 %vm382_vm1, %v4955_v10  ;;  %vm4893_vm4 = vcmp.ge.f32.partialorder %v7246_v20, 0.0  ;;  %v5518_v10 = vld [vmem:[%s9562_s3 + $0x18] sm:$0xff] }
 0x3a3   : > { %vm4892_vm5 = vcmp.ge.f32.partialorder %v7247_v31, 0.0  ;;  %v4925_v0 = vmul.f32 %v7247_v31, %v9388_v34  ;;  %v7083_v33 = vpop.f32.mrb[6].mxu1  ;;  %7176 = vmatmul.mubr.msk.f32.gmra.mrb[90].mxu0 %vm382_vm1, %v4956_v58  ;;  %v5520_v58 = vld [vmem:[%s9562_s3 + $0x28] sm:$0xff] }
 0x3a4   : > { %v7248_v9 = vadd.f32 %v7083_v33, %v9193_v8  ;;  %v4823_v7 = vpop.f32.mrb[7].mxu1  ;;  %v4958_v56 = vsel %vm4893_vm4, %v7246_v20, %v4926_v55  ;;  %v5516_v8 = vld [vmem:[%s9562_s3 + $0x8] sm:$0xff]  ;;  %v5517_v55 = vld [vmem:[%s9562_s3 + $0x10] sm:$0xff]  ;;  %v5522_v33 = vld [vmem:[%s9562_s3 + $0x38] sm:$0xff] }
 0x3a5   : > { %v7249_v26 = vadd.f32 %v4823_v7, %v9195_v60  ;;  %v4957_v46 = vsel %vm4892_vm5, %v7247_v31, %v4925_v0  ;;  %v5515_v31 = vld [vmem:[%s9562_s3] sm:$0xff]  ;;  %v5524_v7 = vld [vmem:[%s9562_s3 + $0x48] sm:$0xff] }
 0x3a6   : > { %v4928_v23 = vmul.f32 %v7248_v9, %v9388_v34  ;;  %7178 = vmatprep.mubr.msk.f32.mxu0 %vm382_vm1, %v4957_v46  ;;  %vm4895_vm0 = vcmp.ge.f32.partialorder %v7248_v9, 0.0  ;;  %v5519_v0 = vld [vmem:[%s9562_s3 + $0x20] sm:$0xff]  ;;  %v5526_v46 = vld [vmem:[%s9562_s3 + $0x58] sm:$0xff] }
 0x3a7   : > { %vm4894_vm6 = vcmp.ge.f32.partialorder %v7249_v26, 0.0  ;;  %v4927_v2 = vmul.f32 %v7249_v26, %v9388_v34  ;;  %7179 = vmatmul.mubr.msk.f32.gmra.mrb[92].mxu0 %vm382_vm1, %v4958_v56  ;;  %v5528_v56 = vld [vmem:[%s9562_s3 + $0x68] sm:$0xff] }
 0x3a8   : > { %v4960_v59 = vsel %vm4895_vm0, %v7248_v9, %v4928_v23  ;;  %v5521_v9 = vld [vmem:[%s9562_s3 + $0x30] sm:$0xff] }
 0x3a9   : > { %v4959_v5 = vsel %vm4894_vm6, %v7249_v26, %v4927_v2  ;;  %v5523_v26 = vld [vmem:[%s9562_s3 + $0x40] sm:$0xff]  ;;  %v5525_v23 = vld [vmem:[%s9562_s3 + $0x50] sm:$0xff] }
 0x3aa   : > { %7181 = vmatprep.mubr.msk.f32.mxu0 %vm382_vm1, %v4959_v5  ;;  %v5527_v2 = vld [vmem:[%s9562_s3 + $0x60] sm:$0xff]  ;;  %v5530_v5 = vld [vmem:[%s9562_s3 + $0x78] sm:$0xff] }
 0x3ab   : > { %7182 = vmatmul.mubr.msk.f32.gmra.mrb[94].mxu0 %vm382_vm1, %v4960_v59  ;;  %v5529_v59 = vld [vmem:[%s9562_s3 + $0x70] sm:$0xff]  ;;  %vm5636_vm1 = vcmask 64512  }
 0x3ac   : > { %5595 = vmatprep.mubr.f32.mxu0 %v5516_v8 }
 0x442   : > { %v7138_v60 = vpop.f32.mrb[64].mxu0 }
 0x443   : > { %v5356_v63 = vpop.f32.mrb[65].mxu0 }
 0x444   : > { %v7186_v19 = vpack.c.bf16 %v7138_v60, %v5356_v63 }
 0x446   : > { %v7141_v14 = vpop.f32.mrb[66].mxu0 }
 0x447   : > { %v5366_v41 = vpop.f32.mrb[67].mxu0 }
 0x448   : > { %v7190_v62 = vpack.c.bf16 %v7141_v14, %v5366_v41 }
 0x44a   : > { %v7144_v34 = vpop.f32.mrb[68].mxu0 }
 0x44b   : > { %v5376_v15 = vpop.f32.mrb[69].mxu0 }
 0x44c   : > { %v7194_v47 = vpack.c.bf16 %v7144_v34, %v5376_v15 }
 0x44e   : > { %v7147_v36 = vpop.f32.mrb[70].mxu0 }
 0x44f   : > { %v5386_v48 = vpop.f32.mrb[71].mxu0 }
 0x450   : > { %v7198_v4 = vpack.c.bf16 %v7147_v36, %v5386_v48 }
 0x452   : > { %v7150_v39 = vpop.f32.mrb[72].mxu0 }
 0x453   : > { %v5396_v1 = vpop.f32.mrb[73].mxu0 }
 0x454   : > { %v7202_v37 = vpack.c.bf16 %v7150_v39, %v5396_v1 }
 0x456   : > { %v7153_v22 = vpop.f32.mrb[74].mxu0 }
 0x457   : > { %v5406_v49 = vpop.f32.mrb[75].mxu0 }
 0x458   : > { %v7206_v3 = vpack.c.bf16 %v7153_v22, %v5406_v49 }
 0x45a   : > { %v7156_v21 = vpop.f32.mrb[76].mxu0 }
 0x45b   : > { %v5416_v35 = vpop.f32.mrb[77].mxu0 }
 0x45c   : > { %v7210_v40 = vpack.c.bf16 %v7156_v21, %v5416_v35 }
 0x45e   : > { %v7159_v61 = vpop.f32.mrb[78].mxu0 }
 0x45f   : > { %v5426_v27 = vpop.f32.mrb[79].mxu0 }
 0x460   : > { %v7214_v29 = vpack.c.bf16 %v7159_v61, %v5426_v27 }
 0x462   : > { %v7162_v50 = vpop.f32.mrb[80].mxu0 }
 0x463   : > { %v5436_v12 = vpop.f32.mrb[81].mxu0 }
 0x464   : > { %v7184_v6 = vpack.c.bf16 %v7162_v50, %v5436_v12 }
 0x466   : > { %v7165_v24 = vpop.f32.mrb[82].mxu0  ;;  %7185 = vmatprep.subr.bf16.mxu0 %v7184_v6 }
 0x467   : > { %v5446_v28 = vpop.f32.mrb[83].mxu0  ;;  %7187 = vmatpush3.bf16.msra.mxu0 %v7186_v19 }
 0x468   : > { %v7188_v42 = vpack.c.bf16 %v7165_v24, %v5446_v28 }
 0x46a   : > { %v7168_v30 = vpop.f32.mrb[84].mxu0  ;;  %7189 = vmatprep.subr.bf16.mxu0 %v7188_v42 }
 0x46b   : > { %v5456_v51 = vpop.f32.mrb[85].mxu0  ;;  %7191 = vmatpush3.bf16.msra.mxu0 %v7190_v62 }
 0x46c   : > { %v7192_v11 = vpack.c.bf16 %v7168_v30, %v5456_v51 }
 0x46e   : > { %v7171_v32 = vpop.f32.mrb[86].mxu0  ;;  %7193 = vmatprep.subr.bf16.mxu0 %v7192_v11 }
 0x46f   : > { %v5466_v18 = vpop.f32.mrb[87].mxu0  ;;  %7195 = vmatpush3.bf16.msra.mxu0 %v7194_v47 }
 0x470   : > { %v7196_v17 = vpack.c.bf16 %v7171_v32, %v5466_v18 }
 0x472   : > { %v7174_v57 = vpop.f32.mrb[88].mxu0  ;;  %7197 = vmatprep.subr.bf16.mxu0 %v7196_v17 }
 0x473   : > { %v5476_v52 = vpop.f32.mrb[89].mxu0  ;;  %7199 = vmatpush3.bf16.msra.mxu0 %v7198_v4 }
 0x474   : > { %v7200_v45 = vpack.c.bf16 %v7174_v57, %v5476_v52 }
 0x476   : > { %v7177_v25 = vpop.f32.mrb[90].mxu0  ;;  %7201 = vmatprep.subr.bf16.mxu0 %v7200_v45 }
 0x477   : > { %v5486_v53 = vpop.f32.mrb[91].mxu0  ;;  %7203 = vmatpush3.bf16.msra.mxu0 %v7202_v37 }
 0x478   : > { %v7204_v43 = vpack.c.bf16 %v7177_v25, %v5486_v53 }
 0x47a   : > { %v7180_v44 = vpop.f32.mrb[92].mxu0  ;;  %7205 = vmatprep.subr.bf16.mxu0 %v7204_v43 }
 0x47b   : > { %v5496_v54 = vpop.f32.mrb[93].mxu0  ;;  %7207 = vmatpush3.bf16.msra.mxu0 %v7206_v3 }
 0x47c   : > { %v7208_v38 = vpack.c.bf16 %v7180_v44, %v5496_v54 }
 0x47e   : > { %v7183_v16 = vpop.f32.mrb[94].mxu0  ;;  %7209 = vmatprep.subr.bf16.mxu0 %v7208_v38 }
 0x47f   : > { %v5506_v20 = vpop.f32.mrb[95].mxu0  ;;  %7211 = vmatpush3.bf16.msra.mxu0 %v7210_v40 }
 0x480   : > { %v7212_v13 = vpack.c.bf16 %v7183_v16, %v5506_v20 }
 0x482   : > { %7213 = vmatprep.subr.bf16.mxu0 %v7212_v13 }
 0x483   : > { %7215 = vmatpush3.bf16.msra.mxu0 %v7214_v29 }
 0x486   : > { %5596 = vmatmul.mubr.f32.vlgmr.msra.gmra.mrb[96].mxu0 %v5515_v31 }
 0x487   : > { %5600 = vmatprep.mubr.f32.mxu0 %v5518_v10 }
 0x48a   : > { %5601 = vmatmul.mubr.f32.gmra.mrb[98].mxu0 %v5517_v55 }
 0x48b   : > { %5605 = vmatprep.mubr.f32.mxu0 %v5520_v58 }
 0x48e   : > { %5606 = vmatmul.mubr.f32.gmra.mrb[100].mxu0 %v5519_v0 }
 0x48f   : > { %5610 = vmatprep.mubr.f32.mxu0 %v5522_v33 }
 0x492   : > { %5611 = vmatmul.mubr.f32.gmra.mrb[102].mxu0 %v5521_v9 }
 0x493   : > { %5615 = vmatprep.mubr.f32.mxu0 %v5524_v7 }
 0x496   : > { %5616 = vmatmul.mubr.f32.gmra.mrb[104].mxu0 %v5523_v26 }
 0x497   : > { %5620 = vmatprep.mubr.f32.mxu0 %v5526_v46 }
 0x49a   : > { %5621 = vmatmul.mubr.f32.gmra.mrb[106].mxu0 %v5525_v23 }
 0x49b   : > { %5625 = vmatprep.mubr.f32.mxu0 %v5528_v56 }
 0x49e   : > { %5626 = vmatmul.mubr.f32.gmra.mrb[108].mxu0 %v5527_v2 }
 0x49f   : > { %5630 = vmatprep.mubr.f32.mxu0 %v5530_v5 }
 0x4a2   : > { %5631 = vmatmul.mubr.f32.gmra.mrb[110].mxu0 %v5529_v59 }
 0x559   : > { %v6560_v8 = vpop.f32.mrb[96].mxu0 }
 0x55a   : > { %v6561_v60 = vpop.f32.mrb[97].mxu0 }
 0x55b   : > { %v6562_v63 = vadd.f32 %v6561_v60, %v6560_v8 }
 0x55d   : > { %5637 = vst.msk [vmem:[%s9538_s27] sm:$0xff] %vm5636_vm1, %v6562_v63  ;;  %v6563_v19 = vpop.f32.mrb[98].mxu0 }
 0x55e   : > { %v6564_v14 = vpop.f32.mrb[99].mxu0 }
 0x55f   : > { %v6565_v41 = vadd.f32 %v6564_v14, %v6563_v19 }
 0x561   : > { %5638 = vst.msk [vmem:[%s9538_s27 + $0x8] sm:$0xff] %vm5636_vm1, %v6565_v41  ;;  %v6566_v62 = vpop.f32.mrb[100].mxu0 }
 0x562   : > { %v6567_v34 = vpop.f32.mrb[101].mxu0 }
 0x563   : > { %v6568_v15 = vadd.f32 %v6567_v34, %v6566_v62 }
 0x565   : > { %5639 = vst.msk [vmem:[%s9538_s27 + $0x10] sm:$0xff] %vm5636_vm1, %v6568_v15  ;;  %v6569_v47 = vpop.f32.mrb[102].mxu0 }
 0x566   : > { %v6570_v36 = vpop.f32.mrb[103].mxu0 }
 0x567   : > { %v6571_v48 = vadd.f32 %v6570_v36, %v6569_v47 }
 0x569   : > { %5640 = vst.msk [vmem:[%s9538_s27 + $0x18] sm:$0xff] %vm5636_vm1, %v6571_v48  ;;  %v6572_v4 = vpop.f32.mrb[104].mxu0 }
 0x56a   : > { %v6573_v39 = vpop.f32.mrb[105].mxu0 }
 0x56b   : > { %v6574_v1 = vadd.f32 %v6573_v39, %v6572_v4 }
 0x56d   : > { %5641 = vst.msk [vmem:[%s9538_s27 + $0x20] sm:$0xff] %vm5636_vm1, %v6574_v1  ;;  %v6575_v37 = vpop.f32.mrb[106].mxu0 }
 0x56e   : > { %v6576_v22 = vpop.f32.mrb[107].mxu0 }
 0x56f   : > { %v6577_v49 = vadd.f32 %v6576_v22, %v6575_v37 }
 0x571   : > { %5642 = vst.msk [vmem:[%s9538_s27 + $0x28] sm:$0xff] %vm5636_vm1, %v6577_v49  ;;  %v6578_v3 = vpop.f32.mrb[108].mxu0 }
 0x572   : > { %v6579_v21 = vpop.f32.mrb[109].mxu0 }
 0x573   : > { %v6580_v35 = vadd.f32 %v6579_v21, %v6578_v3 }
 0x575   : > { %5643 = vst.msk [vmem:[%s9538_s27 + $0x30] sm:$0xff] %vm5636_vm1, %v6580_v35  ;;  %v6581_v40 = vpop.f32.mrb[110].mxu0 }
 0x576   : > { %v6582_v61 = vpop.f32.mrb[111].mxu0 }
 0x577   : > { %v6583_v27 = vadd.f32 %v6582_v61, %v6581_v40 }
 0x579   : > { %5644 = vst.msk [vmem:[%s9538_s27 + $0x38] sm:$0xff] %vm5636_vm1, %v6583_v27 }
 0x57a PF: > { %s20_s30 = sadd.s32 1, %s7586_s30  }
 0x57b   : > { %p17_p1 = scmp.ge.s32.totalorder %s20_s30, 4  }
 0x57d   :  { %19 = sbr.rel (!%p17_p1) target bundleno = 1 (0x1), region = 99 }
 0x584   :  { %5666 = vsyncpa [#allocation4], 1 }
 0x585   :  { %5668 = vsyncpa [#allocation4 + $0x1], 1 }

</bundles_post_ra>
